<compile_context>
chip_gen: v5e
topology: v5e:2x2
jax: 0.10.0
libtpu: 0.0.40
codegen_flags: <defaults>
</compile_context>

<pallas_src>
import functools
import math

import jax
import jax.numpy as jnp
from jax.experimental import pallas as pl
from jax.experimental.pallas import tpu as pltpu

_NEG_INF = -100000000.0  # same additive masking constant as the PyTorch code


# ---------------------------------------------------------------------------
# Helpers
# ---------------------------------------------------------------------------
def _default_vmem_limit():
    """~75% of physical VMEM: ~48 MiB on v7x, ~96 MiB on v5e/v6e (capped)."""
    try:
        cap = pltpu.get_tpu_info().vmem_capacity_bytes
        return min((cap * 3) // 4, 100 * 1024 * 1024)
    except Exception:
        return 48 * 1024 * 1024  # safe on every generation


def _pick_tile(n, blk, align=8):
    """Largest aligned tile == blk that divides n, else the full extent."""
    if n <= blk:
        return n
    blk -= blk % align
    if blk > 0 and n % blk == 0:
        return blk
    return n


def _weight_spec(shape, single_buffer):
    """BlockSpec for a grid-invariant weight block (constant index_map)."""
    index_map = lambda *_: (0,) * len(shape)
    if single_buffer:
        # Constant block -> one VMEM buffer is enough (halves its footprint).
        return pl.BlockSpec(shape, index_map, pipeline_mode=pl.Buffered(1))
    return pl.BlockSpec(shape, index_map)


# ---------------------------------------------------------------------------
# Kernels
# ---------------------------------------------------------------------------
def _proj_kernel(x_ref, *refs, num_heads, num_mats):
    """Head-major projections: out[m][0, n] = x @ w[m][n]."""
    w_refs, out_refs = refs[:num_mats], refs[num_mats:]
    x = x_ref[0]                                            # [t, E]
    for w_ref, o_ref in zip(w_refs, out_refs):
        for n in range(num_heads):                          # NH small, static
            o_ref[0, n] = jnp.dot(
                x, w_ref[n], preferred_element_type=jnp.float32
            ).astype(o_ref.dtype)


def _attn_kernel(*refs, num_heads, has_mask, approx_recip):
    """Grid = (B, NQ tiles, NK chunks); NK is the innermost reduction axis."""
    if has_mask:
        (q_ref, k_ref, v_ref, mask_ref, wq_ref, wo_ref,
         out_ref, qh_sc, m_sc, l_sc, acc_sc) = refs
    else:
        (q_ref, k_ref, v_ref, wq_ref, wo_ref,
         out_ref, qh_sc, m_sc, l_sc, acc_sc) = refs
        mask_ref = None

    kstep = pl.program_id(2)

    @pl.when(kstep == 0)
    def _init():
        # Q projection once per (batch, q-tile); 1/sqrt(D) folded into w_q.
        q_in = q_ref[0]                                     # [tq, E]
        for n in range(num_heads):
            qh_sc[n] = jnp.dot(
                q_in, wq_ref[n], preferred_element_type=jnp.float32
            ).astype(qh_sc.dtype)
        m_sc[...] = jnp.full_like(m_sc, -jnp.inf)
        l_sc[...] = jnp.zeros_like(l_sc)
        acc_sc[...] = jnp.zeros_like(acc_sc)

    q_h = qh_sc[...]                                        # [NH, tq, D]
    k_h = k_ref[0]                                          # [NH, tk, D]
    v_h = v_ref[0]                                          # [NH, tk, D]

    # Head-batched score matmul: no per-head lane slicing, fp32 accumulation.
    s = jnp.einsum('nqd,nkd->nqk', q_h, k_h,
                   preferred_element_type=jnp.float32)      # [NH, tq, tk]
    if has_mask:
        # Binary mask, nonzero == keep (== score*m + NEG_INF*(1-m) for 0/1 m).
        bias = jnp.where(mask_ref[0] != 0,
                         jnp.float32(0.0), jnp.float32(_NEG_INF))
        s = s + bias[None, :, :]

    # Online softmax across NK chunks (fp32 statistics).
    m_prev = m_sc[...]
    m_new = jnp.maximum(m_prev, jnp.max(s, axis=-1, keepdims=True))
    alpha = jnp.exp(m_prev - m_new)
    p = jnp.exp(s - m_new)
    l_sc[...] = alpha * l_sc[...] + jnp.sum(p, axis=-1, keepdims=True)
    acc_sc[...] = alpha * acc_sc[...] + jnp.einsum(
        'nqk,nkd->nqd', p.astype(v_h.dtype), v_h,
        preferred_element_type=jnp.float32)
    m_sc[...] = m_new

    @pl.when(kstep == pl.num_programs(2) - 1)
    def _finalize():
        if approx_recip:
            inv = pl.reciprocal(l_sc[...], approx=True)     # EUP slot
        else:
            inv = 1.0 / l_sc[...]                           # exact (fp32 path)
        attn = (acc_sc[...] * inv).astype(wo_ref.dtype)     # [NH, tq, D]
        out = None
        for n in range(num_heads):                          # per-head out-proj
            part = jnp.dot(attn[n], wo_ref[n],
                           preferred_element_type=jnp.float32)
            out = part if out is None else out + part
        out_ref[0] = out.astype(out_ref.dtype)


# ---------------------------------------------------------------------------
# Wrapper
# ---------------------------------------------------------------------------
def _forward(key, query, w_q, w_k, w_v, w_o, mask, *,
             compute_dtype, out_dtype, q_block, k_block, kv_block,
             approx_softmax_recip, vmem_limit_bytes, single_buffer_weights):
    B, NK, E = key.shape
    _, NQ, _ = query.shape
    NH, _, D = w_q.shape
    has_mask = mask is not None

    if out_dtype is None:
        out_dtype = query.dtype
    if compute_dtype is None:
        compute_dtype = query.dtype
    if approx_softmax_recip is None:
        approx_softmax_recip = jnp.dtype(compute_dtype) == jnp.dtype(jnp.bfloat16)
    if vmem_limit_bytes is None:
        vmem_limit_bytes = _default_vmem_limit()

    cdt = compute_dtype
    key_c = key.astype(cdt)
    query_c = query.astype(cdt)
    wq_c = (w_q * (1.0 / math.sqrt(D))).astype(cdt)   # fold score scale once
    wk_c = w_k.astype(cdt)
    wv_c = w_v.astype(cdt)
    wo_c = w_o.astype(cdt)

    # Tiles (mask ships as int8: sublane tile 32, lane tile 128 unless full).
    tq = _pick_tile(NQ, q_block, align=32 if has_mask else 8)
    tk = _pick_tile(NK, k_block, align=128 if has_mask else 8)
    tkv = _pick_tile(NK, kv_block, align=8)

    # --- 1) K/V projections: once per key position, head-major output. ----
    k_h, v_h = pl.pallas_call(
        functools.partial(_proj_kernel, num_heads=NH, num_mats=2),
        out_shape=(jax.ShapeDtypeStruct((B, NH, NK, D), cdt),
                   jax.ShapeDtypeStruct((B, NH, NK, D), cdt)),
        grid_spec=pltpu.PrefetchScalarGridSpec(
            num_scalar_prefetch=0,
            grid=(B, NK // tkv),
            in_specs=[pl.BlockSpec((1, tkv, E), lambda b, i: (b, i, 0)),
                      _weight_spec((NH, E, D), single_buffer_weights),
                      _weight_spec((NH, E, D), single_buffer_weights)],
            out_specs=(pl.BlockSpec((1, NH, tkv, D), lambda b, i: (b, 0, i, 0)),
                       pl.BlockSpec((1, NH, tkv, D), lambda b, i: (b, 0, i, 0)))),
        compiler_params=pltpu.CompilerParams(
            dimension_semantics=("parallel", "parallel"),
            vmem_limit_bytes=vmem_limit_bytes),
    )(key_c, wk_c, wv_c)

    # --- 2) Fused Q-proj + flash attention + output projection. -----------
    in_specs = [
        pl.BlockSpec((1, tq, E), lambda b, i, k: (b, i, 0)),         # query
        pl.BlockSpec((1, NH, tk, D), lambda b, i, k: (b, 0, k, 0)),  # k_h chunk
        pl.BlockSpec((1, NH, tk, D), lambda b, i, k: (b, 0, k, 0)),  # v_h chunk
    ]
    operands = [query_c, k_h, v_h]
    if has_mask:
        in_specs.append(pl.BlockSpec((1, tq, tk), lambda b, i, k: (b, i, k)))
        operands.append(mask.astype(jnp.int8))   # binary mask, nonzero == keep
    in_specs += [_weight_spec((NH, E, D), single_buffer_weights),    # w_q
                 _weight_spec((NH, D, E), single_buffer_weights)]    # w_o
    operands += [wq_c, wo_c]

    return pl.pallas_call(
        functools.partial(_attn_kernel, num_heads=NH, has_mask=has_mask,
                          approx_recip=approx_softmax_recip),
        out_shape=jax.ShapeDtypeStruct((B, NQ, E), out_dtype),
        grid_spec=pltpu.PrefetchScalarGridSpec(
            num_scalar_prefetch=0,
            grid=(B, NQ // tq, NK // tk),
            in_specs=in_specs,
            out_specs=pl.BlockSpec((1, tq, E), lambda b, i, k: (b, i, 0)),
            scratch_shapes=[pltpu.VMEM((NH, tq, D), cdt),           # q_h
                            pltpu.VMEM((NH, tq, 1), jnp.float32),   # running max
                            pltpu.VMEM((NH, tq, 1), jnp.float32),   # running denom
                            pltpu.VMEM((NH, tq, D), jnp.float32)]), # running numer
        compiler_params=pltpu.CompilerParams(
            dimension_semantics=("parallel", "parallel", "arbitrary"),
            vmem_limit_bytes=vmem_limit_bytes),
    )(*operands)


def multi_head_attention(key, query, w_q, w_k, w_v, w_o, mask=None, *,
                         compute_dtype=jnp.bfloat16, out_dtype=None,
                         q_block=512, k_block=512, kv_block=512,
                         approx_softmax_recip=None, vmem_limit_bytes=None):
    """Pallas MultiHeadAttention.forward (dropout=None => identity).

    compute_dtype: MXU operand dtype (bf16 default; fp32 for exact reference).
    out_dtype:     output dtype (defaults to the query dtype).
    """
    kwargs = dict(compute_dtype=compute_dtype, out_dtype=out_dtype,
                  q_block=q_block, k_block=k_block, kv_block=kv_block,
                  approx_softmax_recip=approx_softmax_recip,
                  vmem_limit_bytes=vmem_limit_bytes)
    try:
        return _forward(key, query, w_q, w_k, w_v, w_o, mask,
                        single_buffer_weights=True, **kwargs)
    except Exception:
        # If this jax/Mosaic build rejects pl.Buffered(1), fall back to the
        # default double-buffered weight blocks (costs a little extra VMEM).
        return _forward(key, query, w_q, w_k, w_v, w_o, mask,
                        single_buffer_weights=False, **kwargs)


# ---------------------------------------------------------------------------
# Reference + demo
# ---------------------------------------------------------------------------
def _reference(key, query, w_q, w_k, w_v, w_o, mask=None):
    """Pure-JAX reference matching the PyTorch forward exactly."""
    D = w_q.shape[-1]
    q = jnp.einsum('blj,njd->bnld', query, w_q)
    k = jnp.einsum('blj,njd->bnld', key, w_k)
    score = jnp.einsum('bnij,bnkj->bnik', q, k) / math.sqrt(D)
    v = jnp.einsum('blj,njd->bnld', key, w_v)
    if mask is not None:
        m = mask[:, None]
        score = score * m + _NEG_INF * (1 - m)
    score = jax.nn.softmax(score, axis=-1)
    out = jnp.einsum('bnij,bnjk->bnik', score, v)
    return jnp.einsum('bnlj,njk->blk', out, w_o)


def _xavier_normal(rng, shape):
    # torch.nn.init.xavier_normal_ for 3D (NH, fan_in_dim, fan_out_dim).
    recep = 1
    for s in shape[2:]:
        recep *= s
    fan_in = shape[1] * recep
    fan_out = shape[0] * recep
    std = math.sqrt(2.0 / (fan_in + fan_out))
    return std * jax.random.normal(rng, shape, dtype=jnp.float32)


if __name__ == "__main__":
    B, NQ, NK = 2, 64, 256
    E, NH, D = 32, 4, 16

    root = jax.random.PRNGKey(0)
    k_key, k_query, k_wq, k_wk, k_wv, k_wo, k_mask = jax.random.split(root, 7)

    key = jax.random.normal(k_key, (B, NK, E), dtype=jnp.float32)
    query = jax.random.normal(k_query, (B, NQ, E), dtype=jnp.float32)
    mask = (jax.random.uniform(k_mask, (B, NQ, NK)) > 0.2).astype(jnp.float32)

    w_q = _xavier_normal(k_wq, (NH, E, D))
    w_k = _xavier_normal(k_wk, (NH, E, D))
    w_v = _xavier_normal(k_wv, (NH, E, D))
    w_o = _xavier_normal(k_wo, (NH, D, E))

    ref_m = _reference(key, query, w_q, w_k, w_v, w_o, mask=mask)
    ref_nm = _reference(key, query, w_q, w_k, w_v, w_o, mask=None)

    # fp32 exact path, masked, small tiles so q-tiling and the online-softmax
    # NK chunking are both exercised (2 q-tiles x 2 key chunks per batch).
    out = jax.block_until_ready(multi_head_attention(
        key, query, w_q, w_k, w_v, w_o, mask=mask,
        compute_dtype=jnp.float32, approx_softmax_recip=False,
        q_block=32, k_block=128, kv_block=128))
    assert out.shape == (B, NQ, E)
    assert jnp.allclose(out, ref_m, atol=1e-4, rtol=1e-4), "masked fp32 mismatch"

    # fp32 exact path, no mask (no mask tensor is materialized or DMA'd).
    out_nm = jax.block_until_ready(multi_head_attention(
        key, query, w_q, w_k, w_v, w_o, mask=None,
        compute_dtype=jnp.float32, approx_softmax_recip=False))
    assert jnp.allclose(out_nm, ref_nm, atol=1e-4, rtol=1e-4), "no-mask fp32 mismatch"

    # Default fast path: bf16 MXU operands, fp32 accumulation / softmax.
    out_bf = jax.block_until_ready(multi_head_attention(
        key, query, w_q, w_k, w_v, w_o, mask=mask))
    assert jnp.allclose(out_bf, ref_m, atol=5e-2, rtol=5e-2), "masked bf16 mismatch"

    print("KERNEL_OK")
</pallas_src>

<mosaic_0001>
module attributes {stable_mosaic.version = 11 : i64} {
  func.func @_proj_kernel(%arg0: i32, %arg1: i32, %arg2: memref<1x128x32xf32, #tpu.memory_space<vmem>>, %arg3: memref<4x32x16xf32, #tpu.memory_space<vmem>>, %arg4: memref<4x32x16xf32, #tpu.memory_space<vmem>>, %arg5: memref<1x4x128x16xf32, #tpu.memory_space<vmem>>, %arg6: memref<1x4x128x16xf32, #tpu.memory_space<vmem>>) attributes {dimension_semantics = [#tpu.dimension_semantics<parallel>, #tpu.dimension_semantics<parallel>], iteration_bounds = array<i64: 2, 2>, scalar_prefetch = 0 : i64, scratch_operands = 0 : i64, tpu.core_type = #tpu.core_type<tc>, window_params = [{transform_indices = @transform_0, window_bounds = array<i64: 1, 128, 32>}, {pipeline_mode = #tpu.pipeline_mode<synchronous>, transform_indices = @transform_1, window_bounds = array<i64: 4, 32, 16>}, {pipeline_mode = #tpu.pipeline_mode<synchronous>, transform_indices = @transform_2, window_bounds = array<i64: 4, 32, 16>}, {transform_indices = @transform_3, window_bounds = array<i64: 1, 4, 128, 16>}, {transform_indices = @transform_4, window_bounds = array<i64: 1, 4, 128, 16>}]} {
    %c0 = arith.constant 0 : index
    %c0_0 = arith.constant 0 : index
    %c0_1 = arith.constant 0 : index
    %0 = vector.load %arg2[%c0, %c0_0, %c0_1] : memref<1x128x32xf32, #tpu.memory_space<vmem>>, vector<1x128x32xf32>
    %1 = vector.shape_cast %0 : vector<1x128x32xf32> to vector<128x32xf32>
    %c0_2 = arith.constant 0 : index
    %c0_3 = arith.constant 0 : index
    %c0_4 = arith.constant 0 : index
    %2 = vector.load %arg3[%c0_2, %c0_3, %c0_4] : memref<4x32x16xf32, #tpu.memory_space<vmem>>, vector<1x32x16xf32>
    %3 = vector.shape_cast %2 : vector<1x32x16xf32> to vector<32x16xf32>
    %cst = arith.constant dense<0.000000e+00> : vector<128x16xf32>
    %4 = tpu.matmul %1, %3, %cst {dimension_numbers = #tpu.dot_dimension_numbers<[1], [0], [0], [1], [0, 0, 1, 1], [], []>} : vector<128x32xf32>, vector<32x16xf32>, vector<128x16xf32> -> vector<128x16xf32>
    %c0_5 = arith.constant 0 : index
    %c0_6 = arith.constant 0 : index
    %c0_7 = arith.constant 0 : index
    %c0_8 = arith.constant 0 : index
    %5 = vector.load %arg5[%c0_5, %c0_6, %c0_7, %c0_8] : memref<1x4x128x16xf32, #tpu.memory_space<vmem>>, vector<1x1x128x16xf32>
    %6 = vector.shape_cast %5 : vector<1x1x128x16xf32> to vector<128x16xf32>
    %7 = vector.shape_cast %4 : vector<128x16xf32> to vector<1x1x128x16xf32>
    tpu.vector_store %arg5[%c0_5, %c0_6, %c0_7, %c0_8], %7 {strides = array<i32>} : memref<1x4x128x16xf32, #tpu.memory_space<vmem>>, vector<1x1x128x16xf32>,
    %c1 = arith.constant 1 : index
    %c0_9 = arith.constant 0 : index
    %c0_10 = arith.constant 0 : index
    %8 = vector.load %arg3[%c1, %c0_9, %c0_10] : memref<4x32x16xf32, #tpu.memory_space<vmem>>, vector<1x32x16xf32>
    %9 = vector.shape_cast %8 : vector<1x32x16xf32> to vector<32x16xf32>
    %cst_11 = arith.constant dense<0.000000e+00> : vector<128x16xf32>
    %10 = tpu.matmul %1, %9, %cst_11 {dimension_numbers = #tpu.dot_dimension_numbers<[1], [0], [0], [1], [0, 0, 1, 1], [], []>} : vector<128x32xf32>, vector<32x16xf32>, vector<128x16xf32> -> vector<128x16xf32>
    %c0_12 = arith.constant 0 : index
    %c1_13 = arith.constant 1 : index
    %c0_14 = arith.constant 0 : index
    %c0_15 = arith.constant 0 : index
    %11 = vector.load %arg5[%c0_12, %c1_13, %c0_14, %c0_15] : memref<1x4x128x16xf32, #tpu.memory_space<vmem>>, vector<1x1x128x16xf32>
    %12 = vector.shape_cast %11 : vector<1x1x128x16xf32> to vector<128x16xf32>
    %13 = vector.shape_cast %10 : vector<128x16xf32> to vector<1x1x128x16xf32>
    tpu.vector_store %arg5[%c0_12, %c1_13, %c0_14, %c0_15], %13 {strides = array<i32>} : memref<1x4x128x16xf32, #tpu.memory_space<vmem>>, vector<1x1x128x16xf32>,
    %c2 = arith.constant 2 : index
    %c0_16 = arith.constant 0 : index
    %c0_17 = arith.constant 0 : index
    %14 = vector.load %arg3[%c2, %c0_16, %c0_17] : memref<4x32x16xf32, #tpu.memory_space<vmem>>, vector<1x32x16xf32>
    %15 = vector.shape_cast %14 : vector<1x32x16xf32> to vector<32x16xf32>
    %cst_18 = arith.constant dense<0.000000e+00> : vector<128x16xf32>
    %16 = tpu.matmul %1, %15, %cst_18 {dimension_numbers = #tpu.dot_dimension_numbers<[1], [0], [0], [1], [0, 0, 1, 1], [], []>} : vector<128x32xf32>, vector<32x16xf32>, vector<128x16xf32> -> vector<128x16xf32>
    %c0_19 = arith.constant 0 : index
    %c2_20 = arith.constant 2 : index
    %c0_21 = arith.constant 0 : index
    %c0_22 = arith.constant 0 : index
    %17 = vector.load %arg5[%c0_19, %c2_20, %c0_21, %c0_22] : memref<1x4x128x16xf32, #tpu.memory_space<vmem>>, vector<1x1x128x16xf32>
    %18 = vector.shape_cast %17 : vector<1x1x128x16xf32> to vector<128x16xf32>
    %19 = vector.shape_cast %16 : vector<128x16xf32> to vector<1x1x128x16xf32>
    tpu.vector_store %arg5[%c0_19, %c2_20, %c0_21, %c0_22], %19 {strides = array<i32>} : memref<1x4x128x16xf32, #tpu.memory_space<vmem>>, vector<1x1x128x16xf32>,
    %c3 = arith.constant 3 : index
    %c0_23 = arith.constant 0 : index
    %c0_24 = arith.constant 0 : index
    %20 = vector.load %arg3[%c3, %c0_23, %c0_24] : memref<4x32x16xf32, #tpu.memory_space<vmem>>, vector<1x32x16xf32>
    %21 = vector.shape_cast %20 : vector<1x32x16xf32> to vector<32x16xf32>
    %cst_25 = arith.constant dense<0.000000e+00> : vector<128x16xf32>
    %22 = tpu.matmul %1, %21, %cst_25 {dimension_numbers = #tpu.dot_dimension_numbers<[1], [0], [0], [1], [0, 0, 1, 1], [], []>} : vector<128x32xf32>, vector<32x16xf32>, vector<128x16xf32> -> vector<128x16xf32>
    %c0_26 = arith.constant 0 : index
    %c3_27 = arith.constant 3 : index
    %c0_28 = arith.constant 0 : index
    %c0_29 = arith.constant 0 : index
    %23 = vector.load %arg5[%c0_26, %c3_27, %c0_28, %c0_29] : memref<1x4x128x16xf32, #tpu.memory_space<vmem>>, vector<1x1x128x16xf32>
    %24 = vector.shape_cast %23 : vector<1x1x128x16xf32> to vector<128x16xf32>
    %25 = vector.shape_cast %22 : vector<128x16xf32> to vector<1x1x128x16xf32>
    tpu.vector_store %arg5[%c0_26, %c3_27, %c0_28, %c0_29], %25 {strides = array<i32>} : memref<1x4x128x16xf32, #tpu.memory_space<vmem>>, vector<1x1x128x16xf32>,
    %c0_30 = arith.constant 0 : index
    %c0_31 = arith.constant 0 : index
    %c0_32 = arith.constant 0 : index
    %26 = vector.load %arg4[%c0_30, %c0_31, %c0_32] : memref<4x32x16xf32, #tpu.memory_space<vmem>>, vector<1x32x16xf32>
    %27 = vector.shape_cast %26 : vector<1x32x16xf32> to vector<32x16xf32>
    %cst_33 = arith.constant dense<0.000000e+00> : vector<128x16xf32>
    %28 = tpu.matmul %1, %27, %cst_33 {dimension_numbers = #tpu.dot_dimension_numbers<[1], [0], [0], [1], [0, 0, 1, 1], [], []>} : vector<128x32xf32>, vector<32x16xf32>, vector<128x16xf32> -> vector<128x16xf32>
    %c0_34 = arith.constant 0 : index
    %c0_35 = arith.constant 0 : index
    %c0_36 = arith.constant 0 : index
    %c0_37 = arith.constant 0 : index
    %29 = vector.load %arg6[%c0_34, %c0_35, %c0_36, %c0_37] : memref<1x4x128x16xf32, #tpu.memory_space<vmem>>, vector<1x1x128x16xf32>
    %30 = vector.shape_cast %29 : vector<1x1x128x16xf32> to vector<128x16xf32>
    %31 = vector.shape_cast %28 : vector<128x16xf32> to vector<1x1x128x16xf32>
    tpu.vector_store %arg6[%c0_34, %c0_35, %c0_36, %c0_37], %31 {strides = array<i32>} : memref<1x4x128x16xf32, #tpu.memory_space<vmem>>, vector<1x1x128x16xf32>,
    %c1_38 = arith.constant 1 : index
    %c0_39 = arith.constant 0 : index
    %c0_40 = arith.constant 0 : index
    %32 = vector.load %arg4[%c1_38, %c0_39, %c0_40] : memref<4x32x16xf32, #tpu.memory_space<vmem>>, vector<1x32x16xf32>
    %33 = vector.shape_cast %32 : vector<1x32x16xf32> to vector<32x16xf32>
    %cst_41 = arith.constant dense<0.000000e+00> : vector<128x16xf32>
    %34 = tpu.matmul %1, %33, %cst_41 {dimension_numbers = #tpu.dot_dimension_numbers<[1], [0], [0], [1], [0, 0, 1, 1], [], []>} : vector<128x32xf32>, vector<32x16xf32>, vector<128x16xf32> -> vector<128x16xf32>
    %c0_42 = arith.constant 0 : index
    %c1_43 = arith.constant 1 : index
    %c0_44 = arith.constant 0 : index
    %c0_45 = arith.constant 0 : index
    %35 = vector.load %arg6[%c0_42, %c1_43, %c0_44, %c0_45] : memref<1x4x128x16xf32, #tpu.memory_space<vmem>>, vector<1x1x128x16xf32>
    %36 = vector.shape_cast %35 : vector<1x1x128x16xf32> to vector<128x16xf32>
    %37 = vector.shape_cast %34 : vector<128x16xf32> to vector<1x1x128x16xf32>
    tpu.vector_store %arg6[%c0_42, %c1_43, %c0_44, %c0_45], %37 {strides = array<i32>} : memref<1x4x128x16xf32, #tpu.memory_space<vmem>>, vector<1x1x128x16xf32>,
    %c2_46 = arith.constant 2 : index
    %c0_47 = arith.constant 0 : index
    %c0_48 = arith.constant 0 : index
    %38 = vector.load %arg4[%c2_46, %c0_47, %c0_48] : memref<4x32x16xf32, #tpu.memory_space<vmem>>, vector<1x32x16xf32>
    %39 = vector.shape_cast %38 : vector<1x32x16xf32> to vector<32x16xf32>
    %cst_49 = arith.constant dense<0.000000e+00> : vector<128x16xf32>
    %40 = tpu.matmul %1, %39, %cst_49 {dimension_numbers = #tpu.dot_dimension_numbers<[1], [0], [0], [1], [0, 0, 1, 1], [], []>} : vector<128x32xf32>, vector<32x16xf32>, vector<128x16xf32> -> vector<128x16xf32>
    %c0_50 = arith.constant 0 : index
    %c2_51 = arith.constant 2 : index
    %c0_52 = arith.constant 0 : index
    %c0_53 = arith.constant 0 : index
    %41 = vector.load %arg6[%c0_50, %c2_51, %c0_52, %c0_53] : memref<1x4x128x16xf32, #tpu.memory_space<vmem>>, vector<1x1x128x16xf32>
    %42 = vector.shape_cast %41 : vector<1x1x128x16xf32> to vector<128x16xf32>
    %43 = vector.shape_cast %40 : vector<128x16xf32> to vector<1x1x128x16xf32>
    tpu.vector_store %arg6[%c0_50, %c2_51, %c0_52, %c0_53], %43 {strides = array<i32>} : memref<1x4x128x16xf32, #tpu.memory_space<vmem>>, vector<1x1x128x16xf32>,
    %c3_54 = arith.constant 3 : index
    %c0_55 = arith.constant 0 : index
    %c0_56 = arith.constant 0 : index
    %44 = vector.load %arg4[%c3_54, %c0_55, %c0_56] : memref<4x32x16xf32, #tpu.memory_space<vmem>>, vector<1x32x16xf32>
    %45 = vector.shape_cast %44 : vector<1x32x16xf32> to vector<32x16xf32>
    %cst_57 = arith.constant dense<0.000000e+00> : vector<128x16xf32>
    %46 = tpu.matmul %1, %45, %cst_57 {dimension_numbers = #tpu.dot_dimension_numbers<[1], [0], [0], [1], [0, 0, 1, 1], [], []>} : vector<128x32xf32>, vector<32x16xf32>, vector<128x16xf32> -> vector<128x16xf32>
    %c0_58 = arith.constant 0 : index
    %c3_59 = arith.constant 3 : index
    %c0_60 = arith.constant 0 : index
    %c0_61 = arith.constant 0 : index
    %47 = vector.load %arg6[%c0_58, %c3_59, %c0_60, %c0_61] : memref<1x4x128x16xf32, #tpu.memory_space<vmem>>, vector<1x1x128x16xf32>
    %48 = vector.shape_cast %47 : vector<1x1x128x16xf32> to vector<128x16xf32>
    %49 = vector.shape_cast %46 : vector<128x16xf32> to vector<1x1x128x16xf32>
    tpu.vector_store %arg6[%c0_58, %c3_59, %c0_60, %c0_61], %49 {strides = array<i32>} : memref<1x4x128x16xf32, #tpu.memory_space<vmem>>, vector<1x1x128x16xf32>,
    return
  }
  func.func @transform_0(%arg0: i32, %arg1: i32) -> (i32, i32, i32) {
    %c0_i32 = arith.constant 0 : i32
    %c0_i32_0 = arith.constant 0 : i32
    return %arg0, %arg1, %c0_i32 : i32, i32, i32
  }
  func.func @transform_1(%arg0: i32, %arg1: i32) -> (i32, i32, i32) {
    %c0_i32 = arith.constant 0 : i32
    %c0_i32_0 = arith.constant 0 : i32
    %c0_i32_1 = arith.constant 0 : i32
    %c0_i32_2 = arith.constant 0 : i32
    return %c0_i32, %c0_i32_0, %c0_i32_1 : i32, i32, i32
  }
  func.func @transform_2(%arg0: i32, %arg1: i32) -> (i32, i32, i32) {
    %c0_i32 = arith.constant 0 : i32
    %c0_i32_0 = arith.constant 0 : i32
    %c0_i32_1 = arith.constant 0 : i32
    %c0_i32_2 = arith.constant 0 : i32
    return %c0_i32, %c0_i32_0, %c0_i32_1 : i32, i32, i32
  }
  func.func @transform_3(%arg0: i32, %arg1: i32) -> (i32, i32, i32, i32) {
    %c0_i32 = arith.constant 0 : i32
    %c0_i32_0 = arith.constant 0 : i32
    %c0_i32_1 = arith.constant 0 : i32
    return %arg0, %c0_i32, %arg1, %c0_i32_0 : i32, i32, i32, i32
  }
  func.func @transform_4(%arg0: i32, %arg1: i32) -> (i32, i32, i32, i32) {
    %c0_i32 = arith.constant 0 : i32
    %c0_i32_0 = arith.constant 0 : i32
    %c0_i32_1 = arith.constant 0 : i32
    return %arg0, %c0_i32, %arg1, %c0_i32_0 : i32, i32, i32, i32
  }
}

module attributes {stable_mosaic.version = 11 : i64} {
  func.func @_proj_kernel(%arg0: i32, %arg1: i32, %arg2: memref<1x128x32xf32, #tpu.memory_space<vmem>>, %arg3: memref<4x32x16xf32, #tpu.memory_space<vmem>>, %arg4: memref<4x32x16xf32, #tpu.memory_space<vmem>>, %arg5: memref<1x4x128x16xf32, #tpu.memory_space<vmem>>, %arg6: memref<1x4x128x16xf32, #tpu.memory_space<vmem>>) attributes {dimension_semantics = [#tpu.dimension_semantics<parallel>, #tpu.dimension_semantics<parallel>], iteration_bounds = array<i64: 2, 2>, scalar_prefetch = 0 : i64, scratch_operands = 0 : i64, tpu.core_type = #tpu.core_type<tc>, window_params = [{transform_indices = @transform_0, window_bounds = array<i64: 1, 128, 32>}, {pipeline_mode = #tpu.pipeline_mode<synchronous>, transform_indices = @transform_1, window_bounds = array<i64: 4, 32, 16>}, {pipeline_mode = #tpu.pipeline_mode<synchronous>, transform_indices = @transform_2, window_bounds = array<i64: 4, 32, 16>}, {transform_indices = @transform_3, window_bounds = array<i64: 1, 4, 128, 16>}, {transform_indices = @transform_4, window_bounds = array<i64: 1, 4, 128, 16>}]} {
    %c0 = arith.constant 0 : index
    %c0_0 = arith.constant 0 : index
    %c0_1 = arith.constant 0 : index
    %0 = vector.load %arg2[%c0, %c0_0, %c0_1] : memref<1x128x32xf32, #tpu.memory_space<vmem>>, vector<1x128x32xf32>
    %1 = vector.shape_cast %0 : vector<1x128x32xf32> to vector<128x32xf32>
    %c0_2 = arith.constant 0 : index
    %c0_3 = arith.constant 0 : index
    %c0_4 = arith.constant 0 : index
    %2 = vector.load %arg3[%c0_2, %c0_3, %c0_4] : memref<4x32x16xf32, #tpu.memory_space<vmem>>, vector<1x32x16xf32>
    %3 = vector.shape_cast %2 : vector<1x32x16xf32> to vector<32x16xf32>
    %cst = arith.constant dense<0.000000e+00> : vector<128x16xf32>
    %4 = tpu.matmul %1, %3, %cst {dimension_numbers = #tpu.dot_dimension_numbers<[1], [0], [0], [1], [0, 0, 1, 1], [], []>} : vector<128x32xf32>, vector<32x16xf32>, vector<128x16xf32> -> vector<128x16xf32>
    %c0_5 = arith.constant 0 : index
    %c0_6 = arith.constant 0 : index
    %c0_7 = arith.constant 0 : index
    %c0_8 = arith.constant 0 : index
    %5 = vector.load %arg5[%c0_5, %c0_6, %c0_7, %c0_8] : memref<1x4x128x16xf32, #tpu.memory_space<vmem>>, vector<1x1x128x16xf32>
    %6 = vector.shape_cast %5 : vector<1x1x128x16xf32> to vector<128x16xf32>
    %7 = vector.shape_cast %4 : vector<128x16xf32> to vector<1x1x128x16xf32>
    tpu.vector_store %arg5[%c0_5, %c0_6, %c0_7, %c0_8], %7 {strides = array<i32>} : memref<1x4x128x16xf32, #tpu.memory_space<vmem>>, vector<1x1x128x16xf32>,
    %c1 = arith.constant 1 : index
    %c0_9 = arith.constant 0 : index
    %c0_10 = arith.constant 0 : index
    %8 = vector.load %arg3[%c1, %c0_9, %c0_10] : memref<4x32x16xf32, #tpu.memory_space<vmem>>, vector<1x32x16xf32>
    %9 = vector.shape_cast %8 : vector<1x32x16xf32> to vector<32x16xf32>
    %cst_11 = arith.constant dense<0.000000e+00> : vector<128x16xf32>
    %10 = tpu.matmul %1, %9, %cst_11 {dimension_numbers = #tpu.dot_dimension_numbers<[1], [0], [0], [1], [0, 0, 1, 1], [], []>} : vector<128x32xf32>, vector<32x16xf32>, vector<128x16xf32> -> vector<128x16xf32>
    %c0_12 = arith.constant 0 : index
    %c1_13 = arith.constant 1 : index
    %c0_14 = arith.constant 0 : index
    %c0_15 = arith.constant 0 : index
    %11 = vector.load %arg5[%c0_12, %c1_13, %c0_14, %c0_15] : memref<1x4x128x16xf32, #tpu.memory_space<vmem>>, vector<1x1x128x16xf32>
    %12 = vector.shape_cast %11 : vector<1x1x128x16xf32> to vector<128x16xf32>
    %13 = vector.shape_cast %10 : vector<128x16xf32> to vector<1x1x128x16xf32>
    tpu.vector_store %arg5[%c0_12, %c1_13, %c0_14, %c0_15], %13 {strides = array<i32>} : memref<1x4x128x16xf32, #tpu.memory_space<vmem>>, vector<1x1x128x16xf32>,
    %c2 = arith.constant 2 : index
    %c0_16 = arith.constant 0 : index
    %c0_17 = arith.constant 0 : index
    %14 = vector.load %arg3[%c2, %c0_16, %c0_17] : memref<4x32x16xf32, #tpu.memory_space<vmem>>, vector<1x32x16xf32>
    %15 = vector.shape_cast %14 : vector<1x32x16xf32> to vector<32x16xf32>
    %cst_18 = arith.constant dense<0.000000e+00> : vector<128x16xf32>
    %16 = tpu.matmul %1, %15, %cst_18 {dimension_numbers = #tpu.dot_dimension_numbers<[1], [0], [0], [1], [0, 0, 1, 1], [], []>} : vector<128x32xf32>, vector<32x16xf32>, vector<128x16xf32> -> vector<128x16xf32>
    %c0_19 = arith.constant 0 : index
    %c2_20 = arith.constant 2 : index
    %c0_21 = arith.constant 0 : index
    %c0_22 = arith.constant 0 : index
    %17 = vector.load %arg5[%c0_19, %c2_20, %c0_21, %c0_22] : memref<1x4x128x16xf32, #tpu.memory_space<vmem>>, vector<1x1x128x16xf32>
    %18 = vector.shape_cast %17 : vector<1x1x128x16xf32> to vector<128x16xf32>
    %19 = vector.shape_cast %16 : vector<128x16xf32> to vector<1x1x128x16xf32>
    tpu.vector_store %arg5[%c0_19, %c2_20, %c0_21, %c0_22], %19 {strides = array<i32>} : memref<1x4x128x16xf32, #tpu.memory_space<vmem>>, vector<1x1x128x16xf32>,
    %c3 = arith.constant 3 : index
    %c0_23 = arith.constant 0 : index
    %c0_24 = arith.constant 0 : index
    %20 = vector.load %arg3[%c3, %c0_23, %c0_24] : memref<4x32x16xf32, #tpu.memory_space<vmem>>, vector<1x32x16xf32>
    %21 = vector.shape_cast %20 : vector<1x32x16xf32> to vector<32x16xf32>
    %cst_25 = arith.constant dense<0.000000e+00> : vector<128x16xf32>
    %22 = tpu.matmul %1, %21, %cst_25 {dimension_numbers = #tpu.dot_dimension_numbers<[1], [0], [0], [1], [0, 0, 1, 1], [], []>} : vector<128x32xf32>, vector<32x16xf32>, vector<128x16xf32> -> vector<128x16xf32>
    %c0_26 = arith.constant 0 : index
    %c3_27 = arith.constant 3 : index
    %c0_28 = arith.constant 0 : index
    %c0_29 = arith.constant 0 : index
    %23 = vector.load %arg5[%c0_26, %c3_27, %c0_28, %c0_29] : memref<1x4x128x16xf32, #tpu.memory_space<vmem>>, vector<1x1x128x16xf32>
    %24 = vector.shape_cast %23 : vector<1x1x128x16xf32> to vector<128x16xf32>
    %25 = vector.shape_cast %22 : vector<128x16xf32> to vector<1x1x128x16xf32>
    tpu.vector_store %arg5[%c0_26, %c3_27, %c0_28, %c0_29], %25 {strides = array<i32>} : memref<1x4x128x16xf32, #tpu.memory_space<vmem>>, vector<1x1x128x16xf32>,
    %c0_30 = arith.constant 0 : index
    %c0_31 = arith.constant 0 : index
    %c0_32 = arith.constant 0 : index
    %26 = vector.load %arg4[%c0_30, %c0_31, %c0_32] : memref<4x32x16xf32, #tpu.memory_space<vmem>>, vector<1x32x16xf32>
    %27 = vector.shape_cast %26 : vector<1x32x16xf32> to vector<32x16xf32>
    %cst_33 = arith.constant dense<0.000000e+00> : vector<128x16xf32>
    %28 = tpu.matmul %1, %27, %cst_33 {dimension_numbers = #tpu.dot_dimension_numbers<[1], [0], [0], [1], [0, 0, 1, 1], [], []>} : vector<128x32xf32>, vector<32x16xf32>, vector<128x16xf32> -> vector<128x16xf32>
    %c0_34 = arith.constant 0 : index
    %c0_35 = arith.constant 0 : index
    %c0_36 = arith.constant 0 : index
    %c0_37 = arith.constant 0 : index
    %29 = vector.load %arg6[%c0_34, %c0_35, %c0_36, %c0_37] : memref<1x4x128x16xf32, #tpu.memory_space<vmem>>, vector<1x1x128x16xf32>
    %30 = vector.shape_cast %29 : vector<1x1x128x16xf32> to vector<128x16xf32>
    %31 = vector.shape_cast %28 : vector<128x16xf32> to vector<1x1x128x16xf32>
    tpu.vector_store %arg6[%c0_34, %c0_35, %c0_36, %c0_37], %31 {strides = array<i32>} : memref<1x4x128x16xf32, #tpu.memory_space<vmem>>, vector<1x1x128x16xf32>,
    %c1_38 = arith.constant 1 : index
    %c0_39 = arith.constant 0 : index
    %c0_40 = arith.constant 0 : index
    %32 = vector.load %arg4[%c1_38, %c0_39, %c0_40] : memref<4x32x16xf32, #tpu.memory_space<vmem>>, vector<1x32x16xf32>
    %33 = vector.shape_cast %32 : vector<1x32x16xf32> to vector<32x16xf32>
    %cst_41 = arith.constant dense<0.000000e+00> : vector<128x16xf32>
    %34 = tpu.matmul %1, %33, %cst_41 {dimension_numbers = #tpu.dot_dimension_numbers<[1], [0], [0], [1], [0, 0, 1, 1], [], []>} : vector<128x32xf32>, vector<32x16xf32>, vector<128x16xf32> -> vector<128x16xf32>
    %c0_42 = arith.constant 0 : index
    %c1_43 = arith.constant 1 : index
    %c0_44 = arith.constant 0 : index
    %c0_45 = arith.constant 0 : index
    %35 = vector.load %arg6[%c0_42, %c1_43, %c0_44, %c0_45] : memref<1x4x128x16xf32, #tpu.memory_space<vmem>>, vector<1x1x128x16xf32>
    %36 = vector.shape_cast %35 : vector<1x1x128x16xf32> to vector<128x16xf32>
    %37 = vector.shape_cast %34 : vector<128x16xf32> to vector<1x1x128x16xf32>
    tpu.vector_store %arg6[%c0_42, %c1_43, %c0_44, %c0_45], %37 {strides = array<i32>} : memref<1x4x128x16xf32, #tpu.memory_space<vmem>>, vector<1x1x128x16xf32>,
    %c2_46 = arith.constant 2 : index
    %c0_47 = arith.constant 0 : index
    %c0_48 = arith.constant 0 : index
    %38 = vector.load %arg4[%c2_46, %c0_47, %c0_48] : memref<4x32x16xf32, #tpu.memory_space<vmem>>, vector<1x32x16xf32>
    %39 = vector.shape_cast %38 : vector<1x32x16xf32> to vector<32x16xf32>
    %cst_49 = arith.constant dense<0.000000e+00> : vector<128x16xf32>
    %40 = tpu.matmul %1, %39, %cst_49 {dimension_numbers = #tpu.dot_dimension_numbers<[1], [0], [0], [1], [0, 0, 1, 1], [], []>} : vector<128x32xf32>, vector<32x16xf32>, vector<128x16xf32> -> vector<128x16xf32>
    %c0_50 = arith.constant 0 : index
    %c2_51 = arith.constant 2 : index
    %c0_52 = arith.constant 0 : index
    %c0_53 = arith.constant 0 : index
    %41 = vector.load %arg6[%c0_50, %c2_51, %c0_52, %c0_53] : memref<1x4x128x16xf32, #tpu.memory_space<vmem>>, vector<1x1x128x16xf32>
    %42 = vector.shape_cast %41 : vector<1x1x128x16xf32> to vector<128x16xf32>
    %43 = vector.shape_cast %40 : vector<128x16xf32> to vector<1x1x128x16xf32>
    tpu.vector_store %arg6[%c0_50, %c2_51, %c0_52, %c0_53], %43 {strides = array<i32>} : memref<1x4x128x16xf32, #tpu.memory_space<vmem>>, vector<1x1x128x16xf32>,
    %c3_54 = arith.constant 3 : index
    %c0_55 = arith.constant 0 : index
    %c0_56 = arith.constant 0 : index
    %44 = vector.load %arg4[%c3_54, %c0_55, %c0_56] : memref<4x32x16xf32, #tpu.memory_space<vmem>>, vector<1x32x16xf32>
    %45 = vector.shape_cast %44 : vector<1x32x16xf32> to vector<32x16xf32>
    %cst_57 = arith.constant dense<0.000000e+00> : vector<128x16xf32>
    %46 = tpu.matmul %1, %45, %cst_57 {dimension_numbers = #tpu.dot_dimension_numbers<[1], [0], [0], [1], [0, 0, 1, 1], [], []>} : vector<128x32xf32>, vector<32x16xf32>, vector<128x16xf32> -> vector<128x16xf32>
    %c0_58 = arith.constant 0 : index
    %c3_59 = arith.constant 3 : index
    %c0_60 = arith.constant 0 : index
    %c0_61 = arith.constant 0 : index
    %47 = vector.load %arg6[%c0_58, %c3_59, %c0_60, %c0_61] : memref<1x4x128x16xf32, #tpu.memory_space<vmem>>, vector<1x1x128x16xf32>
    %48 = vector.shape_cast %47 : vector<1x1x128x16xf32> to vector<128x16xf32>
    %49 = vector.shape_cast %46 : vector<128x16xf32> to vector<1x1x128x16xf32>
    tpu.vector_store %arg6[%c0_58, %c3_59, %c0_60, %c0_61], %49 {strides = array<i32>} : memref<1x4x128x16xf32, #tpu.memory_space<vmem>>, vector<1x1x128x16xf32>,
    return
  }
  func.func @transform_0(%arg0: i32, %arg1: i32) -> (i32, i32, i32) {
    %c0_i32 = arith.constant 0 : i32
    %c0_i32_0 = arith.constant 0 : i32
    return %arg0, %arg1, %c0_i32 : i32, i32, i32
  }
  func.func @transform_1(%arg0: i32, %arg1: i32) -> (i32, i32, i32) {
    %c0_i32 = arith.constant 0 : i32
    %c0_i32_0 = arith.constant 0 : i32
    %c0_i32_1 = arith.constant 0 : i32
    %c0_i32_2 = arith.constant 0 : i32
    return %c0_i32, %c0_i32_0, %c0_i32_1 : i32, i32, i32
  }
  func.func @transform_2(%arg0: i32, %arg1: i32) -> (i32, i32, i32) {
    %c0_i32 = arith.constant 0 : i32
    %c0_i32_0 = arith.constant 0 : i32
    %c0_i32_1 = arith.constant 0 : i32
    %c0_i32_2 = arith.constant 0 : i32
    return %c0_i32, %c0_i32_0, %c0_i32_1 : i32, i32, i32
  }
  func.func @transform_3(%arg0: i32, %arg1: i32) -> (i32, i32, i32, i32) {
    %c0_i32 = arith.constant 0 : i32
    %c0_i32_0 = arith.constant 0 : i32
    %c0_i32_1 = arith.constant 0 : i32
    return %arg0, %c0_i32, %arg1, %c0_i32_0 : i32, i32, i32, i32
  }
  func.func @transform_4(%arg0: i32, %arg1: i32) -> (i32, i32, i32, i32) {
    %c0_i32 = arith.constant 0 : i32
    %c0_i32_0 = arith.constant 0 : i32
    %c0_i32_1 = arith.constant 0 : i32
    return %arg0, %c0_i32, %arg1, %c0_i32_0 : i32, i32, i32, i32
  }
}

</mosaic_0001>

<bundles_post_ra>
// kernel: tpu_custom_call.1
= control target key start
LH: loop header
LB: loop body
LE: loop exit
PB: predicated region body
PF: predicated region fallthrough
CT: control target
= control target key end

     0   :  { %s2092_s15 = smov 0   ;;  %s2094_s16 = smov 0   ;;  %s3120_s0 = inlined_call_operand.vmem [shape: f32[2,256,32], index: 0, kind: input, shape index: {}]   ;;  %s3121_s1 = inlined_call_operand.vmem [shape: f32[4,32,16], index: 1, kind: input, shape index: {}]   ;;  %s3122_s2 = inlined_call_operand.vmem [shape: f32[4,32,16], index: 2, kind: input, shape index: {}]   ;;  %s3123_s3 = inlined_call_operand.vmem [shape: f32[2,4,256,16], index: 3, kind: output, shape index: {0}]   ;;  %s3124_s4 = inlined_call_operand.vmem [shape: f32[2,4,256,16], index: 4, kind: output, shape index: {1}]  }
   0x1   :  { %s2096_s17 = smov 0   ;;  %s2098_s18 = smov 0  }
   0x2   :  { %s2100_s19 = smov 0   ;;  %s2102_s20 = smov 0  }
   0x3   :  { %s2104_s21 = smov 0  }
   0x4 LB: > { %s24_s22 = sadd.s32 1, %s2057_s19  ;;  %s27_s23 = sadd.s32 1, %s2061_s20  ;;  %s2065_s21 = sphi %s2104_s21, %s15_s21   ;;  %s2061_s20 = sphi %s2102_s20, %s3131_s20   ;;  %s2057_s19 = sphi %s2100_s19, %s3130_s19   ;;  %s2053_s18 = sphi %s2098_s18, %s3129_s18   ;;  %s2049_s17 = sphi %s2096_s17, %s3128_s17   ;;  %s2045_s16 = sphi %s2094_s16, %s3127_s16   ;;  %s2041_s15 = sphi %s2092_s15, %s3126_s15  }
   0x5   : > { %p25_p0 = scmp.ge.s32.totalorder %s24_s22, 2  ;;  %s1687_s24 = sadd.s32 4294967295, %s2065_s21  }
   0x6   : > { %p116_p1 = scmp.ne.s32.totalorder %s2045_s16, %s2041_s15  ;;  %p117_p2 = scmp.eq.s32.totalorder %s1687_s24, 3 }
   0x7   : > { %s3133_s22 = smov (%p25_p0, %s24_s22), 0  ;;  %s3135_s23 = smov (!%p25_p0, %s27_s23), %s2061_s20 }
   0x8   : > { %s102_s25 = ssub.s32 %s2057_s19, %s3133_s22  ;;  %p29_p3 = scmp.ge.s32.totalorder %s3135_s23, 2 }
   0x9   : > { %p1691_p4 = scmp.ge.s32.totalorder %s2065_s21, 1  ;;  %p2136_p5 = por %p117_p2, %p116_p1 }
   0xa   : > { %p188_p6 = scmp.lt.s32.totalorder %s2065_s21, 5  ;;  %s3137_s23 = smov (%p29_p3, %s3135_s23), 0 }
   0xb   : > { %s101_s27 = ssub.s32 %s2061_s20, %s3137_s23  ;;  %s106_s29 = sadd.s32 1, %s2045_s16 }
   0xc   : > { %p189_p7 = pnand %p1691_p4, %p188_p6  ;;  %s103_s28 = sor.u32 %s102_s25, %s101_s27 }
   0xd   : > { %p104_p8 = scmp.eq.s32.totalorder %s103_s28, 0  ;;  %s2158_s11 = sshll.u32 (!%p189_p7), %s2049_s17, 4 }
   0xe   : > { %192 = sbr.rel (%p189_p7) target bundleno = 482 (0x1e2), region = 32  ;;  %p222_p9 = scmp.lt.s32.totalorder (!%p189_p7), %s2053_s18, 1 }
   0xf   : > { %s2147_s30 = scalar_select %p104_p8, %s2045_s16, %s106_s29  }
  0x10   : > { %p224_p10 = scmp.lt.s32.totalorder (!%p189_p7), %s2158_s11, 31  ;;  %s212_s29 = sand.u32 (!%p189_p7), 1, %s2041_s15  }
  0x11   : > { %s2433_s5 = sshll.u32 (!%p189_p7), %s212_s29, 9 }
  0x12   : > { %s2695_s15 = scalar_lea.vmem (!%p189_p7), [#allocation3], %s2433_s5 }
  0x13   : > { %v1752_v0 = vld [vmem:[%s3121_s1 + $0x58] sm:$0xff]  ;;  %v1751_v2 = vld [vmem:[%s3121_s1 + $0x50] sm:$0xff]  ;;  %v1750_v4 = vld [vmem:[%s3121_s1 + $0x48] sm:$0xff]  ;;  %s223_s6 = scalar_select %p222_p9, %s2053_s18, 1  ;;  %vm253_vm0 = vcmask 261120   ;;  %vm367_vm1 = vcmask 130048  }
  0x14   : > { %v1788_v1 = vld [vmem:[%s3121_s1 + $0x78] sm:$0xff]  ;;  %488 = vmatpush.msra.mxu2 %v1752_v0  ;;  %v1787_v3 = vld [vmem:[%s3121_s1 + $0x70] sm:$0xff]  ;;  %v1786_v5 = vld [vmem:[%s3121_s1 + $0x68] sm:$0xff]  ;;  %s225_s9 = scalar_select %p224_p10, %s2158_s11, 31 }
  0x15   : > { %575 = vmatpush.msra.mxu3 %v1788_v1  ;;  %v252_v6 = vld [vmem:[%s3121_s1 + $0x18] sm:$0xff]  ;;  %v1749_v8 = vld [vmem:[%s3121_s1 + $0x40] sm:$0xff]  ;;  %s1695_s13 = sshll.u32 %s223_s6, 5  ;;  %v251_v10 = vld [vmem:[%s3121_s1 + $0x10] sm:$0xff]  ;;  %s1948_s7 = sshll.u32 (%p2136_p5), %s2053_s18, 7 }
  0x16   : > { %v1716_v7 = vld [vmem:[%s3121_s1 + $0x38] sm:$0xff]  ;;  %489 = vmatpush.msra.mxu2 %v1751_v2  ;;  %314 = vmatpush.msra.mxu0 %v252_v6  ;;  %v1785_v9 = vld [vmem:[%s3121_s1 + $0x60] sm:$0xff]  ;;  %v1715_v11 = vld [vmem:[%s3121_s1 + $0x30] sm:$0xff]  ;;  %s227_s17 = sadd.s32 %s1695_s13, %s225_s9 }
  0x17   : > { %576 = vmatpush.msra.mxu3 %v1787_v3  ;;  %401 = vmatpush.msra.mxu1 %v1716_v7  ;;  %v1876_v12 = vld [vmem:[%s3122_s2 + $0x58] sm:$0xff]  ;;  %s1696_s6 = sshll.u32 %s227_s17, 3  ;;  %v250_v14 = vld [vmem:[%s3121_s1 + $0x8] sm:$0xff]  ;;  %v249_v17 = vld [vmem:[%s3121_s1] sm:$0xff] }
  0x18   : > { %490 = vmatpush.msra.mxu2 %v1750_v4  ;;  %v1912_v13 = vld [vmem:[%s3122_s2 + $0x78] sm:$0xff]  ;;  %315 = vmatpush.msra.mxu0 %v251_v10  ;;  %s2200_s12 = scalar_lea.vmem %s3120_s0, %s1696_s6  ;;  %v1714_v15 = vld [vmem:[%s3121_s1 + $0x28] sm:$0xff]  ;;  %v1713_v18 = vld [vmem:[%s3121_s1 + $0x20] sm:$0xff]  ;;  %s1004_s6 = sadd.s32 (%p2136_p5), %s1948_s7, %s2158_s11 }
  0x19   : > { %577 = vmatpush.msra.mxu3 %v1786_v5  ;;  %402 = vmatpush.msra.mxu1 %v1715_v11  ;;  %v2209_v16 = vld [vmem:[%s2200_s12] sm:$0xff]  ;;  %v1875_v19 = vld [vmem:[%s3122_s2 + $0x50] sm:$0xff]  ;;  %v648_v21 = vld [vmem:[%s3122_s2 + $0x18] sm:$0xff]  ;;  %s1949_s8 = sshll.u32 (%p2136_p5), %s1004_s6, 3 }
  0x1a   : > { %491 = vmatpush.msra.mxu2 %v1749_v8  ;;  %316 = vmatpush.msra.mxu0 %v250_v14  ;;  %v1911_v20 = vld [vmem:[%s3122_s2 + $0x70] sm:$0xff]  ;;  %v1840_v22 = vld [vmem:[%s3122_s2 + $0x38] sm:$0xff]  ;;  %v2244_v25 = vld [vmem:[%s2200_s12 + $0x8] sm:$0xff]  ;;  %s2834_s13 = scalar_lea.vmem (%p2136_p5), %s3123_s3, %s1949_s8 }
  0x1b   : > { %578 = vmatpush.msra.mxu3 %v1785_v9  ;;  %1753 = vmatmul.msk.f32.vlgmr.msra.gmra.mxu2 %vm253_vm0, %v2209_v16  ;;  %v647_v23 = vld [vmem:[%s3122_s2 + $0x10] sm:$0xff]  ;;  %v2266_v27 = vld [vmem:[%s2200_s12 + $0x18] sm:$0xff]  ;;  %v2277_v28 = vld [vmem:[%s2200_s12 + $0x20] sm:$0xff] }
  0x1c   : > { %834 = vmatpush.msrb.mxu2 %v1876_v12  ;;  %1789 = vmatmul.msk.f32.vlgmr.msra.gmra.mxu3 %vm253_vm0, %v2209_v16  ;;  %v1839_v24 = vld [vmem:[%s3122_s2 + $0x30] sm:$0xff]  ;;  %v1874_v29 = vld [vmem:[%s3122_s2 + $0x48] sm:$0xff]  ;;  %v2322_v35 = vld [vmem:[%s2200_s12 + $0x38] sm:$0xff] }
  0x1d   : > { %921 = vmatpush.msrb.mxu3 %v1912_v13  ;;  %403 = vmatpush.msra.mxu1 %v1714_v15  ;;  %v2255_v26 = vld [vmem:[%s2200_s12 + $0x10] sm:$0xff]  ;;  %v1910_v30 = vld [vmem:[%s3122_s2 + $0x68] sm:$0xff]  ;;  %v2333_v36 = vld [vmem:[%s2200_s12 + $0x40] sm:$0xff] }
  0x1e   : > { %835 = vmatpush.msrb.mxu2 %v1875_v19  ;;  %317 = vmatpush.msra.mxu0 %v249_v17  ;;  %v646_v31 = vld [vmem:[%s3122_s2 + $0x8] sm:$0xff]  ;;  %v2311_v34 = vld [vmem:[%s2200_s12 + $0x30] sm:$0xff]  ;;  %v1873_v37 = vld [vmem:[%s3122_s2 + $0x40] sm:$0xff] }
  0x1f   : > { %922 = vmatpush.msrb.mxu3 %v1911_v20  ;;  %404 = vmatpush.msra.mxu1 %v1713_v18  ;;  %v1838_v32 = vld [vmem:[%s3122_s2 + $0x28] sm:$0xff]  ;;  %v1909_v38 = vld [vmem:[%s3122_s2 + $0x60] sm:$0xff]  ;;  %v2367_v42 = vld [vmem:[%s2200_s12 + $0x50] sm:$0xff] }
  0x20   : > { %1697 = vmatmul.msk.f32.vlgmr.msra.gmra.mxu0 %vm253_vm0, %v2209_v16  ;;  %1717 = vmatmul.msk.f32.vlgmr.msra.gmra.mxu1 %vm253_vm0, %v2209_v16  ;;  %v2300_v33 = vld [vmem:[%s2200_s12 + $0x28] sm:$0xff]  ;;  %v645_v39 = vld [vmem:[%s3122_s2] sm:$0xff]  ;;  %v2378_v43 = vld [vmem:[%s2200_s12 + $0x58] sm:$0xff] }
  0x21   : > { %661 = vmatpush.msrb.mxu0 %v648_v21  ;;  %747 = vmatpush.msrb.mxu1 %v1840_v22  ;;  %v1837_v40 = vld [vmem:[%s3122_s2 + $0x20] sm:$0xff]  ;;  %v2356_v41 = vld [vmem:[%s2200_s12 + $0x48] sm:$0xff]  ;;  %v2411_v46 = vld [vmem:[%s2200_s12 + $0x70] sm:$0xff] }
  0x22   : > { %836 = vmatpush.msrb.mxu2 %v1874_v29  ;;  %923 = vmatpush.msrb.mxu3 %v1910_v30  ;;  %v2389_v44 = vld [vmem:[%s2200_s12 + $0x60] sm:$0xff]  ;;  %v2400_v45 = vld [vmem:[%s2200_s12 + $0x68] sm:$0xff]  ;;  %v2422_v47 = vld [vmem:[%s2200_s12 + $0x78] sm:$0xff]  ;;  %s2440_s12 = scalar_lea.vmem [#allocation2], %s2433_s5 }
  0x23   : > { %662 = vmatpush.msrb.mxu0 %v647_v23  ;;  %748 = vmatpush.msrb.mxu1 %v1839_v24 }
  0x24   : > { %1754 = vmatmul.msk.f32.gmra.mxu2 %vm253_vm0, %v2244_v25  ;;  %1790 = vmatmul.msk.f32.gmra.mxu3 %vm253_vm0, %v2244_v25 }
  0x25   : > { %663 = vmatpush.msrb.mxu0 %v646_v31  ;;  %749 = vmatpush.msrb.mxu1 %v1838_v32 }
  0x26   : > { %837 = vmatpush.msrb.mxu2 %v1873_v37  ;;  %924 = vmatpush.msrb.mxu3 %v1909_v38 }
  0x27   : > { %664 = vmatpush.msrb.mxu0 %v645_v39  ;;  %750 = vmatpush.msrb.mxu1 %v1837_v40 }
  0x28   : > { %1698 = vmatmul.msk.f32.gmra.mxu0 %vm253_vm0, %v2244_v25  ;;  %1718 = vmatmul.msk.f32.gmra.mxu1 %vm253_vm0, %v2244_v25 }
  0x2c   : > { %1755 = vmatmul.msk.f32.gmra.mxu2 %vm253_vm0, %v2255_v26  ;;  %1791 = vmatmul.msk.f32.gmra.mxu3 %vm253_vm0, %v2255_v26 }
  0x30   : > { %1699 = vmatmul.msk.f32.gmra.mxu0 %vm253_vm0, %v2255_v26  ;;  %1719 = vmatmul.msk.f32.gmra.mxu1 %vm253_vm0, %v2255_v26 }
  0x34   : > { %1756 = vmatmul.msk.f32.gmra.mxu2 %vm253_vm0, %v2266_v27  ;;  %1792 = vmatmul.msk.f32.gmra.mxu3 %vm253_vm0, %v2266_v27 }
  0x38   : > { %1700 = vmatmul.msk.f32.gmra.mxu0 %vm253_vm0, %v2266_v27  ;;  %1720 = vmatmul.msk.f32.gmra.mxu1 %vm253_vm0, %v2266_v27 }
  0x3c   : > { %1757 = vmatmul.msk.f32.gmra.mxu2 %vm253_vm0, %v2277_v28  ;;  %1793 = vmatmul.msk.f32.gmra.mxu3 %vm253_vm0, %v2277_v28 }
  0x40   : > { %1701 = vmatmul.msk.f32.gmra.mxu0 %vm253_vm0, %v2277_v28  ;;  %1721 = vmatmul.msk.f32.gmra.mxu1 %vm253_vm0, %v2277_v28 }
  0x44   : > { %1758 = vmatmul.msk.f32.gmra.mxu2 %vm253_vm0, %v2300_v33  ;;  %1794 = vmatmul.msk.f32.gmra.mxu3 %vm253_vm0, %v2300_v33 }
  0x48   : > { %1702 = vmatmul.msk.f32.gmra.mxu0 %vm253_vm0, %v2300_v33  ;;  %1722 = vmatmul.msk.f32.gmra.mxu1 %vm253_vm0, %v2300_v33 }
  0x4c   : > { %1759 = vmatmul.msk.f32.gmra.mxu2 %vm253_vm0, %v2311_v34  ;;  %1795 = vmatmul.msk.f32.gmra.mxu3 %vm253_vm0, %v2311_v34 }
  0x50   : > { %1703 = vmatmul.msk.f32.gmra.mxu0 %vm253_vm0, %v2311_v34  ;;  %1723 = vmatmul.msk.f32.gmra.mxu1 %vm253_vm0, %v2311_v34 }
  0x54   : > { %1760 = vmatmul.msk.f32.gmra.mxu2 %vm253_vm0, %v2322_v35  ;;  %1796 = vmatmul.msk.f32.gmra.mxu3 %vm253_vm0, %v2322_v35 }
  0x58   : > { %1704 = vmatmul.msk.f32.gmra.mxu0 %vm253_vm0, %v2322_v35  ;;  %1724 = vmatmul.msk.f32.gmra.mxu1 %vm253_vm0, %v2322_v35 }
  0x5c   : > { %1761 = vmatmul.msk.f32.gmra.mxu2 %vm253_vm0, %v2333_v36  ;;  %1797 = vmatmul.msk.f32.gmra.mxu3 %vm253_vm0, %v2333_v36 }
  0x60   : > { %1705 = vmatmul.msk.f32.gmra.mxu0 %vm253_vm0, %v2333_v36  ;;  %1725 = vmatmul.msk.f32.gmra.mxu1 %vm253_vm0, %v2333_v36 }
  0x64   : > { %1762 = vmatmul.msk.f32.gmra.mxu2 %vm253_vm0, %v2356_v41  ;;  %1798 = vmatmul.msk.f32.gmra.mxu3 %vm253_vm0, %v2356_v41 }
  0x68   : > { %1706 = vmatmul.msk.f32.gmra.mxu0 %vm253_vm0, %v2356_v41  ;;  %1726 = vmatmul.msk.f32.gmra.mxu1 %vm253_vm0, %v2356_v41 }
  0x6c   : > { %1763 = vmatmul.msk.f32.gmra.mxu2 %vm253_vm0, %v2367_v42  ;;  %1799 = vmatmul.msk.f32.gmra.mxu3 %vm253_vm0, %v2367_v42 }
  0x70   : > { %1707 = vmatmul.msk.f32.gmra.mxu0 %vm253_vm0, %v2367_v42  ;;  %1727 = vmatmul.msk.f32.gmra.mxu1 %vm253_vm0, %v2367_v42 }
  0x74   : > { %1764 = vmatmul.msk.f32.gmra.mxu2 %vm253_vm0, %v2378_v43  ;;  %1800 = vmatmul.msk.f32.gmra.mxu3 %vm253_vm0, %v2378_v43 }
  0x78   : > { %1708 = vmatmul.msk.f32.gmra.mxu0 %vm253_vm0, %v2378_v43  ;;  %1728 = vmatmul.msk.f32.gmra.mxu1 %vm253_vm0, %v2378_v43 }
  0x7c   : > { %1765 = vmatmul.msk.f32.gmra.mxu2 %vm253_vm0, %v2389_v44  ;;  %1801 = vmatmul.msk.f32.gmra.mxu3 %vm253_vm0, %v2389_v44 }
  0x80   : > { %1709 = vmatmul.msk.f32.gmra.mxu0 %vm253_vm0, %v2389_v44  ;;  %1729 = vmatmul.msk.f32.gmra.mxu1 %vm253_vm0, %v2389_v44 }
  0x84   : > { %1766 = vmatmul.msk.f32.gmra.mxu2 %vm253_vm0, %v2400_v45  ;;  %1802 = vmatmul.msk.f32.gmra.mxu3 %vm253_vm0, %v2400_v45 }
  0x88   : > { %1710 = vmatmul.msk.f32.gmra.mxu0 %vm253_vm0, %v2400_v45  ;;  %1730 = vmatmul.msk.f32.gmra.mxu1 %vm253_vm0, %v2400_v45 }
  0x8c   : > { %1767 = vmatmul.msk.f32.gmra.mxu2 %vm253_vm0, %v2411_v46  ;;  %1803 = vmatmul.msk.f32.gmra.mxu3 %vm253_vm0, %v2411_v46 }
  0x90   : > { %1711 = vmatmul.msk.f32.gmra.mxu0 %vm253_vm0, %v2411_v46  ;;  %1731 = vmatmul.msk.f32.gmra.mxu1 %vm253_vm0, %v2411_v46 }
  0x94   : > { %1768 = vmatmul.msk.f32.gmra.mxu2 %vm253_vm0, %v2422_v47  ;;  %1804 = vmatmul.msk.f32.gmra.mxu3 %vm253_vm0, %v2422_v47 }
  0x98   : > { %1712 = vmatmul.msk.f32.gmra.mxu0 %vm253_vm0, %v2422_v47  ;;  %1732 = vmatmul.msk.f32.gmra.mxu1 %vm253_vm0, %v2422_v47 }
  0x9c   : > { %1877 = vmatmul.msk.f32.vlgmr.msrb.gmra.mxu2 %vm253_vm0, %v2209_v16  ;;  %1913 = vmatmul.msk.f32.vlgmr.msrb.gmra.mxu3 %vm253_vm0, %v2209_v16 }
  0x9d   : > { %v319_v48 = vpop.f32.mrf.mxu0  ;;  %v406_v49 = vpop.f32.mrf.mxu1 }
  0x9e   : > { %368 = vst.msk [vmem:[%s2440_s12] sm:$0xff] %vm367_vm1, %v319_v48  ;;  %v493_v50 = vpop.f32.mrf.mxu2 }
  0x9f   : > { %1733 = vst.msk [vmem:[%s2440_s12 + $0x80] sm:$0xff] %vm367_vm1, %v406_v49  ;;  %v580_v51 = vpop.f32.mrf.mxu3 }
  0xa0   : > { %1769 = vst.msk [vmem:[%s2440_s12 + $0x100] sm:$0xff] %vm367_vm1, %v493_v50  ;;  %1821 = vmatmul.msk.f32.vlgmr.msrb.gmra.mxu0 %vm253_vm0, %v2209_v16  ;;  %1841 = vmatmul.msk.f32.vlgmr.msrb.gmra.mxu1 %vm253_vm0, %v2209_v16 }
  0xa1   : > { %1805 = vst.msk [vmem:[%s2440_s12 + $0x180] sm:$0xff] %vm367_vm1, %v580_v51 }
  0xa4   : > { %1878 = vmatmul.msk.f32.gmra.mxu2 %vm253_vm0, %v2244_v25  ;;  %1914 = vmatmul.msk.f32.gmra.mxu3 %vm253_vm0, %v2244_v25 }
  0xa5   : > { %v322_v52 = vpop.f32.mrf.mxu0  ;;  %v409_v53 = vpop.f32.mrf.mxu1 }
  0xa6   : > { %369 = vst.msk [vmem:[%s2440_s12 + $0x8] sm:$0xff] %vm367_vm1, %v322_v52 }
  0xa7   : > { %1734 = vst.msk [vmem:[%s2440_s12 + $0x88] sm:$0xff] %vm367_vm1, %v409_v53  ;;  %v496_v54 = vpop.f32.mrf.mxu2  ;;  %v583_v55 = vpop.f32.mrf.mxu3 }
  0xa8   : > { %1770 = vst.msk [vmem:[%s2440_s12 + $0x108] sm:$0xff] %vm367_vm1, %v496_v54  ;;  %1822 = vmatmul.msk.f32.gmra.mxu0 %vm253_vm0, %v2244_v25  ;;  %1842 = vmatmul.msk.f32.gmra.mxu1 %vm253_vm0, %v2244_v25 }
  0xa9   : > { %1806 = vst.msk [vmem:[%s2440_s12 + $0x188] sm:$0xff] %vm367_vm1, %v583_v55 }
  0xac   : > { %1879 = vmatmul.msk.f32.gmra.mxu2 %vm253_vm0, %v2255_v26  ;;  %1915 = vmatmul.msk.f32.gmra.mxu3 %vm253_vm0, %v2255_v26 }
  0xad   : > { %v325_v56 = vpop.f32.mrf.mxu0  ;;  %v412_v57 = vpop.f32.mrf.mxu1 }
  0xae   : > { %370 = vst.msk [vmem:[%s2440_s12 + $0x10] sm:$0xff] %vm367_vm1, %v325_v56 }
  0xaf   : > { %1735 = vst.msk [vmem:[%s2440_s12 + $0x90] sm:$0xff] %vm367_vm1, %v412_v57  ;;  %v499_v58 = vpop.f32.mrf.mxu2  ;;  %v586_v59 = vpop.f32.mrf.mxu3 }
  0xb0   : > { %1771 = vst.msk [vmem:[%s2440_s12 + $0x110] sm:$0xff] %vm367_vm1, %v499_v58  ;;  %1823 = vmatmul.msk.f32.gmra.mxu0 %vm253_vm0, %v2255_v26  ;;  %1843 = vmatmul.msk.f32.gmra.mxu1 %vm253_vm0, %v2255_v26 }
  0xb1   : > { %1807 = vst.msk [vmem:[%s2440_s12 + $0x190] sm:$0xff] %vm367_vm1, %v586_v59 }
  0xb4   : > { %1880 = vmatmul.msk.f32.gmra.mxu2 %vm253_vm0, %v2266_v27  ;;  %1916 = vmatmul.msk.f32.gmra.mxu3 %vm253_vm0, %v2266_v27 }
  0xb5   : > { %v328_v60 = vpop.f32.mrf.mxu0  ;;  %v415_v61 = vpop.f32.mrf.mxu1 }
  0xb6   : > { %371 = vst.msk [vmem:[%s2440_s12 + $0x18] sm:$0xff] %vm367_vm1, %v328_v60 }
  0xb7   : > { %1736 = vst.msk [vmem:[%s2440_s12 + $0x98] sm:$0xff] %vm367_vm1, %v415_v61  ;;  %v502_v62 = vpop.f32.mrf.mxu2  ;;  %v589_v63 = vpop.f32.mrf.mxu3 }
  0xb8   : > { %1772 = vst.msk [vmem:[%s2440_s12 + $0x118] sm:$0xff] %vm367_vm1, %v502_v62  ;;  %1824 = vmatmul.msk.f32.gmra.mxu0 %vm253_vm0, %v2266_v27  ;;  %1844 = vmatmul.msk.f32.gmra.mxu1 %vm253_vm0, %v2266_v27 }
  0xb9   : > { %1808 = vst.msk [vmem:[%s2440_s12 + $0x198] sm:$0xff] %vm367_vm1, %v589_v63 }
  0xbc   : > { %1881 = vmatmul.msk.f32.gmra.mxu2 %vm253_vm0, %v2277_v28  ;;  %1917 = vmatmul.msk.f32.gmra.mxu3 %vm253_vm0, %v2277_v28 }
  0xbd   : > { %v331_v0 = vpop.f32.mrf.mxu0  ;;  %v418_v1 = vpop.f32.mrf.mxu1 }
  0xbe   : > { %372 = vst.msk [vmem:[%s2440_s12 + $0x20] sm:$0xff] %vm367_vm1, %v331_v0 }
  0xbf   : > { %1737 = vst.msk [vmem:[%s2440_s12 + $0xa0] sm:$0xff] %vm367_vm1, %v418_v1  ;;  %v505_v2 = vpop.f32.mrf.mxu2  ;;  %v592_v3 = vpop.f32.mrf.mxu3 }
  0xc0   : > { %1773 = vst.msk [vmem:[%s2440_s12 + $0x120] sm:$0xff] %vm367_vm1, %v505_v2  ;;  %1825 = vmatmul.msk.f32.gmra.mxu0 %vm253_vm0, %v2277_v28  ;;  %1845 = vmatmul.msk.f32.gmra.mxu1 %vm253_vm0, %v2277_v28 }
  0xc1   : > { %1809 = vst.msk [vmem:[%s2440_s12 + $0x1a0] sm:$0xff] %vm367_vm1, %v592_v3 }
  0xc4   : > { %1882 = vmatmul.msk.f32.gmra.mxu2 %vm253_vm0, %v2300_v33  ;;  %1918 = vmatmul.msk.f32.gmra.mxu3 %vm253_vm0, %v2300_v33 }
  0xc5   : > { %v334_v4 = vpop.f32.mrf.mxu0  ;;  %v421_v5 = vpop.f32.mrf.mxu1 }
  0xc6   : > { %373 = vst.msk [vmem:[%s2440_s12 + $0x28] sm:$0xff] %vm367_vm1, %v334_v4 }
  0xc7   : > { %1738 = vst.msk [vmem:[%s2440_s12 + $0xa8] sm:$0xff] %vm367_vm1, %v421_v5  ;;  %v508_v6 = vpop.f32.mrf.mxu2  ;;  %v595_v7 = vpop.f32.mrf.mxu3 }
  0xc8   : > { %1774 = vst.msk [vmem:[%s2440_s12 + $0x128] sm:$0xff] %vm367_vm1, %v508_v6  ;;  %1826 = vmatmul.msk.f32.gmra.mxu0 %vm253_vm0, %v2300_v33  ;;  %1846 = vmatmul.msk.f32.gmra.mxu1 %vm253_vm0, %v2300_v33 }
  0xc9   : > { %1810 = vst.msk [vmem:[%s2440_s12 + $0x1a8] sm:$0xff] %vm367_vm1, %v595_v7 }
  0xcc   : > { %1883 = vmatmul.msk.f32.gmra.mxu2 %vm253_vm0, %v2311_v34  ;;  %1919 = vmatmul.msk.f32.gmra.mxu3 %vm253_vm0, %v2311_v34 }
  0xcd   : > { %v337_v8 = vpop.f32.mrf.mxu0  ;;  %v424_v9 = vpop.f32.mrf.mxu1 }
  0xce   : > { %374 = vst.msk [vmem:[%s2440_s12 + $0x30] sm:$0xff] %vm367_vm1, %v337_v8 }
  0xcf   : > { %1739 = vst.msk [vmem:[%s2440_s12 + $0xb0] sm:$0xff] %vm367_vm1, %v424_v9  ;;  %v511_v10 = vpop.f32.mrf.mxu2  ;;  %v598_v11 = vpop.f32.mrf.mxu3 }
  0xd0   : > { %1775 = vst.msk [vmem:[%s2440_s12 + $0x130] sm:$0xff] %vm367_vm1, %v511_v10  ;;  %1827 = vmatmul.msk.f32.gmra.mxu0 %vm253_vm0, %v2311_v34  ;;  %1847 = vmatmul.msk.f32.gmra.mxu1 %vm253_vm0, %v2311_v34 }
  0xd1   : > { %1811 = vst.msk [vmem:[%s2440_s12 + $0x1b0] sm:$0xff] %vm367_vm1, %v598_v11 }
  0xd4   : > { %1884 = vmatmul.msk.f32.gmra.mxu2 %vm253_vm0, %v2322_v35  ;;  %1920 = vmatmul.msk.f32.gmra.mxu3 %vm253_vm0, %v2322_v35 }
  0xd5   : > { %v340_v12 = vpop.f32.mrf.mxu0  ;;  %v427_v13 = vpop.f32.mrf.mxu1 }
  0xd6   : > { %375 = vst.msk [vmem:[%s2440_s12 + $0x38] sm:$0xff] %vm367_vm1, %v340_v12 }
  0xd7   : > { %1740 = vst.msk [vmem:[%s2440_s12 + $0xb8] sm:$0xff] %vm367_vm1, %v427_v13  ;;  %v514_v14 = vpop.f32.mrf.mxu2  ;;  %v601_v15 = vpop.f32.mrf.mxu3 }
  0xd8   : > { %1776 = vst.msk [vmem:[%s2440_s12 + $0x138] sm:$0xff] %vm367_vm1, %v514_v14  ;;  %1828 = vmatmul.msk.f32.gmra.mxu0 %vm253_vm0, %v2322_v35  ;;  %1848 = vmatmul.msk.f32.gmra.mxu1 %vm253_vm0, %v2322_v35 }
  0xd9   : > { %1812 = vst.msk [vmem:[%s2440_s12 + $0x1b8] sm:$0xff] %vm367_vm1, %v601_v15 }
  0xdc   : > { %1885 = vmatmul.msk.f32.gmra.mxu2 %vm253_vm0, %v2333_v36  ;;  %1921 = vmatmul.msk.f32.gmra.mxu3 %vm253_vm0, %v2333_v36 }
  0xdd   : > { %v343_v16 = vpop.f32.mrf.mxu0  ;;  %v430_v17 = vpop.f32.mrf.mxu1 }
  0xde   : > { %376 = vst.msk [vmem:[%s2440_s12 + $0x40] sm:$0xff] %vm367_vm1, %v343_v16 }
  0xdf   : > { %1741 = vst.msk [vmem:[%s2440_s12 + $0xc0] sm:$0xff] %vm367_vm1, %v430_v17  ;;  %v517_v18 = vpop.f32.mrf.mxu2  ;;  %v604_v19 = vpop.f32.mrf.mxu3 }
  0xe0   : > { %1777 = vst.msk [vmem:[%s2440_s12 + $0x140] sm:$0xff] %vm367_vm1, %v517_v18  ;;  %1829 = vmatmul.msk.f32.gmra.mxu0 %vm253_vm0, %v2333_v36  ;;  %1849 = vmatmul.msk.f32.gmra.mxu1 %vm253_vm0, %v2333_v36 }
  0xe1   : > { %1813 = vst.msk [vmem:[%s2440_s12 + $0x1c0] sm:$0xff] %vm367_vm1, %v604_v19 }
  0xe4   : > { %1886 = vmatmul.msk.f32.gmra.mxu2 %vm253_vm0, %v2356_v41  ;;  %1922 = vmatmul.msk.f32.gmra.mxu3 %vm253_vm0, %v2356_v41 }
  0xe5   : > { %v346_v20 = vpop.f32.mrf.mxu0  ;;  %v433_v21 = vpop.f32.mrf.mxu1 }
  0xe6   : > { %377 = vst.msk [vmem:[%s2440_s12 + $0x48] sm:$0xff] %vm367_vm1, %v346_v20 }
  0xe7   : > { %1742 = vst.msk [vmem:[%s2440_s12 + $0xc8] sm:$0xff] %vm367_vm1, %v433_v21  ;;  %v520_v22 = vpop.f32.mrf.mxu2  ;;  %v607_v23 = vpop.f32.mrf.mxu3 }
  0xe8   : > { %1778 = vst.msk [vmem:[%s2440_s12 + $0x148] sm:$0xff] %vm367_vm1, %v520_v22  ;;  %1830 = vmatmul.msk.f32.gmra.mxu0 %vm253_vm0, %v2356_v41  ;;  %1850 = vmatmul.msk.f32.gmra.mxu1 %vm253_vm0, %v2356_v41 }
  0xe9   : > { %1814 = vst.msk [vmem:[%s2440_s12 + $0x1c8] sm:$0xff] %vm367_vm1, %v607_v23 }
  0xec   : > { %1887 = vmatmul.msk.f32.gmra.mxu2 %vm253_vm0, %v2367_v42  ;;  %1923 = vmatmul.msk.f32.gmra.mxu3 %vm253_vm0, %v2367_v42 }
  0xed   : > { %v349_v24 = vpop.f32.mrf.mxu0  ;;  %v436_v25 = vpop.f32.mrf.mxu1 }
  0xee   : > { %378 = vst.msk [vmem:[%s2440_s12 + $0x50] sm:$0xff] %vm367_vm1, %v349_v24 }
  0xef   : > { %1743 = vst.msk [vmem:[%s2440_s12 + $0xd0] sm:$0xff] %vm367_vm1, %v436_v25  ;;  %v523_v26 = vpop.f32.mrf.mxu2  ;;  %v610_v27 = vpop.f32.mrf.mxu3 }
  0xf0   : > { %1779 = vst.msk [vmem:[%s2440_s12 + $0x150] sm:$0xff] %vm367_vm1, %v523_v26  ;;  %1831 = vmatmul.msk.f32.gmra.mxu0 %vm253_vm0, %v2367_v42  ;;  %1851 = vmatmul.msk.f32.gmra.mxu1 %vm253_vm0, %v2367_v42 }
  0xf1   : > { %1815 = vst.msk [vmem:[%s2440_s12 + $0x1d0] sm:$0xff] %vm367_vm1, %v610_v27 }
  0xf4   : > { %1888 = vmatmul.msk.f32.gmra.mxu2 %vm253_vm0, %v2378_v43  ;;  %1924 = vmatmul.msk.f32.gmra.mxu3 %vm253_vm0, %v2378_v43 }
  0xf5   : > { %v352_v28 = vpop.f32.mrf.mxu0  ;;  %v439_v29 = vpop.f32.mrf.mxu1 }
  0xf6   : > { %379 = vst.msk [vmem:[%s2440_s12 + $0x58] sm:$0xff] %vm367_vm1, %v352_v28 }
  0xf7   : > { %1744 = vst.msk [vmem:[%s2440_s12 + $0xd8] sm:$0xff] %vm367_vm1, %v439_v29  ;;  %v526_v30 = vpop.f32.mrf.mxu2  ;;  %v613_v31 = vpop.f32.mrf.mxu3 }
  0xf8   : > { %1780 = vst.msk [vmem:[%s2440_s12 + $0x158] sm:$0xff] %vm367_vm1, %v526_v30  ;;  %1832 = vmatmul.msk.f32.gmra.mxu0 %vm253_vm0, %v2378_v43  ;;  %1852 = vmatmul.msk.f32.gmra.mxu1 %vm253_vm0, %v2378_v43 }
  0xf9   : > { %1816 = vst.msk [vmem:[%s2440_s12 + $0x1d8] sm:$0xff] %vm367_vm1, %v613_v31 }
  0xfc   : > { %1889 = vmatmul.msk.f32.gmra.mxu2 %vm253_vm0, %v2389_v44  ;;  %1925 = vmatmul.msk.f32.gmra.mxu3 %vm253_vm0, %v2389_v44 }
  0xfd   : > { %v355_v32 = vpop.f32.mrf.mxu0  ;;  %v442_v33 = vpop.f32.mrf.mxu1 }
  0xfe   : > { %380 = vst.msk [vmem:[%s2440_s12 + $0x60] sm:$0xff] %vm367_vm1, %v355_v32 }
  0xff   : > { %1745 = vst.msk [vmem:[%s2440_s12 + $0xe0] sm:$0xff] %vm367_vm1, %v442_v33  ;;  %v529_v34 = vpop.f32.mrf.mxu2  ;;  %v616_v35 = vpop.f32.mrf.mxu3 }
 0x100   : > { %1781 = vst.msk [vmem:[%s2440_s12 + $0x160] sm:$0xff] %vm367_vm1, %v529_v34  ;;  %1833 = vmatmul.msk.f32.gmra.mxu0 %vm253_vm0, %v2389_v44  ;;  %1853 = vmatmul.msk.f32.gmra.mxu1 %vm253_vm0, %v2389_v44 }
 0x101   : > { %1817 = vst.msk [vmem:[%s2440_s12 + $0x1e0] sm:$0xff] %vm367_vm1, %v616_v35 }
 0x104   : > { %1890 = vmatmul.msk.f32.gmra.mxu2 %vm253_vm0, %v2400_v45  ;;  %1926 = vmatmul.msk.f32.gmra.mxu3 %vm253_vm0, %v2400_v45 }
 0x105   : > { %v358_v36 = vpop.f32.mrf.mxu0  ;;  %v445_v37 = vpop.f32.mrf.mxu1 }
 0x106   : > { %381 = vst.msk [vmem:[%s2440_s12 + $0x68] sm:$0xff] %vm367_vm1, %v358_v36 }
 0x107   : > { %1746 = vst.msk [vmem:[%s2440_s12 + $0xe8] sm:$0xff] %vm367_vm1, %v445_v37  ;;  %v532_v38 = vpop.f32.mrf.mxu2  ;;  %v619_v39 = vpop.f32.mrf.mxu3 }
 0x108   : > { %1782 = vst.msk [vmem:[%s2440_s12 + $0x168] sm:$0xff] %vm367_vm1, %v532_v38  ;;  %1834 = vmatmul.msk.f32.gmra.mxu0 %vm253_vm0, %v2400_v45  ;;  %1854 = vmatmul.msk.f32.gmra.mxu1 %vm253_vm0, %v2400_v45 }
 0x109   : > { %1818 = vst.msk [vmem:[%s2440_s12 + $0x1e8] sm:$0xff] %vm367_vm1, %v619_v39 }
 0x10c   : > { %1891 = vmatmul.msk.f32.gmra.mxu2 %vm253_vm0, %v2411_v46  ;;  %1927 = vmatmul.msk.f32.gmra.mxu3 %vm253_vm0, %v2411_v46 }
 0x10d   : > { %v361_v40 = vpop.f32.mrf.mxu0  ;;  %v448_v41 = vpop.f32.mrf.mxu1 }
 0x10e   : > { %382 = vst.msk [vmem:[%s2440_s12 + $0x70] sm:$0xff] %vm367_vm1, %v361_v40 }
 0x10f   : > { %1747 = vst.msk [vmem:[%s2440_s12 + $0xf0] sm:$0xff] %vm367_vm1, %v448_v41  ;;  %v535_v42 = vpop.f32.mrf.mxu2  ;;  %v622_v43 = vpop.f32.mrf.mxu3 }
 0x110   : > { %1783 = vst.msk [vmem:[%s2440_s12 + $0x170] sm:$0xff] %vm367_vm1, %v535_v42  ;;  %1835 = vmatmul.msk.f32.gmra.mxu0 %vm253_vm0, %v2411_v46  ;;  %1855 = vmatmul.msk.f32.gmra.mxu1 %vm253_vm0, %v2411_v46 }
 0x111   : > { %1819 = vst.msk [vmem:[%s2440_s12 + $0x1f0] sm:$0xff] %vm367_vm1, %v622_v43 }
 0x114   : > { %1892 = vmatmul.msk.f32.gmra.mxu2 %vm253_vm0, %v2422_v47  ;;  %1928 = vmatmul.msk.f32.gmra.mxu3 %vm253_vm0, %v2422_v47 }
 0x115   : > { %v364_v44 = vpop.f32.mrf.mxu0  ;;  %v451_v45 = vpop.f32.mrf.mxu1 }
 0x116   : > { %383 = vst.msk [vmem:[%s2440_s12 + $0x78] sm:$0xff] %vm367_vm1, %v364_v44 }
 0x117   : > { %1748 = vst.msk [vmem:[%s2440_s12 + $0xf8] sm:$0xff] %vm367_vm1, %v451_v45  ;;  %v538_v48 = vpop.f32.mrf.mxu2  ;;  %v625_v49 = vpop.f32.mrf.mxu3 }
 0x118   : > { %1784 = vst.msk [vmem:[%s2440_s12 + $0x178] sm:$0xff] %vm367_vm1, %v538_v48  ;;  %1836 = vmatmul.msk.f32.gmra.mxu0 %vm253_vm0, %v2422_v47  ;;  %1856 = vmatmul.msk.f32.gmra.mxu1 %vm253_vm0, %v2422_v47 }
 0x119   : > { %1820 = vst.msk [vmem:[%s2440_s12 + $0x1f8] sm:$0xff] %vm367_vm1, %v625_v49 }
 0x11d   : > { %v666_v46 = vpop.f32.mrf.mxu0  ;;  %v752_v50 = vpop.f32.mrf.mxu1 }
 0x11e   : > { %714 = vst.msk [vmem:[%s2695_s15] sm:$0xff] %vm367_vm1, %v666_v46  ;;  %v1161_v46 = vld [vmem:[%s2440_s12] sm:$0xff] (%p2136_p5) }
 0x11f   : > { %1857 = vst.msk [vmem:[%s2695_s15 + $0x80] sm:$0xff] %vm367_vm1, %v752_v50  ;;  %v839_v47 = vpop.f32.mrf.mxu2  ;;  %v926_v51 = vpop.f32.mrf.mxu3  ;;  %v1163_v50 = vld [vmem:[%s2440_s12 + $0x8] sm:$0xff] (%p2136_p5) }
 0x120   : > { %1893 = vst.msk [vmem:[%s2695_s15 + $0x100] sm:$0xff] %vm367_vm1, %v839_v47  ;;  %v1165_v47 = vld [vmem:[%s2440_s12 + $0x10] sm:$0xff] (%p2136_p5) }
 0x121   : > { %1929 = vst.msk [vmem:[%s2695_s15 + $0x180] sm:$0xff] %vm367_vm1, %v926_v51  ;;  %v1167_v51 = vld [vmem:[%s2440_s12 + $0x18] sm:$0xff] (%p2136_p5) }
 0x122   : > { %1162 = vst [vmem:[%s2834_s13] sm:$0xff] (%p2136_p5), %v1161_v46 }
 0x123   : > { %1164 = vst [vmem:[%s2834_s13 + $0x8] sm:$0xff] (%p2136_p5), %v1163_v50 }
 0x124   : > { %1166 = vst [vmem:[%s2834_s13 + $0x10] sm:$0xff] (%p2136_p5), %v1165_v47 }
 0x125   : > { %v669_v52 = vpop.f32.mrf.mxu0  ;;  %v755_v53 = vpop.f32.mrf.mxu1  ;;  %1168 = vst [vmem:[%s2834_s13 + $0x18] sm:$0xff] (%p2136_p5), %v1167_v51 }
 0x126   : > { %715 = vst.msk [vmem:[%s2695_s15 + $0x8] sm:$0xff] %vm367_vm1, %v669_v52  ;;  %v1169_v52 = vld [vmem:[%s2440_s12 + $0x20] sm:$0xff] (%p2136_p5) }
 0x127   : > { %1858 = vst.msk [vmem:[%s2695_s15 + $0x88] sm:$0xff] %vm367_vm1, %v755_v53  ;;  %v842_v54 = vpop.f32.mrf.mxu2  ;;  %v929_v55 = vpop.f32.mrf.mxu3  ;;  %v1171_v53 = vld [vmem:[%s2440_s12 + $0x28] sm:$0xff] (%p2136_p5) }
 0x128   : > { %1894 = vst.msk [vmem:[%s2695_s15 + $0x108] sm:$0xff] %vm367_vm1, %v842_v54  ;;  %v1173_v54 = vld [vmem:[%s2440_s12 + $0x30] sm:$0xff] (%p2136_p5) }
 0x129   : > { %1930 = vst.msk [vmem:[%s2695_s15 + $0x188] sm:$0xff] %vm367_vm1, %v929_v55  ;;  %v1175_v55 = vld [vmem:[%s2440_s12 + $0x38] sm:$0xff] (%p2136_p5) }
 0x12a   : > { %1170 = vst [vmem:[%s2834_s13 + $0x20] sm:$0xff] (%p2136_p5), %v1169_v52 }
 0x12b   : > { %1172 = vst [vmem:[%s2834_s13 + $0x28] sm:$0xff] (%p2136_p5), %v1171_v53 }
 0x12c   : > { %1174 = vst [vmem:[%s2834_s13 + $0x30] sm:$0xff] (%p2136_p5), %v1173_v54 }
 0x12d   : > { %v672_v56 = vpop.f32.mrf.mxu0  ;;  %v758_v57 = vpop.f32.mrf.mxu1  ;;  %1176 = vst [vmem:[%s2834_s13 + $0x38] sm:$0xff] (%p2136_p5), %v1175_v55 }
 0x12e   : > { %716 = vst.msk [vmem:[%s2695_s15 + $0x10] sm:$0xff] %vm367_vm1, %v672_v56  ;;  %v1177_v56 = vld [vmem:[%s2440_s12 + $0x40] sm:$0xff] (%p2136_p5) }
 0x12f   : > { %1859 = vst.msk [vmem:[%s2695_s15 + $0x90] sm:$0xff] %vm367_vm1, %v758_v57  ;;  %v845_v58 = vpop.f32.mrf.mxu2  ;;  %v932_v59 = vpop.f32.mrf.mxu3  ;;  %v1179_v57 = vld [vmem:[%s2440_s12 + $0x48] sm:$0xff] (%p2136_p5) }
 0x130   : > { %1895 = vst.msk [vmem:[%s2695_s15 + $0x110] sm:$0xff] %vm367_vm1, %v845_v58  ;;  %v1181_v58 = vld [vmem:[%s2440_s12 + $0x50] sm:$0xff] (%p2136_p5) }
 0x131   : > { %1931 = vst.msk [vmem:[%s2695_s15 + $0x190] sm:$0xff] %vm367_vm1, %v932_v59  ;;  %v1183_v59 = vld [vmem:[%s2440_s12 + $0x58] sm:$0xff] (%p2136_p5) }
 0x132   : > { %1178 = vst [vmem:[%s2834_s13 + $0x40] sm:$0xff] (%p2136_p5), %v1177_v56 }
 0x133   : > { %1180 = vst [vmem:[%s2834_s13 + $0x48] sm:$0xff] (%p2136_p5), %v1179_v57 }
 0x134   : > { %1182 = vst [vmem:[%s2834_s13 + $0x50] sm:$0xff] (%p2136_p5), %v1181_v58 }
 0x135   : > { %v675_v60 = vpop.f32.mrf.mxu0  ;;  %v761_v61 = vpop.f32.mrf.mxu1  ;;  %1184 = vst [vmem:[%s2834_s13 + $0x58] sm:$0xff] (%p2136_p5), %v1183_v59 }
 0x136   : > { %717 = vst.msk [vmem:[%s2695_s15 + $0x18] sm:$0xff] %vm367_vm1, %v675_v60  ;;  %v1185_v60 = vld [vmem:[%s2440_s12 + $0x60] sm:$0xff] (%p2136_p5) }
 0x137   : > { %1860 = vst.msk [vmem:[%s2695_s15 + $0x98] sm:$0xff] %vm367_vm1, %v761_v61  ;;  %v848_v62 = vpop.f32.mrf.mxu2  ;;  %v935_v63 = vpop.f32.mrf.mxu3  ;;  %v1187_v61 = vld [vmem:[%s2440_s12 + $0x68] sm:$0xff] (%p2136_p5) }
 0x138   : > { %1896 = vst.msk [vmem:[%s2695_s15 + $0x118] sm:$0xff] %vm367_vm1, %v848_v62  ;;  %v1189_v62 = vld [vmem:[%s2440_s12 + $0x70] sm:$0xff] (%p2136_p5) }
 0x139   : > { %1932 = vst.msk [vmem:[%s2695_s15 + $0x198] sm:$0xff] %vm367_vm1, %v935_v63  ;;  %v1191_v63 = vld [vmem:[%s2440_s12 + $0x78] sm:$0xff] (%p2136_p5) }
 0x13a   : > { %1186 = vst [vmem:[%s2834_s13 + $0x60] sm:$0xff] (%p2136_p5), %v1185_v60 }
 0x13b   : > { %1188 = vst [vmem:[%s2834_s13 + $0x68] sm:$0xff] (%p2136_p5), %v1187_v61 }
 0x13c   : > { %1190 = vst [vmem:[%s2834_s13 + $0x70] sm:$0xff] (%p2136_p5), %v1189_v62 }
 0x13d   : > { %v678_v0 = vpop.f32.mrf.mxu0  ;;  %v764_v1 = vpop.f32.mrf.mxu1  ;;  %1192 = vst [vmem:[%s2834_s13 + $0x78] sm:$0xff] (%p2136_p5), %v1191_v63 }
 0x13e   : > { %718 = vst.msk [vmem:[%s2695_s15 + $0x20] sm:$0xff] %vm367_vm1, %v678_v0  ;;  %v1193_v0 = vld [vmem:[%s2440_s12 + $0x80] sm:$0xff] (%p2136_p5) }
 0x13f   : > { %1861 = vst.msk [vmem:[%s2695_s15 + $0xa0] sm:$0xff] %vm367_vm1, %v764_v1  ;;  %v851_v2 = vpop.f32.mrf.mxu2  ;;  %v938_v3 = vpop.f32.mrf.mxu3  ;;  %v1195_v1 = vld [vmem:[%s2440_s12 + $0x88] sm:$0xff] (%p2136_p5) }
 0x140   : > { %1897 = vst.msk [vmem:[%s2695_s15 + $0x120] sm:$0xff] %vm367_vm1, %v851_v2  ;;  %v1197_v2 = vld [vmem:[%s2440_s12 + $0x90] sm:$0xff] (%p2136_p5) }
 0x141   : > { %1933 = vst.msk [vmem:[%s2695_s15 + $0x1a0] sm:$0xff] %vm367_vm1, %v938_v3  ;;  %v1199_v3 = vld [vmem:[%s2440_s12 + $0x98] sm:$0xff] (%p2136_p5) }
 0x142   : > { %1194 = vst [vmem:[%s2834_s13 + $0x100] sm:$0xff] (%p2136_p5), %v1193_v0 }
 0x143   : > { %1196 = vst [vmem:[%s2834_s13 + $0x108] sm:$0xff] (%p2136_p5), %v1195_v1 }
 0x144   : > { %1198 = vst [vmem:[%s2834_s13 + $0x110] sm:$0xff] (%p2136_p5), %v1197_v2 }
 0x145   : > { %v681_v4 = vpop.f32.mrf.mxu0  ;;  %v767_v5 = vpop.f32.mrf.mxu1  ;;  %1200 = vst [vmem:[%s2834_s13 + $0x118] sm:$0xff] (%p2136_p5), %v1199_v3 }
 0x146   : > { %719 = vst.msk [vmem:[%s2695_s15 + $0x28] sm:$0xff] %vm367_vm1, %v681_v4  ;;  %v1201_v4 = vld [vmem:[%s2440_s12 + $0xa0] sm:$0xff] (%p2136_p5) }
 0x147   : > { %1862 = vst.msk [vmem:[%s2695_s15 + $0xa8] sm:$0xff] %vm367_vm1, %v767_v5  ;;  %v854_v6 = vpop.f32.mrf.mxu2  ;;  %v941_v7 = vpop.f32.mrf.mxu3  ;;  %v1203_v5 = vld [vmem:[%s2440_s12 + $0xa8] sm:$0xff] (%p2136_p5) }
 0x148   : > { %1898 = vst.msk [vmem:[%s2695_s15 + $0x128] sm:$0xff] %vm367_vm1, %v854_v6  ;;  %v1205_v6 = vld [vmem:[%s2440_s12 + $0xb0] sm:$0xff] (%p2136_p5) }
 0x149   : > { %1934 = vst.msk [vmem:[%s2695_s15 + $0x1a8] sm:$0xff] %vm367_vm1, %v941_v7  ;;  %v1207_v7 = vld [vmem:[%s2440_s12 + $0xb8] sm:$0xff] (%p2136_p5) }
 0x14a   : > { %1202 = vst [vmem:[%s2834_s13 + $0x120] sm:$0xff] (%p2136_p5), %v1201_v4 }
 0x14b   : > { %1204 = vst [vmem:[%s2834_s13 + $0x128] sm:$0xff] (%p2136_p5), %v1203_v5 }
 0x14c   : > { %1206 = vst [vmem:[%s2834_s13 + $0x130] sm:$0xff] (%p2136_p5), %v1205_v6 }
 0x14d   : > { %v684_v8 = vpop.f32.mrf.mxu0  ;;  %v770_v9 = vpop.f32.mrf.mxu1  ;;  %1208 = vst [vmem:[%s2834_s13 + $0x138] sm:$0xff] (%p2136_p5), %v1207_v7 }
 0x14e   : > { %720 = vst.msk [vmem:[%s2695_s15 + $0x30] sm:$0xff] %vm367_vm1, %v684_v8  ;;  %v1209_v8 = vld [vmem:[%s2440_s12 + $0xc0] sm:$0xff] (%p2136_p5) }
 0x14f   : > { %1863 = vst.msk [vmem:[%s2695_s15 + $0xb0] sm:$0xff] %vm367_vm1, %v770_v9  ;;  %v857_v10 = vpop.f32.mrf.mxu2  ;;  %v944_v11 = vpop.f32.mrf.mxu3  ;;  %v1211_v9 = vld [vmem:[%s2440_s12 + $0xc8] sm:$0xff] (%p2136_p5) }
 0x150   : > { %1899 = vst.msk [vmem:[%s2695_s15 + $0x130] sm:$0xff] %vm367_vm1, %v857_v10  ;;  %v1213_v10 = vld [vmem:[%s2440_s12 + $0xd0] sm:$0xff] (%p2136_p5) }
 0x151   : > { %1935 = vst.msk [vmem:[%s2695_s15 + $0x1b0] sm:$0xff] %vm367_vm1, %v944_v11  ;;  %v1215_v11 = vld [vmem:[%s2440_s12 + $0xd8] sm:$0xff] (%p2136_p5) }
 0x152   : > { %1210 = vst [vmem:[%s2834_s13 + $0x140] sm:$0xff] (%p2136_p5), %v1209_v8 }
 0x153   : > { %1212 = vst [vmem:[%s2834_s13 + $0x148] sm:$0xff] (%p2136_p5), %v1211_v9 }
 0x154   : > { %1214 = vst [vmem:[%s2834_s13 + $0x150] sm:$0xff] (%p2136_p5), %v1213_v10 }
 0x155   : > { %v687_v12 = vpop.f32.mrf.mxu0  ;;  %v773_v13 = vpop.f32.mrf.mxu1  ;;  %1216 = vst [vmem:[%s2834_s13 + $0x158] sm:$0xff] (%p2136_p5), %v1215_v11 }
 0x156   : > { %721 = vst.msk [vmem:[%s2695_s15 + $0x38] sm:$0xff] %vm367_vm1, %v687_v12  ;;  %v1217_v12 = vld [vmem:[%s2440_s12 + $0xe0] sm:$0xff] (%p2136_p5) }
 0x157   : > { %1864 = vst.msk [vmem:[%s2695_s15 + $0xb8] sm:$0xff] %vm367_vm1, %v773_v13  ;;  %v860_v14 = vpop.f32.mrf.mxu2  ;;  %v947_v15 = vpop.f32.mrf.mxu3  ;;  %v1219_v13 = vld [vmem:[%s2440_s12 + $0xe8] sm:$0xff] (%p2136_p5) }
 0x158   : > { %1900 = vst.msk [vmem:[%s2695_s15 + $0x138] sm:$0xff] %vm367_vm1, %v860_v14  ;;  %v1221_v14 = vld [vmem:[%s2440_s12 + $0xf0] sm:$0xff] (%p2136_p5) }
 0x159   : > { %1936 = vst.msk [vmem:[%s2695_s15 + $0x1b8] sm:$0xff] %vm367_vm1, %v947_v15  ;;  %v1223_v15 = vld [vmem:[%s2440_s12 + $0xf8] sm:$0xff] (%p2136_p5) }
 0x15a   : > { %1218 = vst [vmem:[%s2834_s13 + $0x160] sm:$0xff] (%p2136_p5), %v1217_v12 }
 0x15b   : > { %1220 = vst [vmem:[%s2834_s13 + $0x168] sm:$0xff] (%p2136_p5), %v1219_v13 }
 0x15c   : > { %1222 = vst [vmem:[%s2834_s13 + $0x170] sm:$0xff] (%p2136_p5), %v1221_v14 }
 0x15d   : > { %v690_v16 = vpop.f32.mrf.mxu0  ;;  %v776_v17 = vpop.f32.mrf.mxu1  ;;  %1224 = vst [vmem:[%s2834_s13 + $0x178] sm:$0xff] (%p2136_p5), %v1223_v15 }
 0x15e   : > { %722 = vst.msk [vmem:[%s2695_s15 + $0x40] sm:$0xff] %vm367_vm1, %v690_v16  ;;  %v1225_v16 = vld [vmem:[%s2440_s12 + $0x100] sm:$0xff] (%p2136_p5) }
 0x15f   : > { %1865 = vst.msk [vmem:[%s2695_s15 + $0xc0] sm:$0xff] %vm367_vm1, %v776_v17  ;;  %v863_v18 = vpop.f32.mrf.mxu2  ;;  %v950_v19 = vpop.f32.mrf.mxu3  ;;  %v1227_v17 = vld [vmem:[%s2440_s12 + $0x108] sm:$0xff] (%p2136_p5) }
 0x160   : > { %1901 = vst.msk [vmem:[%s2695_s15 + $0x140] sm:$0xff] %vm367_vm1, %v863_v18  ;;  %v1229_v18 = vld [vmem:[%s2440_s12 + $0x110] sm:$0xff] (%p2136_p5) }
 0x161   : > { %1937 = vst.msk [vmem:[%s2695_s15 + $0x1c0] sm:$0xff] %vm367_vm1, %v950_v19  ;;  %v1231_v19 = vld [vmem:[%s2440_s12 + $0x118] sm:$0xff] (%p2136_p5) }
 0x162   : > { %1226 = vst [vmem:[%s2834_s13 + $0x200] sm:$0xff] (%p2136_p5), %v1225_v16 }
 0x163   : > { %1228 = vst [vmem:[%s2834_s13 + $0x208] sm:$0xff] (%p2136_p5), %v1227_v17 }
 0x164   : > { %1230 = vst [vmem:[%s2834_s13 + $0x210] sm:$0xff] (%p2136_p5), %v1229_v18 }
 0x165   : > { %v693_v20 = vpop.f32.mrf.mxu0  ;;  %v779_v21 = vpop.f32.mrf.mxu1  ;;  %1232 = vst [vmem:[%s2834_s13 + $0x218] sm:$0xff] (%p2136_p5), %v1231_v19 }
 0x166   : > { %723 = vst.msk [vmem:[%s2695_s15 + $0x48] sm:$0xff] %vm367_vm1, %v693_v20  ;;  %v1233_v20 = vld [vmem:[%s2440_s12 + $0x120] sm:$0xff] (%p2136_p5) }
 0x167   : > { %1866 = vst.msk [vmem:[%s2695_s15 + $0xc8] sm:$0xff] %vm367_vm1, %v779_v21  ;;  %v866_v22 = vpop.f32.mrf.mxu2  ;;  %v953_v23 = vpop.f32.mrf.mxu3  ;;  %v1235_v21 = vld [vmem:[%s2440_s12 + $0x128] sm:$0xff] (%p2136_p5) }
 0x168   : > { %1902 = vst.msk [vmem:[%s2695_s15 + $0x148] sm:$0xff] %vm367_vm1, %v866_v22  ;;  %v1237_v22 = vld [vmem:[%s2440_s12 + $0x130] sm:$0xff] (%p2136_p5) }
 0x169   : > { %1938 = vst.msk [vmem:[%s2695_s15 + $0x1c8] sm:$0xff] %vm367_vm1, %v953_v23  ;;  %v1239_v23 = vld [vmem:[%s2440_s12 + $0x138] sm:$0xff] (%p2136_p5) }
 0x16a   : > { %1234 = vst [vmem:[%s2834_s13 + $0x220] sm:$0xff] (%p2136_p5), %v1233_v20 }
 0x16b   : > { %1236 = vst [vmem:[%s2834_s13 + $0x228] sm:$0xff] (%p2136_p5), %v1235_v21 }
 0x16c   : > { %1238 = vst [vmem:[%s2834_s13 + $0x230] sm:$0xff] (%p2136_p5), %v1237_v22 }
 0x16d   : > { %v696_v24 = vpop.f32.mrf.mxu0  ;;  %v782_v25 = vpop.f32.mrf.mxu1  ;;  %1240 = vst [vmem:[%s2834_s13 + $0x238] sm:$0xff] (%p2136_p5), %v1239_v23 }
 0x16e   : > { %724 = vst.msk [vmem:[%s2695_s15 + $0x50] sm:$0xff] %vm367_vm1, %v696_v24  ;;  %v1241_v24 = vld [vmem:[%s2440_s12 + $0x140] sm:$0xff] (%p2136_p5) }
 0x16f   : > { %1867 = vst.msk [vmem:[%s2695_s15 + $0xd0] sm:$0xff] %vm367_vm1, %v782_v25  ;;  %v869_v26 = vpop.f32.mrf.mxu2  ;;  %v956_v27 = vpop.f32.mrf.mxu3  ;;  %v1243_v25 = vld [vmem:[%s2440_s12 + $0x148] sm:$0xff] (%p2136_p5) }
 0x170   : > { %1903 = vst.msk [vmem:[%s2695_s15 + $0x150] sm:$0xff] %vm367_vm1, %v869_v26  ;;  %v1245_v26 = vld [vmem:[%s2440_s12 + $0x150] sm:$0xff] (%p2136_p5) }
 0x171   : > { %1939 = vst.msk [vmem:[%s2695_s15 + $0x1d0] sm:$0xff] %vm367_vm1, %v956_v27  ;;  %v1247_v27 = vld [vmem:[%s2440_s12 + $0x158] sm:$0xff] (%p2136_p5) }
 0x172   : > { %1242 = vst [vmem:[%s2834_s13 + $0x240] sm:$0xff] (%p2136_p5), %v1241_v24 }
 0x173   : > { %1244 = vst [vmem:[%s2834_s13 + $0x248] sm:$0xff] (%p2136_p5), %v1243_v25 }
 0x174   : > { %1246 = vst [vmem:[%s2834_s13 + $0x250] sm:$0xff] (%p2136_p5), %v1245_v26 }
 0x175   : > { %v699_v28 = vpop.f32.mrf.mxu0  ;;  %v785_v29 = vpop.f32.mrf.mxu1  ;;  %1248 = vst [vmem:[%s2834_s13 + $0x258] sm:$0xff] (%p2136_p5), %v1247_v27 }
 0x176   : > { %725 = vst.msk [vmem:[%s2695_s15 + $0x58] sm:$0xff] %vm367_vm1, %v699_v28  ;;  %v1249_v28 = vld [vmem:[%s2440_s12 + $0x160] sm:$0xff] (%p2136_p5) }
 0x177   : > { %1868 = vst.msk [vmem:[%s2695_s15 + $0xd8] sm:$0xff] %vm367_vm1, %v785_v29  ;;  %v872_v30 = vpop.f32.mrf.mxu2  ;;  %v959_v31 = vpop.f32.mrf.mxu3  ;;  %v1251_v29 = vld [vmem:[%s2440_s12 + $0x168] sm:$0xff] (%p2136_p5) }
 0x178   : > { %1904 = vst.msk [vmem:[%s2695_s15 + $0x158] sm:$0xff] %vm367_vm1, %v872_v30  ;;  %v1253_v30 = vld [vmem:[%s2440_s12 + $0x170] sm:$0xff] (%p2136_p5) }
 0x179   : > { %1940 = vst.msk [vmem:[%s2695_s15 + $0x1d8] sm:$0xff] %vm367_vm1, %v959_v31  ;;  %v1255_v31 = vld [vmem:[%s2440_s12 + $0x178] sm:$0xff] (%p2136_p5) }
 0x17a   : > { %1250 = vst [vmem:[%s2834_s13 + $0x260] sm:$0xff] (%p2136_p5), %v1249_v28 }
 0x17b   : > { %1252 = vst [vmem:[%s2834_s13 + $0x268] sm:$0xff] (%p2136_p5), %v1251_v29 }
 0x17c   : > { %1254 = vst [vmem:[%s2834_s13 + $0x270] sm:$0xff] (%p2136_p5), %v1253_v30 }
 0x17d   : > { %v702_v32 = vpop.f32.mrf.mxu0  ;;  %v788_v33 = vpop.f32.mrf.mxu1  ;;  %1256 = vst [vmem:[%s2834_s13 + $0x278] sm:$0xff] (%p2136_p5), %v1255_v31 }
 0x17e   : > { %726 = vst.msk [vmem:[%s2695_s15 + $0x60] sm:$0xff] %vm367_vm1, %v702_v32  ;;  %v1257_v32 = vld [vmem:[%s2440_s12 + $0x180] sm:$0xff] (%p2136_p5) }
 0x17f   : > { %1869 = vst.msk [vmem:[%s2695_s15 + $0xe0] sm:$0xff] %vm367_vm1, %v788_v33  ;;  %v875_v34 = vpop.f32.mrf.mxu2  ;;  %v962_v35 = vpop.f32.mrf.mxu3  ;;  %v1259_v33 = vld [vmem:[%s2440_s12 + $0x188] sm:$0xff] (%p2136_p5) }
 0x180   : > { %1905 = vst.msk [vmem:[%s2695_s15 + $0x160] sm:$0xff] %vm367_vm1, %v875_v34  ;;  %v1261_v34 = vld [vmem:[%s2440_s12 + $0x190] sm:$0xff] (%p2136_p5) }
 0x181   : > { %1941 = vst.msk [vmem:[%s2695_s15 + $0x1e0] sm:$0xff] %vm367_vm1, %v962_v35  ;;  %v1263_v35 = vld [vmem:[%s2440_s12 + $0x198] sm:$0xff] (%p2136_p5) }
 0x182   : > { %1258 = vst [vmem:[%s2834_s13 + $0x300] sm:$0xff] (%p2136_p5), %v1257_v32 }
 0x183   : > { %1260 = vst [vmem:[%s2834_s13 + $0x308] sm:$0xff] (%p2136_p5), %v1259_v33 }
 0x184   : > { %1262 = vst [vmem:[%s2834_s13 + $0x310] sm:$0xff] (%p2136_p5), %v1261_v34 }
 0x185   : > { %v705_v36 = vpop.f32.mrf.mxu0  ;;  %v791_v37 = vpop.f32.mrf.mxu1  ;;  %1264 = vst [vmem:[%s2834_s13 + $0x318] sm:$0xff] (%p2136_p5), %v1263_v35 }
 0x186   : > { %727 = vst.msk [vmem:[%s2695_s15 + $0x68] sm:$0xff] %vm367_vm1, %v705_v36  ;;  %v1265_v36 = vld [vmem:[%s2440_s12 + $0x1a0] sm:$0xff] (%p2136_p5) }
 0x187   : > { %1870 = vst.msk [vmem:[%s2695_s15 + $0xe8] sm:$0xff] %vm367_vm1, %v791_v37  ;;  %v878_v38 = vpop.f32.mrf.mxu2  ;;  %v965_v39 = vpop.f32.mrf.mxu3  ;;  %v1267_v37 = vld [vmem:[%s2440_s12 + $0x1a8] sm:$0xff] (%p2136_p5) }
 0x188   : > { %1906 = vst.msk [vmem:[%s2695_s15 + $0x168] sm:$0xff] %vm367_vm1, %v878_v38  ;;  %v1269_v38 = vld [vmem:[%s2440_s12 + $0x1b0] sm:$0xff] (%p2136_p5) }
 0x189   : > { %1942 = vst.msk [vmem:[%s2695_s15 + $0x1e8] sm:$0xff] %vm367_vm1, %v965_v39  ;;  %v1271_v39 = vld [vmem:[%s2440_s12 + $0x1b8] sm:$0xff] (%p2136_p5) }
 0x18a   : > { %1266 = vst [vmem:[%s2834_s13 + $0x320] sm:$0xff] (%p2136_p5), %v1265_v36 }
 0x18b   : > { %1268 = vst [vmem:[%s2834_s13 + $0x328] sm:$0xff] (%p2136_p5), %v1267_v37 }
 0x18c   : > { %1270 = vst [vmem:[%s2834_s13 + $0x330] sm:$0xff] (%p2136_p5), %v1269_v38 }
 0x18d   : > { %v708_v40 = vpop.f32.mrf.mxu0  ;;  %v794_v41 = vpop.f32.mrf.mxu1  ;;  %1272 = vst [vmem:[%s2834_s13 + $0x338] sm:$0xff] (%p2136_p5), %v1271_v39 }
 0x18e   : > { %728 = vst.msk [vmem:[%s2695_s15 + $0x70] sm:$0xff] %vm367_vm1, %v708_v40  ;;  %v1273_v40 = vld [vmem:[%s2440_s12 + $0x1c0] sm:$0xff] (%p2136_p5) }
 0x18f   : > { %1871 = vst.msk [vmem:[%s2695_s15 + $0xf0] sm:$0xff] %vm367_vm1, %v794_v41  ;;  %v881_v42 = vpop.f32.mrf.mxu2  ;;  %v968_v43 = vpop.f32.mrf.mxu3  ;;  %v1275_v41 = vld [vmem:[%s2440_s12 + $0x1c8] sm:$0xff] (%p2136_p5) }
 0x190   : > { %1907 = vst.msk [vmem:[%s2695_s15 + $0x170] sm:$0xff] %vm367_vm1, %v881_v42  ;;  %v1277_v42 = vld [vmem:[%s2440_s12 + $0x1d0] sm:$0xff] (%p2136_p5) }
 0x191   : > { %1943 = vst.msk [vmem:[%s2695_s15 + $0x1f0] sm:$0xff] %vm367_vm1, %v968_v43  ;;  %v1279_v43 = vld [vmem:[%s2440_s12 + $0x1d8] sm:$0xff] (%p2136_p5) }
 0x192   : > { %1274 = vst [vmem:[%s2834_s13 + $0x340] sm:$0xff] (%p2136_p5), %v1273_v40 }
 0x193   : > { %1276 = vst [vmem:[%s2834_s13 + $0x348] sm:$0xff] (%p2136_p5), %v1275_v41 }
 0x194   : > { %1278 = vst [vmem:[%s2834_s13 + $0x350] sm:$0xff] (%p2136_p5), %v1277_v42 }
 0x195   : > { %v711_v44 = vpop.f32.mrf.mxu0  ;;  %v797_v45 = vpop.f32.mrf.mxu1  ;;  %1001 = sbr.rel (!%p2136_p5) target bundleno = 414 (0x19e), region = 36  ;;  %1280 = vst [vmem:[%s2834_s13 + $0x358] sm:$0xff] (%p2136_p5), %v1279_v43 }
 0x196   : > { %729 = vst.msk [vmem:[%s2695_s15 + $0x78] sm:$0xff] %vm367_vm1, %v711_v44  ;;  %v1281_v44 = vld [vmem:[%s2440_s12 + $0x1e0] sm:$0xff] (%p2136_p5) }
 0x197   : > { %1872 = vst.msk [vmem:[%s2695_s15 + $0xf8] sm:$0xff] %vm367_vm1, %v797_v45  ;;  %v884_v48 = vpop.f32.mrf.mxu2  ;;  %v971_v49 = vpop.f32.mrf.mxu3  ;;  %v1283_v45 = vld [vmem:[%s2440_s12 + $0x1e8] sm:$0xff] (%p2136_p5) }
 0x198   : > { %1908 = vst.msk [vmem:[%s2695_s15 + $0x178] sm:$0xff] %vm367_vm1, %v884_v48  ;;  %v1285_v48 = vld [vmem:[%s2440_s12 + $0x1f0] sm:$0xff] (%p2136_p5) }
 0x199   : > { %1944 = vst.msk [vmem:[%s2695_s15 + $0x1f8] sm:$0xff] %vm367_vm1, %v971_v49  ;;  %v1287_v49 = vld [vmem:[%s2440_s12 + $0x1f8] sm:$0xff] (%p2136_p5) }
 0x19a   : > { %1282 = vst [vmem:[%s2834_s13 + $0x360] sm:$0xff] %v1281_v44 }
 0x19b   : > { %1284 = vst [vmem:[%s2834_s13 + $0x368] sm:$0xff] %v1283_v45 }
 0x19c   : > { %1286 = vst [vmem:[%s2834_s13 + $0x370] sm:$0xff] %v1285_v48 }
 0x19d   : > { %1288 = vst [vmem:[%s2834_s13 + $0x378] sm:$0xff] %v1287_v49 }
 0x19e PF: > { %1294 = sbr.rel (!%p2136_p5) target bundleno = 482 (0x1e2), region = 74  ;;  %s1951_s14 = sshll.u32 (%p2136_p5), %s2053_s18, 7  ;;  %v1454_v46 = vld [vmem:[%s2695_s15] sm:$0xff] (%p2136_p5)  ;;  %v1456_v50 = vld [vmem:[%s2695_s15 + $0x8] sm:$0xff] (%p2136_p5)  ;;  %v1458_v47 = vld [vmem:[%s2695_s15 + $0x10] sm:$0xff] (%p2136_p5) }
 0x19f   : > { %s1297_s24 = sadd.s32 (%p2136_p5), %s1951_s14, %s2158_s11  ;;  %v1460_v51 = vld [vmem:[%s2695_s15 + $0x18] sm:$0xff] (%p2136_p5)  ;;  %v1462_v52 = vld [vmem:[%s2695_s15 + $0x20] sm:$0xff] (%p2136_p5)  ;;  %v1464_v53 = vld [vmem:[%s2695_s15 + $0x28] sm:$0xff] (%p2136_p5) }
 0x1a0   : > { %s1952_s25 = sshll.u32 (%p2136_p5), %s1297_s24, 3  ;;  %v1466_v54 = vld [vmem:[%s2695_s15 + $0x30] sm:$0xff] (%p2136_p5)  ;;  %v1468_v55 = vld [vmem:[%s2695_s15 + $0x38] sm:$0xff] (%p2136_p5)  ;;  %v1470_v56 = vld [vmem:[%s2695_s15 + $0x40] sm:$0xff] (%p2136_p5) }
 0x1a1   : > { %s2971_s26 = scalar_lea.vmem (%p2136_p5), %s3124_s4, %s1952_s25  ;;  %v1472_v57 = vld [vmem:[%s2695_s15 + $0x48] sm:$0xff] (%p2136_p5)  ;;  %v1474_v58 = vld [vmem:[%s2695_s15 + $0x50] sm:$0xff] (%p2136_p5)  ;;  %v1476_v59 = vld [vmem:[%s2695_s15 + $0x58] sm:$0xff] (%p2136_p5) }
 0x1a2   : > { %1455 = vst [vmem:[%s2971_s26] sm:$0xff] (%p2136_p5), %v1454_v46  ;;  %v1478_v60 = vld [vmem:[%s2695_s15 + $0x60] sm:$0xff] (%p2136_p5)  ;;  %v1480_v61 = vld [vmem:[%s2695_s15 + $0x68] sm:$0xff] (%p2136_p5)  ;;  %v1482_v62 = vld [vmem:[%s2695_s15 + $0x70] sm:$0xff] (%p2136_p5) }
 0x1a3   : > { %1457 = vst [vmem:[%s2971_s26 + $0x8] sm:$0xff] %v1456_v50  ;;  %v1484_v63 = vld [vmem:[%s2695_s15 + $0x78] sm:$0xff]  ;;  %v1486_v0 = vld [vmem:[%s2695_s15 + $0x80] sm:$0xff]  ;;  %v1488_v1 = vld [vmem:[%s2695_s15 + $0x88] sm:$0xff] }
 0x1a4   : > { %1459 = vst [vmem:[%s2971_s26 + $0x10] sm:$0xff] %v1458_v47  ;;  %v1490_v2 = vld [vmem:[%s2695_s15 + $0x90] sm:$0xff]  ;;  %v1492_v3 = vld [vmem:[%s2695_s15 + $0x98] sm:$0xff]  ;;  %v1494_v4 = vld [vmem:[%s2695_s15 + $0xa0] sm:$0xff] }
 0x1a5   : > { %1461 = vst [vmem:[%s2971_s26 + $0x18] sm:$0xff] %v1460_v51  ;;  %v1496_v5 = vld [vmem:[%s2695_s15 + $0xa8] sm:$0xff]  ;;  %v1498_v6 = vld [vmem:[%s2695_s15 + $0xb0] sm:$0xff]  ;;  %v1500_v7 = vld [vmem:[%s2695_s15 + $0xb8] sm:$0xff] }
 0x1a6   : > { %1463 = vst [vmem:[%s2971_s26 + $0x20] sm:$0xff] %v1462_v52  ;;  %v1502_v8 = vld [vmem:[%s2695_s15 + $0xc0] sm:$0xff]  ;;  %v1504_v9 = vld [vmem:[%s2695_s15 + $0xc8] sm:$0xff]  ;;  %v1506_v10 = vld [vmem:[%s2695_s15 + $0xd0] sm:$0xff] }
 0x1a7   : > { %1465 = vst [vmem:[%s2971_s26 + $0x28] sm:$0xff] %v1464_v53  ;;  %v1508_v11 = vld [vmem:[%s2695_s15 + $0xd8] sm:$0xff]  ;;  %v1510_v12 = vld [vmem:[%s2695_s15 + $0xe0] sm:$0xff]  ;;  %v1512_v13 = vld [vmem:[%s2695_s15 + $0xe8] sm:$0xff] }
 0x1a8   : > { %1467 = vst [vmem:[%s2971_s26 + $0x30] sm:$0xff] %v1466_v54  ;;  %v1514_v14 = vld [vmem:[%s2695_s15 + $0xf0] sm:$0xff]  ;;  %v1516_v15 = vld [vmem:[%s2695_s15 + $0xf8] sm:$0xff]  ;;  %v1518_v16 = vld [vmem:[%s2695_s15 + $0x100] sm:$0xff] }
 0x1a9   : > { %1469 = vst [vmem:[%s2971_s26 + $0x38] sm:$0xff] %v1468_v55  ;;  %v1520_v17 = vld [vmem:[%s2695_s15 + $0x108] sm:$0xff]  ;;  %v1522_v18 = vld [vmem:[%s2695_s15 + $0x110] sm:$0xff]  ;;  %v1524_v19 = vld [vmem:[%s2695_s15 + $0x118] sm:$0xff] }
 0x1aa   : > { %1471 = vst [vmem:[%s2971_s26 + $0x40] sm:$0xff] %v1470_v56  ;;  %v1526_v20 = vld [vmem:[%s2695_s15 + $0x120] sm:$0xff]  ;;  %v1528_v21 = vld [vmem:[%s2695_s15 + $0x128] sm:$0xff]  ;;  %v1530_v22 = vld [vmem:[%s2695_s15 + $0x130] sm:$0xff] }
 0x1ab   : > { %1473 = vst [vmem:[%s2971_s26 + $0x48] sm:$0xff] %v1472_v57  ;;  %v1532_v23 = vld [vmem:[%s2695_s15 + $0x138] sm:$0xff]  ;;  %v1534_v24 = vld [vmem:[%s2695_s15 + $0x140] sm:$0xff]  ;;  %v1536_v25 = vld [vmem:[%s2695_s15 + $0x148] sm:$0xff] }
 0x1ac   : > { %1475 = vst [vmem:[%s2971_s26 + $0x50] sm:$0xff] %v1474_v58  ;;  %v1538_v26 = vld [vmem:[%s2695_s15 + $0x150] sm:$0xff]  ;;  %v1540_v27 = vld [vmem:[%s2695_s15 + $0x158] sm:$0xff]  ;;  %v1542_v28 = vld [vmem:[%s2695_s15 + $0x160] sm:$0xff] }
 0x1ad   : > { %1477 = vst [vmem:[%s2971_s26 + $0x58] sm:$0xff] %v1476_v59  ;;  %v1544_v29 = vld [vmem:[%s2695_s15 + $0x168] sm:$0xff]  ;;  %v1546_v30 = vld [vmem:[%s2695_s15 + $0x170] sm:$0xff]  ;;  %v1548_v31 = vld [vmem:[%s2695_s15 + $0x178] sm:$0xff] }
 0x1ae   : > { %1479 = vst [vmem:[%s2971_s26 + $0x60] sm:$0xff] %v1478_v60  ;;  %v1550_v32 = vld [vmem:[%s2695_s15 + $0x180] sm:$0xff]  ;;  %v1552_v33 = vld [vmem:[%s2695_s15 + $0x188] sm:$0xff]  ;;  %v1554_v34 = vld [vmem:[%s2695_s15 + $0x190] sm:$0xff] }
 0x1af   : > { %1481 = vst [vmem:[%s2971_s26 + $0x68] sm:$0xff] %v1480_v61  ;;  %v1556_v35 = vld [vmem:[%s2695_s15 + $0x198] sm:$0xff]  ;;  %v1558_v36 = vld [vmem:[%s2695_s15 + $0x1a0] sm:$0xff]  ;;  %v1560_v37 = vld [vmem:[%s2695_s15 + $0x1a8] sm:$0xff] }
 0x1b0   : > { %1483 = vst [vmem:[%s2971_s26 + $0x70] sm:$0xff] %v1482_v62  ;;  %v1562_v38 = vld [vmem:[%s2695_s15 + $0x1b0] sm:$0xff]  ;;  %v1564_v39 = vld [vmem:[%s2695_s15 + $0x1b8] sm:$0xff]  ;;  %v1566_v40 = vld [vmem:[%s2695_s15 + $0x1c0] sm:$0xff] }
 0x1b1   : > { %1485 = vst [vmem:[%s2971_s26 + $0x78] sm:$0xff] %v1484_v63  ;;  %v1568_v41 = vld [vmem:[%s2695_s15 + $0x1c8] sm:$0xff]  ;;  %v1570_v42 = vld [vmem:[%s2695_s15 + $0x1d0] sm:$0xff]  ;;  %v1572_v43 = vld [vmem:[%s2695_s15 + $0x1d8] sm:$0xff] }
 0x1b2   : > { %1487 = vst [vmem:[%s2971_s26 + $0x100] sm:$0xff] %v1486_v0  ;;  %v1574_v44 = vld [vmem:[%s2695_s15 + $0x1e0] sm:$0xff]  ;;  %v1576_v45 = vld [vmem:[%s2695_s15 + $0x1e8] sm:$0xff]  ;;  %v1578_v48 = vld [vmem:[%s2695_s15 + $0x1f0] sm:$0xff] }
 0x1b3   : > { %1489 = vst [vmem:[%s2971_s26 + $0x108] sm:$0xff] %v1488_v1  ;;  %v1580_v49 = vld [vmem:[%s2695_s15 + $0x1f8] sm:$0xff] }
 0x1b4   : > { %1491 = vst [vmem:[%s2971_s26 + $0x110] sm:$0xff] %v1490_v2 }
 0x1b5   : > { %1493 = vst [vmem:[%s2971_s26 + $0x118] sm:$0xff] %v1492_v3 }
 0x1b6   : > { %1495 = vst [vmem:[%s2971_s26 + $0x120] sm:$0xff] %v1494_v4 }
 0x1b7   : > { %1497 = vst [vmem:[%s2971_s26 + $0x128] sm:$0xff] %v1496_v5 }
 0x1b8   : > { %1499 = vst [vmem:[%s2971_s26 + $0x130] sm:$0xff] %v1498_v6 }
 0x1b9   : > { %1501 = vst [vmem:[%s2971_s26 + $0x138] sm:$0xff] %v1500_v7 }
 0x1ba   : > { %1503 = vst [vmem:[%s2971_s26 + $0x140] sm:$0xff] %v1502_v8 }
 0x1bb   : > { %1505 = vst [vmem:[%s2971_s26 + $0x148] sm:$0xff] %v1504_v9 }
 0x1bc   : > { %1507 = vst [vmem:[%s2971_s26 + $0x150] sm:$0xff] %v1506_v10 }
 0x1bd   : > { %1509 = vst [vmem:[%s2971_s26 + $0x158] sm:$0xff] %v1508_v11 }
 0x1be   : > { %1511 = vst [vmem:[%s2971_s26 + $0x160] sm:$0xff] %v1510_v12 }
 0x1bf   : > { %1513 = vst [vmem:[%s2971_s26 + $0x168] sm:$0xff] %v1512_v13 }
 0x1c0   : > { %1515 = vst [vmem:[%s2971_s26 + $0x170] sm:$0xff] %v1514_v14 }
 0x1c1   : > { %1517 = vst [vmem:[%s2971_s26 + $0x178] sm:$0xff] %v1516_v15 }
 0x1c2   : > { %1519 = vst [vmem:[%s2971_s26 + $0x200] sm:$0xff] %v1518_v16 }
 0x1c3   : > { %1521 = vst [vmem:[%s2971_s26 + $0x208] sm:$0xff] %v1520_v17 }
 0x1c4   : > { %1523 = vst [vmem:[%s2971_s26 + $0x210] sm:$0xff] %v1522_v18 }
 0x1c5   : > { %1525 = vst [vmem:[%s2971_s26 + $0x218] sm:$0xff] %v1524_v19 }
 0x1c6   : > { %1527 = vst [vmem:[%s2971_s26 + $0x220] sm:$0xff] %v1526_v20 }
 0x1c7   : > { %1529 = vst [vmem:[%s2971_s26 + $0x228] sm:$0xff] %v1528_v21 }
 0x1c8   : > { %1531 = vst [vmem:[%s2971_s26 + $0x230] sm:$0xff] %v1530_v22 }
 0x1c9   : > { %1533 = vst [vmem:[%s2971_s26 + $0x238] sm:$0xff] %v1532_v23 }
 0x1ca   : > { %1535 = vst [vmem:[%s2971_s26 + $0x240] sm:$0xff] %v1534_v24 }
 0x1cb   : > { %1537 = vst [vmem:[%s2971_s26 + $0x248] sm:$0xff] %v1536_v25 }
 0x1cc   : > { %1539 = vst [vmem:[%s2971_s26 + $0x250] sm:$0xff] %v1538_v26 }
 0x1cd   : > { %1541 = vst [vmem:[%s2971_s26 + $0x258] sm:$0xff] %v1540_v27 }
 0x1ce   : > { %1543 = vst [vmem:[%s2971_s26 + $0x260] sm:$0xff] %v1542_v28 }
 0x1cf   : > { %1545 = vst [vmem:[%s2971_s26 + $0x268] sm:$0xff] %v1544_v29 }
 0x1d0   : > { %1547 = vst [vmem:[%s2971_s26 + $0x270] sm:$0xff] %v1546_v30 }
 0x1d1   : > { %1549 = vst [vmem:[%s2971_s26 + $0x278] sm:$0xff] %v1548_v31 }
 0x1d2   : > { %1551 = vst [vmem:[%s2971_s26 + $0x300] sm:$0xff] %v1550_v32 }
 0x1d3   : > { %1553 = vst [vmem:[%s2971_s26 + $0x308] sm:$0xff] %v1552_v33 }
 0x1d4   : > { %1555 = vst [vmem:[%s2971_s26 + $0x310] sm:$0xff] %v1554_v34 }
 0x1d5   : > { %1557 = vst [vmem:[%s2971_s26 + $0x318] sm:$0xff] %v1556_v35 }
 0x1d6   : > { %1559 = vst [vmem:[%s2971_s26 + $0x320] sm:$0xff] %v1558_v36 }
 0x1d7   : > { %1561 = vst [vmem:[%s2971_s26 + $0x328] sm:$0xff] %v1560_v37 }
 0x1d8   : > { %1563 = vst [vmem:[%s2971_s26 + $0x330] sm:$0xff] %v1562_v38 }
 0x1d9   : > { %1565 = vst [vmem:[%s2971_s26 + $0x338] sm:$0xff] %v1564_v39 }
 0x1da   : > { %1567 = vst [vmem:[%s2971_s26 + $0x340] sm:$0xff] %v1566_v40 }
 0x1db   : > { %1569 = vst [vmem:[%s2971_s26 + $0x348] sm:$0xff] %v1568_v41 }
 0x1dc   : > { %1571 = vst [vmem:[%s2971_s26 + $0x350] sm:$0xff] %v1570_v42 }
 0x1dd   : > { %1573 = vst [vmem:[%s2971_s26 + $0x358] sm:$0xff] %v1572_v43 }
 0x1de   : > { %1575 = vst [vmem:[%s2971_s26 + $0x360] sm:$0xff] %v1574_v44 }
 0x1df   : > { %1577 = vst [vmem:[%s2971_s26 + $0x368] sm:$0xff] %v1576_v45 }
 0x1e0   : > { %1579 = vst [vmem:[%s2971_s26 + $0x370] sm:$0xff] %v1578_v48 }
 0x1e1   : > { %1581 = vst [vmem:[%s2971_s26 + $0x378] sm:$0xff] %v1580_v49 }
 0x1e2 PF: > { %s15_s21 = sadd.s32 1, %s2065_s21   ;;  %s3126_s15 = smov %s2045_s16 }
 0x1e3   : > { %p12_p11 = scmp.ge.s32.totalorder %s15_s21, 6   ;;  %s3127_s16 = smov %s2147_s30 }
 0x1e4   : > { %s3128_s17 = smov %s2057_s19  ;;  %s3129_s18 = smov %s2061_s20 }
 0x1e5   : > { %s3130_s19 = smov %s3133_s22  ;;  %s3131_s20 = smov %s3137_s23 }
 0x1e6   :  { %14 = sbr.rel (!%p12_p11) target bundleno = 4 (0x4), region = 162 }

// kernel: tpu_custom_call.1
= control target key start
LH: loop header
LB: loop body
LE: loop exit
PB: predicated region body
PF: predicated region fallthrough
CT: control target
= control target key end

     0   :  { %s2092_s15 = smov 0   ;;  %s2094_s16 = smov 0   ;;  %s3120_s0 = inlined_call_operand.vmem [shape: f32[2,256,32], index: 0, kind: input, shape index: {}]   ;;  %s3121_s1 = inlined_call_operand.vmem [shape: f32[4,32,16], index: 1, kind: input, shape index: {}]   ;;  %s3122_s2 = inlined_call_operand.vmem [shape: f32[4,32,16], index: 2, kind: input, shape index: {}]   ;;  %s3123_s3 = inlined_call_operand.vmem [shape: f32[2,4,256,16], index: 3, kind: output, shape index: {0}]   ;;  %s3124_s4 = inlined_call_operand.vmem [shape: f32[2,4,256,16], index: 4, kind: output, shape index: {1}]  }
   0x1   :  { %s2096_s17 = smov 0   ;;  %s2098_s18 = smov 0  }
   0x2   :  { %s2100_s19 = smov 0   ;;  %s2102_s20 = smov 0  }
   0x3   :  { %s2104_s21 = smov 0  }
   0x4 LB: > { %s24_s22 = sadd.s32 1, %s2057_s19  ;;  %s27_s23 = sadd.s32 1, %s2061_s20  ;;  %s2065_s21 = sphi %s2104_s21, %s15_s21   ;;  %s2061_s20 = sphi %s2102_s20, %s3131_s20   ;;  %s2057_s19 = sphi %s2100_s19, %s3130_s19   ;;  %s2053_s18 = sphi %s2098_s18, %s3129_s18   ;;  %s2049_s17 = sphi %s2096_s17, %s3128_s17   ;;  %s2045_s16 = sphi %s2094_s16, %s3127_s16   ;;  %s2041_s15 = sphi %s2092_s15, %s3126_s15  }
   0x5   : > { %p25_p0 = scmp.ge.s32.totalorder %s24_s22, 2  ;;  %s1687_s24 = sadd.s32 4294967295, %s2065_s21  }
   0x6   : > { %p116_p1 = scmp.ne.s32.totalorder %s2045_s16, %s2041_s15  ;;  %p117_p2 = scmp.eq.s32.totalorder %s1687_s24, 3 }
   0x7   : > { %s3133_s22 = smov (%p25_p0, %s24_s22), 0  ;;  %s3135_s23 = smov (!%p25_p0, %s27_s23), %s2061_s20 }
   0x8   : > { %s102_s25 = ssub.s32 %s2057_s19, %s3133_s22  ;;  %p29_p3 = scmp.ge.s32.totalorder %s3135_s23, 2 }
   0x9   : > { %p1691_p4 = scmp.ge.s32.totalorder %s2065_s21, 1  ;;  %p2136_p5 = por %p117_p2, %p116_p1 }
   0xa   : > { %p188_p6 = scmp.lt.s32.totalorder %s2065_s21, 5  ;;  %s3137_s23 = smov (%p29_p3, %s3135_s23), 0 }
   0xb   : > { %s101_s27 = ssub.s32 %s2061_s20, %s3137_s23  ;;  %s106_s29 = sadd.s32 1, %s2045_s16 }
   0xc   : > { %p189_p7 = pnand %p1691_p4, %p188_p6  ;;  %s103_s28 = sor.u32 %s102_s25, %s101_s27 }
   0xd   : > { %p104_p8 = scmp.eq.s32.totalorder %s103_s28, 0  ;;  %s2158_s11 = sshll.u32 (!%p189_p7), %s2049_s17, 4 }
   0xe   : > { %192 = sbr.rel (%p189_p7) target bundleno = 482 (0x1e2), region = 32  ;;  %p222_p9 = scmp.lt.s32.totalorder (!%p189_p7), %s2053_s18, 1 }
   0xf   : > { %s2147_s30 = scalar_select %p104_p8, %s2045_s16, %s106_s29  }
  0x10   : > { %p224_p10 = scmp.lt.s32.totalorder (!%p189_p7), %s2158_s11, 31  ;;  %s212_s29 = sand.u32 (!%p189_p7), 1, %s2041_s15  }
  0x11   : > { %s2433_s5 = sshll.u32 (!%p189_p7), %s212_s29, 9 }
  0x12   : > { %s2695_s15 = scalar_lea.vmem (!%p189_p7), [#allocation3], %s2433_s5 }
  0x13   : > { %v1752_v0 = vld [vmem:[%s3121_s1 + $0x58] sm:$0xff]  ;;  %v1751_v2 = vld [vmem:[%s3121_s1 + $0x50] sm:$0xff]  ;;  %v1750_v4 = vld [vmem:[%s3121_s1 + $0x48] sm:$0xff]  ;;  %s223_s6 = scalar_select %p222_p9, %s2053_s18, 1  ;;  %vm253_vm0 = vcmask 261120   ;;  %vm367_vm1 = vcmask 130048  }
  0x14   : > { %v1788_v1 = vld [vmem:[%s3121_s1 + $0x78] sm:$0xff]  ;;  %488 = vmatpush.msra.mxu2 %v1752_v0  ;;  %v1787_v3 = vld [vmem:[%s3121_s1 + $0x70] sm:$0xff]  ;;  %v1786_v5 = vld [vmem:[%s3121_s1 + $0x68] sm:$0xff]  ;;  %s225_s9 = scalar_select %p224_p10, %s2158_s11, 31 }
  0x15   : > { %575 = vmatpush.msra.mxu3 %v1788_v1  ;;  %v252_v6 = vld [vmem:[%s3121_s1 + $0x18] sm:$0xff]  ;;  %v1749_v8 = vld [vmem:[%s3121_s1 + $0x40] sm:$0xff]  ;;  %s1695_s13 = sshll.u32 %s223_s6, 5  ;;  %v251_v10 = vld [vmem:[%s3121_s1 + $0x10] sm:$0xff]  ;;  %s1948_s7 = sshll.u32 (%p2136_p5), %s2053_s18, 7 }
  0x16   : > { %v1716_v7 = vld [vmem:[%s3121_s1 + $0x38] sm:$0xff]  ;;  %489 = vmatpush.msra.mxu2 %v1751_v2  ;;  %314 = vmatpush.msra.mxu0 %v252_v6  ;;  %v1785_v9 = vld [vmem:[%s3121_s1 + $0x60] sm:$0xff]  ;;  %v1715_v11 = vld [vmem:[%s3121_s1 + $0x30] sm:$0xff]  ;;  %s227_s17 = sadd.s32 %s1695_s13, %s225_s9 }
  0x17   : > { %576 = vmatpush.msra.mxu3 %v1787_v3  ;;  %401 = vmatpush.msra.mxu1 %v1716_v7  ;;  %v1876_v12 = vld [vmem:[%s3122_s2 + $0x58] sm:$0xff]  ;;  %s1696_s6 = sshll.u32 %s227_s17, 3  ;;  %v250_v14 = vld [vmem:[%s3121_s1 + $0x8] sm:$0xff]  ;;  %v249_v17 = vld [vmem:[%s3121_s1] sm:$0xff] }
  0x18   : > { %490 = vmatpush.msra.mxu2 %v1750_v4  ;;  %v1912_v13 = vld [vmem:[%s3122_s2 + $0x78] sm:$0xff]  ;;  %315 = vmatpush.msra.mxu0 %v251_v10  ;;  %s2200_s12 = scalar_lea.vmem %s3120_s0, %s1696_s6  ;;  %v1714_v15 = vld [vmem:[%s3121_s1 + $0x28] sm:$0xff]  ;;  %v1713_v18 = vld [vmem:[%s3121_s1 + $0x20] sm:$0xff]  ;;  %s1004_s6 = sadd.s32 (%p2136_p5), %s1948_s7, %s2158_s11 }
  0x19   : > { %577 = vmatpush.msra.mxu3 %v1786_v5  ;;  %402 = vmatpush.msra.mxu1 %v1715_v11  ;;  %v2209_v16 = vld [vmem:[%s2200_s12] sm:$0xff]  ;;  %v1875_v19 = vld [vmem:[%s3122_s2 + $0x50] sm:$0xff]  ;;  %v648_v21 = vld [vmem:[%s3122_s2 + $0x18] sm:$0xff]  ;;  %s1949_s8 = sshll.u32 (%p2136_p5), %s1004_s6, 3 }
  0x1a   : > { %491 = vmatpush.msra.mxu2 %v1749_v8  ;;  %316 = vmatpush.msra.mxu0 %v250_v14  ;;  %v1911_v20 = vld [vmem:[%s3122_s2 + $0x70] sm:$0xff]  ;;  %v1840_v22 = vld [vmem:[%s3122_s2 + $0x38] sm:$0xff]  ;;  %v2244_v25 = vld [vmem:[%s2200_s12 + $0x8] sm:$0xff]  ;;  %s2834_s13 = scalar_lea.vmem (%p2136_p5), %s3123_s3, %s1949_s8 }
  0x1b   : > { %578 = vmatpush.msra.mxu3 %v1785_v9  ;;  %1753 = vmatmul.msk.f32.vlgmr.msra.gmra.mxu2 %vm253_vm0, %v2209_v16  ;;  %v647_v23 = vld [vmem:[%s3122_s2 + $0x10] sm:$0xff]  ;;  %v2266_v27 = vld [vmem:[%s2200_s12 + $0x18] sm:$0xff]  ;;  %v2277_v28 = vld [vmem:[%s2200_s12 + $0x20] sm:$0xff] }
  0x1c   : > { %834 = vmatpush.msrb.mxu2 %v1876_v12  ;;  %1789 = vmatmul.msk.f32.vlgmr.msra.gmra.mxu3 %vm253_vm0, %v2209_v16  ;;  %v1839_v24 = vld [vmem:[%s3122_s2 + $0x30] sm:$0xff]  ;;  %v1874_v29 = vld [vmem:[%s3122_s2 + $0x48] sm:$0xff]  ;;  %v2322_v35 = vld [vmem:[%s2200_s12 + $0x38] sm:$0xff] }
  0x1d   : > { %921 = vmatpush.msrb.mxu3 %v1912_v13  ;;  %403 = vmatpush.msra.mxu1 %v1714_v15  ;;  %v2255_v26 = vld [vmem:[%s2200_s12 + $0x10] sm:$0xff]  ;;  %v1910_v30 = vld [vmem:[%s3122_s2 + $0x68] sm:$0xff]  ;;  %v2333_v36 = vld [vmem:[%s2200_s12 + $0x40] sm:$0xff] }
  0x1e   : > { %835 = vmatpush.msrb.mxu2 %v1875_v19  ;;  %317 = vmatpush.msra.mxu0 %v249_v17  ;;  %v646_v31 = vld [vmem:[%s3122_s2 + $0x8] sm:$0xff]  ;;  %v2311_v34 = vld [vmem:[%s2200_s12 + $0x30] sm:$0xff]  ;;  %v1873_v37 = vld [vmem:[%s3122_s2 + $0x40] sm:$0xff] }
  0x1f   : > { %922 = vmatpush.msrb.mxu3 %v1911_v20  ;;  %404 = vmatpush.msra.mxu1 %v1713_v18  ;;  %v1838_v32 = vld [vmem:[%s3122_s2 + $0x28] sm:$0xff]  ;;  %v1909_v38 = vld [vmem:[%s3122_s2 + $0x60] sm:$0xff]  ;;  %v2367_v42 = vld [vmem:[%s2200_s12 + $0x50] sm:$0xff] }
  0x20   : > { %1697 = vmatmul.msk.f32.vlgmr.msra.gmra.mxu0 %vm253_vm0, %v2209_v16  ;;  %1717 = vmatmul.msk.f32.vlgmr.msra.gmra.mxu1 %vm253_vm0, %v2209_v16  ;;  %v2300_v33 = vld [vmem:[%s2200_s12 + $0x28] sm:$0xff]  ;;  %v645_v39 = vld [vmem:[%s3122_s2] sm:$0xff]  ;;  %v2378_v43 = vld [vmem:[%s2200_s12 + $0x58] sm:$0xff] }
  0x21   : > { %661 = vmatpush.msrb.mxu0 %v648_v21  ;;  %747 = vmatpush.msrb.mxu1 %v1840_v22  ;;  %v1837_v40 = vld [vmem:[%s3122_s2 + $0x20] sm:$0xff]  ;;  %v2356_v41 = vld [vmem:[%s2200_s12 + $0x48] sm:$0xff]  ;;  %v2411_v46 = vld [vmem:[%s2200_s12 + $0x70] sm:$0xff] }
  0x22   : > { %836 = vmatpush.msrb.mxu2 %v1874_v29  ;;  %923 = vmatpush.msrb.mxu3 %v1910_v30  ;;  %v2389_v44 = vld [vmem:[%s2200_s12 + $0x60] sm:$0xff]  ;;  %v2400_v45 = vld [vmem:[%s2200_s12 + $0x68] sm:$0xff]  ;;  %v2422_v47 = vld [vmem:[%s2200_s12 + $0x78] sm:$0xff]  ;;  %s2440_s12 = scalar_lea.vmem [#allocation2], %s2433_s5 }
  0x23   : > { %662 = vmatpush.msrb.mxu0 %v647_v23  ;;  %748 = vmatpush.msrb.mxu1 %v1839_v24 }
  0x24   : > { %1754 = vmatmul.msk.f32.gmra.mxu2 %vm253_vm0, %v2244_v25  ;;  %1790 = vmatmul.msk.f32.gmra.mxu3 %vm253_vm0, %v2244_v25 }
  0x25   : > { %663 = vmatpush.msrb.mxu0 %v646_v31  ;;  %749 = vmatpush.msrb.mxu1 %v1838_v32 }
  0x26   : > { %837 = vmatpush.msrb.mxu2 %v1873_v37  ;;  %924 = vmatpush.msrb.mxu3 %v1909_v38 }
  0x27   : > { %664 = vmatpush.msrb.mxu0 %v645_v39  ;;  %750 = vmatpush.msrb.mxu1 %v1837_v40 }
  0x28   : > { %1698 = vmatmul.msk.f32.gmra.mxu0 %vm253_vm0, %v2244_v25  ;;  %1718 = vmatmul.msk.f32.gmra.mxu1 %vm253_vm0, %v2244_v25 }
  0x2c   : > { %1755 = vmatmul.msk.f32.gmra.mxu2 %vm253_vm0, %v2255_v26  ;;  %1791 = vmatmul.msk.f32.gmra.mxu3 %vm253_vm0, %v2255_v26 }
  0x30   : > { %1699 = vmatmul.msk.f32.gmra.mxu0 %vm253_vm0, %v2255_v26  ;;  %1719 = vmatmul.msk.f32.gmra.mxu1 %vm253_vm0, %v2255_v26 }
  0x34   : > { %1756 = vmatmul.msk.f32.gmra.mxu2 %vm253_vm0, %v2266_v27  ;;  %1792 = vmatmul.msk.f32.gmra.mxu3 %vm253_vm0, %v2266_v27 }
  0x38   : > { %1700 = vmatmul.msk.f32.gmra.mxu0 %vm253_vm0, %v2266_v27  ;;  %1720 = vmatmul.msk.f32.gmra.mxu1 %vm253_vm0, %v2266_v27 }
  0x3c   : > { %1757 = vmatmul.msk.f32.gmra.mxu2 %vm253_vm0, %v2277_v28  ;;  %1793 = vmatmul.msk.f32.gmra.mxu3 %vm253_vm0, %v2277_v28 }
  0x40   : > { %1701 = vmatmul.msk.f32.gmra.mxu0 %vm253_vm0, %v2277_v28  ;;  %1721 = vmatmul.msk.f32.gmra.mxu1 %vm253_vm0, %v2277_v28 }
  0x44   : > { %1758 = vmatmul.msk.f32.gmra.mxu2 %vm253_vm0, %v2300_v33  ;;  %1794 = vmatmul.msk.f32.gmra.mxu3 %vm253_vm0, %v2300_v33 }
  0x48   : > { %1702 = vmatmul.msk.f32.gmra.mxu0 %vm253_vm0, %v2300_v33  ;;  %1722 = vmatmul.msk.f32.gmra.mxu1 %vm253_vm0, %v2300_v33 }
  0x4c   : > { %1759 = vmatmul.msk.f32.gmra.mxu2 %vm253_vm0, %v2311_v34  ;;  %1795 = vmatmul.msk.f32.gmra.mxu3 %vm253_vm0, %v2311_v34 }
  0x50   : > { %1703 = vmatmul.msk.f32.gmra.mxu0 %vm253_vm0, %v2311_v34  ;;  %1723 = vmatmul.msk.f32.gmra.mxu1 %vm253_vm0, %v2311_v34 }
  0x54   : > { %1760 = vmatmul.msk.f32.gmra.mxu2 %vm253_vm0, %v2322_v35  ;;  %1796 = vmatmul.msk.f32.gmra.mxu3 %vm253_vm0, %v2322_v35 }
  0x58   : > { %1704 = vmatmul.msk.f32.gmra.mxu0 %vm253_vm0, %v2322_v35  ;;  %1724 = vmatmul.msk.f32.gmra.mxu1 %vm253_vm0, %v2322_v35 }
  0x5c   : > { %1761 = vmatmul.msk.f32.gmra.mxu2 %vm253_vm0, %v2333_v36  ;;  %1797 = vmatmul.msk.f32.gmra.mxu3 %vm253_vm0, %v2333_v36 }
  0x60   : > { %1705 = vmatmul.msk.f32.gmra.mxu0 %vm253_vm0, %v2333_v36  ;;  %1725 = vmatmul.msk.f32.gmra.mxu1 %vm253_vm0, %v2333_v36 }
  0x64   : > { %1762 = vmatmul.msk.f32.gmra.mxu2 %vm253_vm0, %v2356_v41  ;;  %1798 = vmatmul.msk.f32.gmra.mxu3 %vm253_vm0, %v2356_v41 }
  0x68   : > { %1706 = vmatmul.msk.f32.gmra.mxu0 %vm253_vm0, %v2356_v41  ;;  %1726 = vmatmul.msk.f32.gmra.mxu1 %vm253_vm0, %v2356_v41 }
  0x6c   : > { %1763 = vmatmul.msk.f32.gmra.mxu2 %vm253_vm0, %v2367_v42  ;;  %1799 = vmatmul.msk.f32.gmra.mxu3 %vm253_vm0, %v2367_v42 }
  0x70   : > { %1707 = vmatmul.msk.f32.gmra.mxu0 %vm253_vm0, %v2367_v42  ;;  %1727 = vmatmul.msk.f32.gmra.mxu1 %vm253_vm0, %v2367_v42 }
  0x74   : > { %1764 = vmatmul.msk.f32.gmra.mxu2 %vm253_vm0, %v2378_v43  ;;  %1800 = vmatmul.msk.f32.gmra.mxu3 %vm253_vm0, %v2378_v43 }
  0x78   : > { %1708 = vmatmul.msk.f32.gmra.mxu0 %vm253_vm0, %v2378_v43  ;;  %1728 = vmatmul.msk.f32.gmra.mxu1 %vm253_vm0, %v2378_v43 }
  0x7c   : > { %1765 = vmatmul.msk.f32.gmra.mxu2 %vm253_vm0, %v2389_v44  ;;  %1801 = vmatmul.msk.f32.gmra.mxu3 %vm253_vm0, %v2389_v44 }
  0x80   : > { %1709 = vmatmul.msk.f32.gmra.mxu0 %vm253_vm0, %v2389_v44  ;;  %1729 = vmatmul.msk.f32.gmra.mxu1 %vm253_vm0, %v2389_v44 }
  0x84   : > { %1766 = vmatmul.msk.f32.gmra.mxu2 %vm253_vm0, %v2400_v45  ;;  %1802 = vmatmul.msk.f32.gmra.mxu3 %vm253_vm0, %v2400_v45 }
  0x88   : > { %1710 = vmatmul.msk.f32.gmra.mxu0 %vm253_vm0, %v2400_v45  ;;  %1730 = vmatmul.msk.f32.gmra.mxu1 %vm253_vm0, %v2400_v45 }
  0x8c   : > { %1767 = vmatmul.msk.f32.gmra.mxu2 %vm253_vm0, %v2411_v46  ;;  %1803 = vmatmul.msk.f32.gmra.mxu3 %vm253_vm0, %v2411_v46 }
  0x90   : > { %1711 = vmatmul.msk.f32.gmra.mxu0 %vm253_vm0, %v2411_v46  ;;  %1731 = vmatmul.msk.f32.gmra.mxu1 %vm253_vm0, %v2411_v46 }
  0x94   : > { %1768 = vmatmul.msk.f32.gmra.mxu2 %vm253_vm0, %v2422_v47  ;;  %1804 = vmatmul.msk.f32.gmra.mxu3 %vm253_vm0, %v2422_v47 }
  0x98   : > { %1712 = vmatmul.msk.f32.gmra.mxu0 %vm253_vm0, %v2422_v47  ;;  %1732 = vmatmul.msk.f32.gmra.mxu1 %vm253_vm0, %v2422_v47 }
  0x9c   : > { %1877 = vmatmul.msk.f32.vlgmr.msrb.gmra.mxu2 %vm253_vm0, %v2209_v16  ;;  %1913 = vmatmul.msk.f32.vlgmr.msrb.gmra.mxu3 %vm253_vm0, %v2209_v16 }
  0x9d   : > { %v319_v48 = vpop.f32.mrf.mxu0  ;;  %v406_v49 = vpop.f32.mrf.mxu1 }
  0x9e   : > { %368 = vst.msk [vmem:[%s2440_s12] sm:$0xff] %vm367_vm1, %v319_v48  ;;  %v493_v50 = vpop.f32.mrf.mxu2 }
  0x9f   : > { %1733 = vst.msk [vmem:[%s2440_s12 + $0x80] sm:$0xff] %vm367_vm1, %v406_v49  ;;  %v580_v51 = vpop.f32.mrf.mxu3 }
  0xa0   : > { %1769 = vst.msk [vmem:[%s2440_s12 + $0x100] sm:$0xff] %vm367_vm1, %v493_v50  ;;  %1821 = vmatmul.msk.f32.vlgmr.msrb.gmra.mxu0 %vm253_vm0, %v2209_v16  ;;  %1841 = vmatmul.msk.f32.vlgmr.msrb.gmra.mxu1 %vm253_vm0, %v2209_v16 }
  0xa1   : > { %1805 = vst.msk [vmem:[%s2440_s12 + $0x180] sm:$0xff] %vm367_vm1, %v580_v51 }
  0xa4   : > { %1878 = vmatmul.msk.f32.gmra.mxu2 %vm253_vm0, %v2244_v25  ;;  %1914 = vmatmul.msk.f32.gmra.mxu3 %vm253_vm0, %v2244_v25 }
  0xa5   : > { %v322_v52 = vpop.f32.mrf.mxu0  ;;  %v409_v53 = vpop.f32.mrf.mxu1 }
  0xa6   : > { %369 = vst.msk [vmem:[%s2440_s12 + $0x8] sm:$0xff] %vm367_vm1, %v322_v52 }
  0xa7   : > { %1734 = vst.msk [vmem:[%s2440_s12 + $0x88] sm:$0xff] %vm367_vm1, %v409_v53  ;;  %v496_v54 = vpop.f32.mrf.mxu2  ;;  %v583_v55 = vpop.f32.mrf.mxu3 }
  0xa8   : > { %1770 = vst.msk [vmem:[%s2440_s12 + $0x108] sm:$0xff] %vm367_vm1, %v496_v54  ;;  %1822 = vmatmul.msk.f32.gmra.mxu0 %vm253_vm0, %v2244_v25  ;;  %1842 = vmatmul.msk.f32.gmra.mxu1 %vm253_vm0, %v2244_v25 }
  0xa9   : > { %1806 = vst.msk [vmem:[%s2440_s12 + $0x188] sm:$0xff] %vm367_vm1, %v583_v55 }
  0xac   : > { %1879 = vmatmul.msk.f32.gmra.mxu2 %vm253_vm0, %v2255_v26  ;;  %1915 = vmatmul.msk.f32.gmra.mxu3 %vm253_vm0, %v2255_v26 }
  0xad   : > { %v325_v56 = vpop.f32.mrf.mxu0  ;;  %v412_v57 = vpop.f32.mrf.mxu1 }
  0xae   : > { %370 = vst.msk [vmem:[%s2440_s12 + $0x10] sm:$0xff] %vm367_vm1, %v325_v56 }
  0xaf   : > { %1735 = vst.msk [vmem:[%s2440_s12 + $0x90] sm:$0xff] %vm367_vm1, %v412_v57  ;;  %v499_v58 = vpop.f32.mrf.mxu2  ;;  %v586_v59 = vpop.f32.mrf.mxu3 }
  0xb0   : > { %1771 = vst.msk [vmem:[%s2440_s12 + $0x110] sm:$0xff] %vm367_vm1, %v499_v58  ;;  %1823 = vmatmul.msk.f32.gmra.mxu0 %vm253_vm0, %v2255_v26  ;;  %1843 = vmatmul.msk.f32.gmra.mxu1 %vm253_vm0, %v2255_v26 }
  0xb1   : > { %1807 = vst.msk [vmem:[%s2440_s12 + $0x190] sm:$0xff] %vm367_vm1, %v586_v59 }
  0xb4   : > { %1880 = vmatmul.msk.f32.gmra.mxu2 %vm253_vm0, %v2266_v27  ;;  %1916 = vmatmul.msk.f32.gmra.mxu3 %vm253_vm0, %v2266_v27 }
  0xb5   : > { %v328_v60 = vpop.f32.mrf.mxu0  ;;  %v415_v61 = vpop.f32.mrf.mxu1 }
  0xb6   : > { %371 = vst.msk [vmem:[%s2440_s12 + $0x18] sm:$0xff] %vm367_vm1, %v328_v60 }
  0xb7   : > { %1736 = vst.msk [vmem:[%s2440_s12 + $0x98] sm:$0xff] %vm367_vm1, %v415_v61  ;;  %v502_v62 = vpop.f32.mrf.mxu2  ;;  %v589_v63 = vpop.f32.mrf.mxu3 }
  0xb8   : > { %1772 = vst.msk [vmem:[%s2440_s12 + $0x118] sm:$0xff] %vm367_vm1, %v502_v62  ;;  %1824 = vmatmul.msk.f32.gmra.mxu0 %vm253_vm0, %v2266_v27  ;;  %1844 = vmatmul.msk.f32.gmra.mxu1 %vm253_vm0, %v2266_v27 }
  0xb9   : > { %1808 = vst.msk [vmem:[%s2440_s12 + $0x198] sm:$0xff] %vm367_vm1, %v589_v63 }
  0xbc   : > { %1881 = vmatmul.msk.f32.gmra.mxu2 %vm253_vm0, %v2277_v28  ;;  %1917 = vmatmul.msk.f32.gmra.mxu3 %vm253_vm0, %v2277_v28 }
  0xbd   : > { %v331_v0 = vpop.f32.mrf.mxu0  ;;  %v418_v1 = vpop.f32.mrf.mxu1 }
  0xbe   : > { %372 = vst.msk [vmem:[%s2440_s12 + $0x20] sm:$0xff] %vm367_vm1, %v331_v0 }
  0xbf   : > { %1737 = vst.msk [vmem:[%s2440_s12 + $0xa0] sm:$0xff] %vm367_vm1, %v418_v1  ;;  %v505_v2 = vpop.f32.mrf.mxu2  ;;  %v592_v3 = vpop.f32.mrf.mxu3 }
  0xc0   : > { %1773 = vst.msk [vmem:[%s2440_s12 + $0x120] sm:$0xff] %vm367_vm1, %v505_v2  ;;  %1825 = vmatmul.msk.f32.gmra.mxu0 %vm253_vm0, %v2277_v28  ;;  %1845 = vmatmul.msk.f32.gmra.mxu1 %vm253_vm0, %v2277_v28 }
  0xc1   : > { %1809 = vst.msk [vmem:[%s2440_s12 + $0x1a0] sm:$0xff] %vm367_vm1, %v592_v3 }
  0xc4   : > { %1882 = vmatmul.msk.f32.gmra.mxu2 %vm253_vm0, %v2300_v33  ;;  %1918 = vmatmul.msk.f32.gmra.mxu3 %vm253_vm0, %v2300_v33 }
  0xc5   : > { %v334_v4 = vpop.f32.mrf.mxu0  ;;  %v421_v5 = vpop.f32.mrf.mxu1 }
  0xc6   : > { %373 = vst.msk [vmem:[%s2440_s12 + $0x28] sm:$0xff] %vm367_vm1, %v334_v4 }
  0xc7   : > { %1738 = vst.msk [vmem:[%s2440_s12 + $0xa8] sm:$0xff] %vm367_vm1, %v421_v5  ;;  %v508_v6 = vpop.f32.mrf.mxu2  ;;  %v595_v7 = vpop.f32.mrf.mxu3 }
  0xc8   : > { %1774 = vst.msk [vmem:[%s2440_s12 + $0x128] sm:$0xff] %vm367_vm1, %v508_v6  ;;  %1826 = vmatmul.msk.f32.gmra.mxu0 %vm253_vm0, %v2300_v33  ;;  %1846 = vmatmul.msk.f32.gmra.mxu1 %vm253_vm0, %v2300_v33 }
  0xc9   : > { %1810 = vst.msk [vmem:[%s2440_s12 + $0x1a8] sm:$0xff] %vm367_vm1, %v595_v7 }
  0xcc   : > { %1883 = vmatmul.msk.f32.gmra.mxu2 %vm253_vm0, %v2311_v34  ;;  %1919 = vmatmul.msk.f32.gmra.mxu3 %vm253_vm0, %v2311_v34 }
  0xcd   : > { %v337_v8 = vpop.f32.mrf.mxu0  ;;  %v424_v9 = vpop.f32.mrf.mxu1 }
  0xce   : > { %374 = vst.msk [vmem:[%s2440_s12 + $0x30] sm:$0xff] %vm367_vm1, %v337_v8 }
  0xcf   : > { %1739 = vst.msk [vmem:[%s2440_s12 + $0xb0] sm:$0xff] %vm367_vm1, %v424_v9  ;;  %v511_v10 = vpop.f32.mrf.mxu2  ;;  %v598_v11 = vpop.f32.mrf.mxu3 }
  0xd0   : > { %1775 = vst.msk [vmem:[%s2440_s12 + $0x130] sm:$0xff] %vm367_vm1, %v511_v10  ;;  %1827 = vmatmul.msk.f32.gmra.mxu0 %vm253_vm0, %v2311_v34  ;;  %1847 = vmatmul.msk.f32.gmra.mxu1 %vm253_vm0, %v2311_v34 }
  0xd1   : > { %1811 = vst.msk [vmem:[%s2440_s12 + $0x1b0] sm:$0xff] %vm367_vm1, %v598_v11 }
  0xd4   : > { %1884 = vmatmul.msk.f32.gmra.mxu2 %vm253_vm0, %v2322_v35  ;;  %1920 = vmatmul.msk.f32.gmra.mxu3 %vm253_vm0, %v2322_v35 }
  0xd5   : > { %v340_v12 = vpop.f32.mrf.mxu0  ;;  %v427_v13 = vpop.f32.mrf.mxu1 }
  0xd6   : > { %375 = vst.msk [vmem:[%s2440_s12 + $0x38] sm:$0xff] %vm367_vm1, %v340_v12 }
  0xd7   : > { %1740 = vst.msk [vmem:[%s2440_s12 + $0xb8] sm:$0xff] %vm367_vm1, %v427_v13  ;;  %v514_v14 = vpop.f32.mrf.mxu2  ;;  %v601_v15 = vpop.f32.mrf.mxu3 }
  0xd8   : > { %1776 = vst.msk [vmem:[%s2440_s12 + $0x138] sm:$0xff] %vm367_vm1, %v514_v14  ;;  %1828 = vmatmul.msk.f32.gmra.mxu0 %vm253_vm0, %v2322_v35  ;;  %1848 = vmatmul.msk.f32.gmra.mxu1 %vm253_vm0, %v2322_v35 }
  0xd9   : > { %1812 = vst.msk [vmem:[%s2440_s12 + $0x1b8] sm:$0xff] %vm367_vm1, %v601_v15 }
  0xdc   : > { %1885 = vmatmul.msk.f32.gmra.mxu2 %vm253_vm0, %v2333_v36  ;;  %1921 = vmatmul.msk.f32.gmra.mxu3 %vm253_vm0, %v2333_v36 }
  0xdd   : > { %v343_v16 = vpop.f32.mrf.mxu0  ;;  %v430_v17 = vpop.f32.mrf.mxu1 }
  0xde   : > { %376 = vst.msk [vmem:[%s2440_s12 + $0x40] sm:$0xff] %vm367_vm1, %v343_v16 }
  0xdf   : > { %1741 = vst.msk [vmem:[%s2440_s12 + $0xc0] sm:$0xff] %vm367_vm1, %v430_v17  ;;  %v517_v18 = vpop.f32.mrf.mxu2  ;;  %v604_v19 = vpop.f32.mrf.mxu3 }
  0xe0   : > { %1777 = vst.msk [vmem:[%s2440_s12 + $0x140] sm:$0xff] %vm367_vm1, %v517_v18  ;;  %1829 = vmatmul.msk.f32.gmra.mxu0 %vm253_vm0, %v2333_v36  ;;  %1849 = vmatmul.msk.f32.gmra.mxu1 %vm253_vm0, %v2333_v36 }
  0xe1   : > { %1813 = vst.msk [vmem:[%s2440_s12 + $0x1c0] sm:$0xff] %vm367_vm1, %v604_v19 }
  0xe4   : > { %1886 = vmatmul.msk.f32.gmra.mxu2 %vm253_vm0, %v2356_v41  ;;  %1922 = vmatmul.msk.f32.gmra.mxu3 %vm253_vm0, %v2356_v41 }
  0xe5   : > { %v346_v20 = vpop.f32.mrf.mxu0  ;;  %v433_v21 = vpop.f32.mrf.mxu1 }
  0xe6   : > { %377 = vst.msk [vmem:[%s2440_s12 + $0x48] sm:$0xff] %vm367_vm1, %v346_v20 }
  0xe7   : > { %1742 = vst.msk [vmem:[%s2440_s12 + $0xc8] sm:$0xff] %vm367_vm1, %v433_v21  ;;  %v520_v22 = vpop.f32.mrf.mxu2  ;;  %v607_v23 = vpop.f32.mrf.mxu3 }
  0xe8   : > { %1778 = vst.msk [vmem:[%s2440_s12 + $0x148] sm:$0xff] %vm367_vm1, %v520_v22  ;;  %1830 = vmatmul.msk.f32.gmra.mxu0 %vm253_vm0, %v2356_v41  ;;  %1850 = vmatmul.msk.f32.gmra.mxu1 %vm253_vm0, %v2356_v41 }
  0xe9   : > { %1814 = vst.msk [vmem:[%s2440_s12 + $0x1c8] sm:$0xff] %vm367_vm1, %v607_v23 }
  0xec   : > { %1887 = vmatmul.msk.f32.gmra.mxu2 %vm253_vm0, %v2367_v42  ;;  %1923 = vmatmul.msk.f32.gmra.mxu3 %vm253_vm0, %v2367_v42 }
  0xed   : > { %v349_v24 = vpop.f32.mrf.mxu0  ;;  %v436_v25 = vpop.f32.mrf.mxu1 }
  0xee   : > { %378 = vst.msk [vmem:[%s2440_s12 + $0x50] sm:$0xff] %vm367_vm1, %v349_v24 }
  0xef   : > { %1743 = vst.msk [vmem:[%s2440_s12 + $0xd0] sm:$0xff] %vm367_vm1, %v436_v25  ;;  %v523_v26 = vpop.f32.mrf.mxu2  ;;  %v610_v27 = vpop.f32.mrf.mxu3 }
  0xf0   : > { %1779 = vst.msk [vmem:[%s2440_s12 + $0x150] sm:$0xff] %vm367_vm1, %v523_v26  ;;  %1831 = vmatmul.msk.f32.gmra.mxu0 %vm253_vm0, %v2367_v42  ;;  %1851 = vmatmul.msk.f32.gmra.mxu1 %vm253_vm0, %v2367_v42 }
  0xf1   : > { %1815 = vst.msk [vmem:[%s2440_s12 + $0x1d0] sm:$0xff] %vm367_vm1, %v610_v27 }
  0xf4   : > { %1888 = vmatmul.msk.f32.gmra.mxu2 %vm253_vm0, %v2378_v43  ;;  %1924 = vmatmul.msk.f32.gmra.mxu3 %vm253_vm0, %v2378_v43 }
  0xf5   : > { %v352_v28 = vpop.f32.mrf.mxu0  ;;  %v439_v29 = vpop.f32.mrf.mxu1 }
  0xf6   : > { %379 = vst.msk [vmem:[%s2440_s12 + $0x58] sm:$0xff] %vm367_vm1, %v352_v28 }
  0xf7   : > { %1744 = vst.msk [vmem:[%s2440_s12 + $0xd8] sm:$0xff] %vm367_vm1, %v439_v29  ;;  %v526_v30 = vpop.f32.mrf.mxu2  ;;  %v613_v31 = vpop.f32.mrf.mxu3 }
  0xf8   : > { %1780 = vst.msk [vmem:[%s2440_s12 + $0x158] sm:$0xff] %vm367_vm1, %v526_v30  ;;  %1832 = vmatmul.msk.f32.gmra.mxu0 %vm253_vm0, %v2378_v43  ;;  %1852 = vmatmul.msk.f32.gmra.mxu1 %vm253_vm0, %v2378_v43 }
  0xf9   : > { %1816 = vst.msk [vmem:[%s2440_s12 + $0x1d8] sm:$0xff] %vm367_vm1, %v613_v31 }
  0xfc   : > { %1889 = vmatmul.msk.f32.gmra.mxu2 %vm253_vm0, %v2389_v44  ;;  %1925 = vmatmul.msk.f32.gmra.mxu3 %vm253_vm0, %v2389_v44 }
  0xfd   : > { %v355_v32 = vpop.f32.mrf.mxu0  ;;  %v442_v33 = vpop.f32.mrf.mxu1 }
  0xfe   : > { %380 = vst.msk [vmem:[%s2440_s12 + $0x60] sm:$0xff] %vm367_vm1, %v355_v32 }
  0xff   : > { %1745 = vst.msk [vmem:[%s2440_s12 + $0xe0] sm:$0xff] %vm367_vm1, %v442_v33  ;;  %v529_v34 = vpop.f32.mrf.mxu2  ;;  %v616_v35 = vpop.f32.mrf.mxu3 }
 0x100   : > { %1781 = vst.msk [vmem:[%s2440_s12 + $0x160] sm:$0xff] %vm367_vm1, %v529_v34  ;;  %1833 = vmatmul.msk.f32.gmra.mxu0 %vm253_vm0, %v2389_v44  ;;  %1853 = vmatmul.msk.f32.gmra.mxu1 %vm253_vm0, %v2389_v44 }
 0x101   : > { %1817 = vst.msk [vmem:[%s2440_s12 + $0x1e0] sm:$0xff] %vm367_vm1, %v616_v35 }
 0x104   : > { %1890 = vmatmul.msk.f32.gmra.mxu2 %vm253_vm0, %v2400_v45  ;;  %1926 = vmatmul.msk.f32.gmra.mxu3 %vm253_vm0, %v2400_v45 }
 0x105   : > { %v358_v36 = vpop.f32.mrf.mxu0  ;;  %v445_v37 = vpop.f32.mrf.mxu1 }
 0x106   : > { %381 = vst.msk [vmem:[%s2440_s12 + $0x68] sm:$0xff] %vm367_vm1, %v358_v36 }
 0x107   : > { %1746 = vst.msk [vmem:[%s2440_s12 + $0xe8] sm:$0xff] %vm367_vm1, %v445_v37  ;;  %v532_v38 = vpop.f32.mrf.mxu2  ;;  %v619_v39 = vpop.f32.mrf.mxu3 }
 0x108   : > { %1782 = vst.msk [vmem:[%s2440_s12 + $0x168] sm:$0xff] %vm367_vm1, %v532_v38  ;;  %1834 = vmatmul.msk.f32.gmra.mxu0 %vm253_vm0, %v2400_v45  ;;  %1854 = vmatmul.msk.f32.gmra.mxu1 %vm253_vm0, %v2400_v45 }
 0x109   : > { %1818 = vst.msk [vmem:[%s2440_s12 + $0x1e8] sm:$0xff] %vm367_vm1, %v619_v39 }
 0x10c   : > { %1891 = vmatmul.msk.f32.gmra.mxu2 %vm253_vm0, %v2411_v46  ;;  %1927 = vmatmul.msk.f32.gmra.mxu3 %vm253_vm0, %v2411_v46 }
 0x10d   : > { %v361_v40 = vpop.f32.mrf.mxu0  ;;  %v448_v41 = vpop.f32.mrf.mxu1 }
 0x10e   : > { %382 = vst.msk [vmem:[%s2440_s12 + $0x70] sm:$0xff] %vm367_vm1, %v361_v40 }
 0x10f   : > { %1747 = vst.msk [vmem:[%s2440_s12 + $0xf0] sm:$0xff] %vm367_vm1, %v448_v41  ;;  %v535_v42 = vpop.f32.mrf.mxu2  ;;  %v622_v43 = vpop.f32.mrf.mxu3 }
 0x110   : > { %1783 = vst.msk [vmem:[%s2440_s12 + $0x170] sm:$0xff] %vm367_vm1, %v535_v42  ;;  %1835 = vmatmul.msk.f32.gmra.mxu0 %vm253_vm0, %v2411_v46  ;;  %1855 = vmatmul.msk.f32.gmra.mxu1 %vm253_vm0, %v2411_v46 }
 0x111   : > { %1819 = vst.msk [vmem:[%s2440_s12 + $0x1f0] sm:$0xff] %vm367_vm1, %v622_v43 }
 0x114   : > { %1892 = vmatmul.msk.f32.gmra.mxu2 %vm253_vm0, %v2422_v47  ;;  %1928 = vmatmul.msk.f32.gmra.mxu3 %vm253_vm0, %v2422_v47 }
 0x115   : > { %v364_v44 = vpop.f32.mrf.mxu0  ;;  %v451_v45 = vpop.f32.mrf.mxu1 }
 0x116   : > { %383 = vst.msk [vmem:[%s2440_s12 + $0x78] sm:$0xff] %vm367_vm1, %v364_v44 }
 0x117   : > { %1748 = vst.msk [vmem:[%s2440_s12 + $0xf8] sm:$0xff] %vm367_vm1, %v451_v45  ;;  %v538_v48 = vpop.f32.mrf.mxu2  ;;  %v625_v49 = vpop.f32.mrf.mxu3 }
 0x118   : > { %1784 = vst.msk [vmem:[%s2440_s12 + $0x178] sm:$0xff] %vm367_vm1, %v538_v48  ;;  %1836 = vmatmul.msk.f32.gmra.mxu0 %vm253_vm0, %v2422_v47  ;;  %1856 = vmatmul.msk.f32.gmra.mxu1 %vm253_vm0, %v2422_v47 }
 0x119   : > { %1820 = vst.msk [vmem:[%s2440_s12 + $0x1f8] sm:$0xff] %vm367_vm1, %v625_v49 }
 0x11d   : > { %v666_v46 = vpop.f32.mrf.mxu0  ;;  %v752_v50 = vpop.f32.mrf.mxu1 }
 0x11e   : > { %714 = vst.msk [vmem:[%s2695_s15] sm:$0xff] %vm367_vm1, %v666_v46  ;;  %v1161_v46 = vld [vmem:[%s2440_s12] sm:$0xff] (%p2136_p5) }
 0x11f   : > { %1857 = vst.msk [vmem:[%s2695_s15 + $0x80] sm:$0xff] %vm367_vm1, %v752_v50  ;;  %v839_v47 = vpop.f32.mrf.mxu2  ;;  %v926_v51 = vpop.f32.mrf.mxu3  ;;  %v1163_v50 = vld [vmem:[%s2440_s12 + $0x8] sm:$0xff] (%p2136_p5) }
 0x120   : > { %1893 = vst.msk [vmem:[%s2695_s15 + $0x100] sm:$0xff] %vm367_vm1, %v839_v47  ;;  %v1165_v47 = vld [vmem:[%s2440_s12 + $0x10] sm:$0xff] (%p2136_p5) }
 0x121   : > { %1929 = vst.msk [vmem:[%s2695_s15 + $0x180] sm:$0xff] %vm367_vm1, %v926_v51  ;;  %v1167_v51 = vld [vmem:[%s2440_s12 + $0x18] sm:$0xff] (%p2136_p5) }
 0x122   : > { %1162 = vst [vmem:[%s2834_s13] sm:$0xff] (%p2136_p5), %v1161_v46 }
 0x123   : > { %1164 = vst [vmem:[%s2834_s13 + $0x8] sm:$0xff] (%p2136_p5), %v1163_v50 }
 0x124   : > { %1166 = vst [vmem:[%s2834_s13 + $0x10] sm:$0xff] (%p2136_p5), %v1165_v47 }
 0x125   : > { %v669_v52 = vpop.f32.mrf.mxu0  ;;  %v755_v53 = vpop.f32.mrf.mxu1  ;;  %1168 = vst [vmem:[%s2834_s13 + $0x18] sm:$0xff] (%p2136_p5), %v1167_v51 }
 0x126   : > { %715 = vst.msk [vmem:[%s2695_s15 + $0x8] sm:$0xff] %vm367_vm1, %v669_v52  ;;  %v1169_v52 = vld [vmem:[%s2440_s12 + $0x20] sm:$0xff] (%p2136_p5) }
 0x127   : > { %1858 = vst.msk [vmem:[%s2695_s15 + $0x88] sm:$0xff] %vm367_vm1, %v755_v53  ;;  %v842_v54 = vpop.f32.mrf.mxu2  ;;  %v929_v55 = vpop.f32.mrf.mxu3  ;;  %v1171_v53 = vld [vmem:[%s2440_s12 + $0x28] sm:$0xff] (%p2136_p5) }
 0x128   : > { %1894 = vst.msk [vmem:[%s2695_s15 + $0x108] sm:$0xff] %vm367_vm1, %v842_v54  ;;  %v1173_v54 = vld [vmem:[%s2440_s12 + $0x30] sm:$0xff] (%p2136_p5) }
 0x129   : > { %1930 = vst.msk [vmem:[%s2695_s15 + $0x188] sm:$0xff] %vm367_vm1, %v929_v55  ;;  %v1175_v55 = vld [vmem:[%s2440_s12 + $0x38] sm:$0xff] (%p2136_p5) }
 0x12a   : > { %1170 = vst [vmem:[%s2834_s13 + $0x20] sm:$0xff] (%p2136_p5), %v1169_v52 }
 0x12b   : > { %1172 = vst [vmem:[%s2834_s13 + $0x28] sm:$0xff] (%p2136_p5), %v1171_v53 }
 0x12c   : > { %1174 = vst [vmem:[%s2834_s13 + $0x30] sm:$0xff] (%p2136_p5), %v1173_v54 }
 0x12d   : > { %v672_v56 = vpop.f32.mrf.mxu0  ;;  %v758_v57 = vpop.f32.mrf.mxu1  ;;  %1176 = vst [vmem:[%s2834_s13 + $0x38] sm:$0xff] (%p2136_p5), %v1175_v55 }
 0x12e   : > { %716 = vst.msk [vmem:[%s2695_s15 + $0x10] sm:$0xff] %vm367_vm1, %v672_v56  ;;  %v1177_v56 = vld [vmem:[%s2440_s12 + $0x40] sm:$0xff] (%p2136_p5) }
 0x12f   : > { %1859 = vst.msk [vmem:[%s2695_s15 + $0x90] sm:$0xff] %vm367_vm1, %v758_v57  ;;  %v845_v58 = vpop.f32.mrf.mxu2  ;;  %v932_v59 = vpop.f32.mrf.mxu3  ;;  %v1179_v57 = vld [vmem:[%s2440_s12 + $0x48] sm:$0xff] (%p2136_p5) }
 0x130   : > { %1895 = vst.msk [vmem:[%s2695_s15 + $0x110] sm:$0xff] %vm367_vm1, %v845_v58  ;;  %v1181_v58 = vld [vmem:[%s2440_s12 + $0x50] sm:$0xff] (%p2136_p5) }
 0x131   : > { %1931 = vst.msk [vmem:[%s2695_s15 + $0x190] sm:$0xff] %vm367_vm1, %v932_v59  ;;  %v1183_v59 = vld [vmem:[%s2440_s12 + $0x58] sm:$0xff] (%p2136_p5) }
 0x132   : > { %1178 = vst [vmem:[%s2834_s13 + $0x40] sm:$0xff] (%p2136_p5), %v1177_v56 }
 0x133   : > { %1180 = vst [vmem:[%s2834_s13 + $0x48] sm:$0xff] (%p2136_p5), %v1179_v57 }
 0x134   : > { %1182 = vst [vmem:[%s2834_s13 + $0x50] sm:$0xff] (%p2136_p5), %v1181_v58 }
 0x135   : > { %v675_v60 = vpop.f32.mrf.mxu0  ;;  %v761_v61 = vpop.f32.mrf.mxu1  ;;  %1184 = vst [vmem:[%s2834_s13 + $0x58] sm:$0xff] (%p2136_p5), %v1183_v59 }
 0x136   : > { %717 = vst.msk [vmem:[%s2695_s15 + $0x18] sm:$0xff] %vm367_vm1, %v675_v60  ;;  %v1185_v60 = vld [vmem:[%s2440_s12 + $0x60] sm:$0xff] (%p2136_p5) }
 0x137   : > { %1860 = vst.msk [vmem:[%s2695_s15 + $0x98] sm:$0xff] %vm367_vm1, %v761_v61  ;;  %v848_v62 = vpop.f32.mrf.mxu2  ;;  %v935_v63 = vpop.f32.mrf.mxu3  ;;  %v1187_v61 = vld [vmem:[%s2440_s12 + $0x68] sm:$0xff] (%p2136_p5) }
 0x138   : > { %1896 = vst.msk [vmem:[%s2695_s15 + $0x118] sm:$0xff] %vm367_vm1, %v848_v62  ;;  %v1189_v62 = vld [vmem:[%s2440_s12 + $0x70] sm:$0xff] (%p2136_p5) }
 0x139   : > { %1932 = vst.msk [vmem:[%s2695_s15 + $0x198] sm:$0xff] %vm367_vm1, %v935_v63  ;;  %v1191_v63 = vld [vmem:[%s2440_s12 + $0x78] sm:$0xff] (%p2136_p5) }
 0x13a   : > { %1186 = vst [vmem:[%s2834_s13 + $0x60] sm:$0xff] (%p2136_p5), %v1185_v60 }
 0x13b   : > { %1188 = vst [vmem:[%s2834_s13 + $0x68] sm:$0xff] (%p2136_p5), %v1187_v61 }
 0x13c   : > { %1190 = vst [vmem:[%s2834_s13 + $0x70] sm:$0xff] (%p2136_p5), %v1189_v62 }
 0x13d   : > { %v678_v0 = vpop.f32.mrf.mxu0  ;;  %v764_v1 = vpop.f32.mrf.mxu1  ;;  %1192 = vst [vmem:[%s2834_s13 + $0x78] sm:$0xff] (%p2136_p5), %v1191_v63 }
 0x13e   : > { %718 = vst.msk [vmem:[%s2695_s15 + $0x20] sm:$0xff] %vm367_vm1, %v678_v0  ;;  %v1193_v0 = vld [vmem:[%s2440_s12 + $0x80] sm:$0xff] (%p2136_p5) }
 0x13f   : > { %1861 = vst.msk [vmem:[%s2695_s15 + $0xa0] sm:$0xff] %vm367_vm1, %v764_v1  ;;  %v851_v2 = vpop.f32.mrf.mxu2  ;;  %v938_v3 = vpop.f32.mrf.mxu3  ;;  %v1195_v1 = vld [vmem:[%s2440_s12 + $0x88] sm:$0xff] (%p2136_p5) }
 0x140   : > { %1897 = vst.msk [vmem:[%s2695_s15 + $0x120] sm:$0xff] %vm367_vm1, %v851_v2  ;;  %v1197_v2 = vld [vmem:[%s2440_s12 + $0x90] sm:$0xff] (%p2136_p5) }
 0x141   : > { %1933 = vst.msk [vmem:[%s2695_s15 + $0x1a0] sm:$0xff] %vm367_vm1, %v938_v3  ;;  %v1199_v3 = vld [vmem:[%s2440_s12 + $0x98] sm:$0xff] (%p2136_p5) }
 0x142   : > { %1194 = vst [vmem:[%s2834_s13 + $0x100] sm:$0xff] (%p2136_p5), %v1193_v0 }
 0x143   : > { %1196 = vst [vmem:[%s2834_s13 + $0x108] sm:$0xff] (%p2136_p5), %v1195_v1 }
 0x144   : > { %1198 = vst [vmem:[%s2834_s13 + $0x110] sm:$0xff] (%p2136_p5), %v1197_v2 }
 0x145   : > { %v681_v4 = vpop.f32.mrf.mxu0  ;;  %v767_v5 = vpop.f32.mrf.mxu1  ;;  %1200 = vst [vmem:[%s2834_s13 + $0x118] sm:$0xff] (%p2136_p5), %v1199_v3 }
 0x146   : > { %719 = vst.msk [vmem:[%s2695_s15 + $0x28] sm:$0xff] %vm367_vm1, %v681_v4  ;;  %v1201_v4 = vld [vmem:[%s2440_s12 + $0xa0] sm:$0xff] (%p2136_p5) }
 0x147   : > { %1862 = vst.msk [vmem:[%s2695_s15 + $0xa8] sm:$0xff] %vm367_vm1, %v767_v5  ;;  %v854_v6 = vpop.f32.mrf.mxu2  ;;  %v941_v7 = vpop.f32.mrf.mxu3  ;;  %v1203_v5 = vld [vmem:[%s2440_s12 + $0xa8] sm:$0xff] (%p2136_p5) }
 0x148   : > { %1898 = vst.msk [vmem:[%s2695_s15 + $0x128] sm:$0xff] %vm367_vm1, %v854_v6  ;;  %v1205_v6 = vld [vmem:[%s2440_s12 + $0xb0] sm:$0xff] (%p2136_p5) }
 0x149   : > { %1934 = vst.msk [vmem:[%s2695_s15 + $0x1a8] sm:$0xff] %vm367_vm1, %v941_v7  ;;  %v1207_v7 = vld [vmem:[%s2440_s12 + $0xb8] sm:$0xff] (%p2136_p5) }
 0x14a   : > { %1202 = vst [vmem:[%s2834_s13 + $0x120] sm:$0xff] (%p2136_p5), %v1201_v4 }
 0x14b   : > { %1204 = vst [vmem:[%s2834_s13 + $0x128] sm:$0xff] (%p2136_p5), %v1203_v5 }
 0x14c   : > { %1206 = vst [vmem:[%s2834_s13 + $0x130] sm:$0xff] (%p2136_p5), %v1205_v6 }
 0x14d   : > { %v684_v8 = vpop.f32.mrf.mxu0  ;;  %v770_v9 = vpop.f32.mrf.mxu1  ;;  %1208 = vst [vmem:[%s2834_s13 + $0x138] sm:$0xff] (%p2136_p5), %v1207_v7 }
 0x14e   : > { %720 = vst.msk [vmem:[%s2695_s15 + $0x30] sm:$0xff] %vm367_vm1, %v684_v8  ;;  %v1209_v8 = vld [vmem:[%s2440_s12 + $0xc0] sm:$0xff] (%p2136_p5) }
 0x14f   : > { %1863 = vst.msk [vmem:[%s2695_s15 + $0xb0] sm:$0xff] %vm367_vm1, %v770_v9  ;;  %v857_v10 = vpop.f32.mrf.mxu2  ;;  %v944_v11 = vpop.f32.mrf.mxu3  ;;  %v1211_v9 = vld [vmem:[%s2440_s12 + $0xc8] sm:$0xff] (%p2136_p5) }
 0x150   : > { %1899 = vst.msk [vmem:[%s2695_s15 + $0x130] sm:$0xff] %vm367_vm1, %v857_v10  ;;  %v1213_v10 = vld [vmem:[%s2440_s12 + $0xd0] sm:$0xff] (%p2136_p5) }
 0x151   : > { %1935 = vst.msk [vmem:[%s2695_s15 + $0x1b0] sm:$0xff] %vm367_vm1, %v944_v11  ;;  %v1215_v11 = vld [vmem:[%s2440_s12 + $0xd8] sm:$0xff] (%p2136_p5) }
 0x152   : > { %1210 = vst [vmem:[%s2834_s13 + $0x140] sm:$0xff] (%p2136_p5), %v1209_v8 }
 0x153   : > { %1212 = vst [vmem:[%s2834_s13 + $0x148] sm:$0xff] (%p2136_p5), %v1211_v9 }
 0x154   : > { %1214 = vst [vmem:[%s2834_s13 + $0x150] sm:$0xff] (%p2136_p5), %v1213_v10 }
 0x155   : > { %v687_v12 = vpop.f32.mrf.mxu0  ;;  %v773_v13 = vpop.f32.mrf.mxu1  ;;  %1216 = vst [vmem:[%s2834_s13 + $0x158] sm:$0xff] (%p2136_p5), %v1215_v11 }
 0x156   : > { %721 = vst.msk [vmem:[%s2695_s15 + $0x38] sm:$0xff] %vm367_vm1, %v687_v12  ;;  %v1217_v12 = vld [vmem:[%s2440_s12 + $0xe0] sm:$0xff] (%p2136_p5) }
 0x157   : > { %1864 = vst.msk [vmem:[%s2695_s15 + $0xb8] sm:$0xff] %vm367_vm1, %v773_v13  ;;  %v860_v14 = vpop.f32.mrf.mxu2  ;;  %v947_v15 = vpop.f32.mrf.mxu3  ;;  %v1219_v13 = vld [vmem:[%s2440_s12 + $0xe8] sm:$0xff] (%p2136_p5) }
 0x158   : > { %1900 = vst.msk [vmem:[%s2695_s15 + $0x138] sm:$0xff] %vm367_vm1, %v860_v14  ;;  %v1221_v14 = vld [vmem:[%s2440_s12 + $0xf0] sm:$0xff] (%p2136_p5) }
 0x159   : > { %1936 = vst.msk [vmem:[%s2695_s15 + $0x1b8] sm:$0xff] %vm367_vm1, %v947_v15  ;;  %v1223_v15 = vld [vmem:[%s2440_s12 + $0xf8] sm:$0xff] (%p2136_p5) }
 0x15a   : > { %1218 = vst [vmem:[%s2834_s13 + $0x160] sm:$0xff] (%p2136_p5), %v1217_v12 }
 0x15b   : > { %1220 = vst [vmem:[%s2834_s13 + $0x168] sm:$0xff] (%p2136_p5), %v1219_v13 }
 0x15c   : > { %1222 = vst [vmem:[%s2834_s13 + $0x170] sm:$0xff] (%p2136_p5), %v1221_v14 }
 0x15d   : > { %v690_v16 = vpop.f32.mrf.mxu0  ;;  %v776_v17 = vpop.f32.mrf.mxu1  ;;  %1224 = vst [vmem:[%s2834_s13 + $0x178] sm:$0xff] (%p2136_p5), %v1223_v15 }
 0x15e   : > { %722 = vst.msk [vmem:[%s2695_s15 + $0x40] sm:$0xff] %vm367_vm1, %v690_v16  ;;  %v1225_v16 = vld [vmem:[%s2440_s12 + $0x100] sm:$0xff] (%p2136_p5) }
 0x15f   : > { %1865 = vst.msk [vmem:[%s2695_s15 + $0xc0] sm:$0xff] %vm367_vm1, %v776_v17  ;;  %v863_v18 = vpop.f32.mrf.mxu2  ;;  %v950_v19 = vpop.f32.mrf.mxu3  ;;  %v1227_v17 = vld [vmem:[%s2440_s12 + $0x108] sm:$0xff] (%p2136_p5) }
 0x160   : > { %1901 = vst.msk [vmem:[%s2695_s15 + $0x140] sm:$0xff] %vm367_vm1, %v863_v18  ;;  %v1229_v18 = vld [vmem:[%s2440_s12 + $0x110] sm:$0xff] (%p2136_p5) }
 0x161   : > { %1937 = vst.msk [vmem:[%s2695_s15 + $0x1c0] sm:$0xff] %vm367_vm1, %v950_v19  ;;  %v1231_v19 = vld [vmem:[%s2440_s12 + $0x118] sm:$0xff] (%p2136_p5) }
 0x162   : > { %1226 = vst [vmem:[%s2834_s13 + $0x200] sm:$0xff] (%p2136_p5), %v1225_v16 }
 0x163   : > { %1228 = vst [vmem:[%s2834_s13 + $0x208] sm:$0xff] (%p2136_p5), %v1227_v17 }
 0x164   : > { %1230 = vst [vmem:[%s2834_s13 + $0x210] sm:$0xff] (%p2136_p5), %v1229_v18 }
 0x165   : > { %v693_v20 = vpop.f32.mrf.mxu0  ;;  %v779_v21 = vpop.f32.mrf.mxu1  ;;  %1232 = vst [vmem:[%s2834_s13 + $0x218] sm:$0xff] (%p2136_p5), %v1231_v19 }
 0x166   : > { %723 = vst.msk [vmem:[%s2695_s15 + $0x48] sm:$0xff] %vm367_vm1, %v693_v20  ;;  %v1233_v20 = vld [vmem:[%s2440_s12 + $0x120] sm:$0xff] (%p2136_p5) }
 0x167   : > { %1866 = vst.msk [vmem:[%s2695_s15 + $0xc8] sm:$0xff] %vm367_vm1, %v779_v21  ;;  %v866_v22 = vpop.f32.mrf.mxu2  ;;  %v953_v23 = vpop.f32.mrf.mxu3  ;;  %v1235_v21 = vld [vmem:[%s2440_s12 + $0x128] sm:$0xff] (%p2136_p5) }
 0x168   : > { %1902 = vst.msk [vmem:[%s2695_s15 + $0x148] sm:$0xff] %vm367_vm1, %v866_v22  ;;  %v1237_v22 = vld [vmem:[%s2440_s12 + $0x130] sm:$0xff] (%p2136_p5) }
 0x169   : > { %1938 = vst.msk [vmem:[%s2695_s15 + $0x1c8] sm:$0xff] %vm367_vm1, %v953_v23  ;;  %v1239_v23 = vld [vmem:[%s2440_s12 + $0x138] sm:$0xff] (%p2136_p5) }
 0x16a   : > { %1234 = vst [vmem:[%s2834_s13 + $0x220] sm:$0xff] (%p2136_p5), %v1233_v20 }
 0x16b   : > { %1236 = vst [vmem:[%s2834_s13 + $0x228] sm:$0xff] (%p2136_p5), %v1235_v21 }
 0x16c   : > { %1238 = vst [vmem:[%s2834_s13 + $0x230] sm:$0xff] (%p2136_p5), %v1237_v22 }
 0x16d   : > { %v696_v24 = vpop.f32.mrf.mxu0  ;;  %v782_v25 = vpop.f32.mrf.mxu1  ;;  %1240 = vst [vmem:[%s2834_s13 + $0x238] sm:$0xff] (%p2136_p5), %v1239_v23 }
 0x16e   : > { %724 = vst.msk [vmem:[%s2695_s15 + $0x50] sm:$0xff] %vm367_vm1, %v696_v24  ;;  %v1241_v24 = vld [vmem:[%s2440_s12 + $0x140] sm:$0xff] (%p2136_p5) }
 0x16f   : > { %1867 = vst.msk [vmem:[%s2695_s15 + $0xd0] sm:$0xff] %vm367_vm1, %v782_v25  ;;  %v869_v26 = vpop.f32.mrf.mxu2  ;;  %v956_v27 = vpop.f32.mrf.mxu3  ;;  %v1243_v25 = vld [vmem:[%s2440_s12 + $0x148] sm:$0xff] (%p2136_p5) }
 0x170   : > { %1903 = vst.msk [vmem:[%s2695_s15 + $0x150] sm:$0xff] %vm367_vm1, %v869_v26  ;;  %v1245_v26 = vld [vmem:[%s2440_s12 + $0x150] sm:$0xff] (%p2136_p5) }
 0x171   : > { %1939 = vst.msk [vmem:[%s2695_s15 + $0x1d0] sm:$0xff] %vm367_vm1, %v956_v27  ;;  %v1247_v27 = vld [vmem:[%s2440_s12 + $0x158] sm:$0xff] (%p2136_p5) }
 0x172   : > { %1242 = vst [vmem:[%s2834_s13 + $0x240] sm:$0xff] (%p2136_p5), %v1241_v24 }
 0x173   : > { %1244 = vst [vmem:[%s2834_s13 + $0x248] sm:$0xff] (%p2136_p5), %v1243_v25 }
 0x174   : > { %1246 = vst [vmem:[%s2834_s13 + $0x250] sm:$0xff] (%p2136_p5), %v1245_v26 }
 0x175   : > { %v699_v28 = vpop.f32.mrf.mxu0  ;;  %v785_v29 = vpop.f32.mrf.mxu1  ;;  %1248 = vst [vmem:[%s2834_s13 + $0x258] sm:$0xff] (%p2136_p5), %v1247_v27 }
 0x176   : > { %725 = vst.msk [vmem:[%s2695_s15 + $0x58] sm:$0xff] %vm367_vm1, %v699_v28  ;;  %v1249_v28 = vld [vmem:[%s2440_s12 + $0x160] sm:$0xff] (%p2136_p5) }
 0x177   : > { %1868 = vst.msk [vmem:[%s2695_s15 + $0xd8] sm:$0xff] %vm367_vm1, %v785_v29  ;;  %v872_v30 = vpop.f32.mrf.mxu2  ;;  %v959_v31 = vpop.f32.mrf.mxu3  ;;  %v1251_v29 = vld [vmem:[%s2440_s12 + $0x168] sm:$0xff] (%p2136_p5) }
 0x178   : > { %1904 = vst.msk [vmem:[%s2695_s15 + $0x158] sm:$0xff] %vm367_vm1, %v872_v30  ;;  %v1253_v30 = vld [vmem:[%s2440_s12 + $0x170] sm:$0xff] (%p2136_p5) }
 0x179   : > { %1940 = vst.msk [vmem:[%s2695_s15 + $0x1d8] sm:$0xff] %vm367_vm1, %v959_v31  ;;  %v1255_v31 = vld [vmem:[%s2440_s12 + $0x178] sm:$0xff] (%p2136_p5) }
 0x17a   : > { %1250 = vst [vmem:[%s2834_s13 + $0x260] sm:$0xff] (%p2136_p5), %v1249_v28 }
 0x17b   : > { %1252 = vst [vmem:[%s2834_s13 + $0x268] sm:$0xff] (%p2136_p5), %v1251_v29 }
 0x17c   : > { %1254 = vst [vmem:[%s2834_s13 + $0x270] sm:$0xff] (%p2136_p5), %v1253_v30 }
 0x17d   : > { %v702_v32 = vpop.f32.mrf.mxu0  ;;  %v788_v33 = vpop.f32.mrf.mxu1  ;;  %1256 = vst [vmem:[%s2834_s13 + $0x278] sm:$0xff] (%p2136_p5), %v1255_v31 }
 0x17e   : > { %726 = vst.msk [vmem:[%s2695_s15 + $0x60] sm:$0xff] %vm367_vm1, %v702_v32  ;;  %v1257_v32 = vld [vmem:[%s2440_s12 + $0x180] sm:$0xff] (%p2136_p5) }
 0x17f   : > { %1869 = vst.msk [vmem:[%s2695_s15 + $0xe0] sm:$0xff] %vm367_vm1, %v788_v33  ;;  %v875_v34 = vpop.f32.mrf.mxu2  ;;  %v962_v35 = vpop.f32.mrf.mxu3  ;;  %v1259_v33 = vld [vmem:[%s2440_s12 + $0x188] sm:$0xff] (%p2136_p5) }
 0x180   : > { %1905 = vst.msk [vmem:[%s2695_s15 + $0x160] sm:$0xff] %vm367_vm1, %v875_v34  ;;  %v1261_v34 = vld [vmem:[%s2440_s12 + $0x190] sm:$0xff] (%p2136_p5) }
 0x181   : > { %1941 = vst.msk [vmem:[%s2695_s15 + $0x1e0] sm:$0xff] %vm367_vm1, %v962_v35  ;;  %v1263_v35 = vld [vmem:[%s2440_s12 + $0x198] sm:$0xff] (%p2136_p5) }
 0x182   : > { %1258 = vst [vmem:[%s2834_s13 + $0x300] sm:$0xff] (%p2136_p5), %v1257_v32 }
 0x183   : > { %1260 = vst [vmem:[%s2834_s13 + $0x308] sm:$0xff] (%p2136_p5), %v1259_v33 }
 0x184   : > { %1262 = vst [vmem:[%s2834_s13 + $0x310] sm:$0xff] (%p2136_p5), %v1261_v34 }
 0x185   : > { %v705_v36 = vpop.f32.mrf.mxu0  ;;  %v791_v37 = vpop.f32.mrf.mxu1  ;;  %1264 = vst [vmem:[%s2834_s13 + $0x318] sm:$0xff] (%p2136_p5), %v1263_v35 }
 0x186   : > { %727 = vst.msk [vmem:[%s2695_s15 + $0x68] sm:$0xff] %vm367_vm1, %v705_v36  ;;  %v1265_v36 = vld [vmem:[%s2440_s12 + $0x1a0] sm:$0xff] (%p2136_p5) }
 0x187   : > { %1870 = vst.msk [vmem:[%s2695_s15 + $0xe8] sm:$0xff] %vm367_vm1, %v791_v37  ;;  %v878_v38 = vpop.f32.mrf.mxu2  ;;  %v965_v39 = vpop.f32.mrf.mxu3  ;;  %v1267_v37 = vld [vmem:[%s2440_s12 + $0x1a8] sm:$0xff] (%p2136_p5) }
 0x188   : > { %1906 = vst.msk [vmem:[%s2695_s15 + $0x168] sm:$0xff] %vm367_vm1, %v878_v38  ;;  %v1269_v38 = vld [vmem:[%s2440_s12 + $0x1b0] sm:$0xff] (%p2136_p5) }
 0x189   : > { %1942 = vst.msk [vmem:[%s2695_s15 + $0x1e8] sm:$0xff] %vm367_vm1, %v965_v39  ;;  %v1271_v39 = vld [vmem:[%s2440_s12 + $0x1b8] sm:$0xff] (%p2136_p5) }
 0x18a   : > { %1266 = vst [vmem:[%s2834_s13 + $0x320] sm:$0xff] (%p2136_p5), %v1265_v36 }
 0x18b   : > { %1268 = vst [vmem:[%s2834_s13 + $0x328] sm:$0xff] (%p2136_p5), %v1267_v37 }
 0x18c   : > { %1270 = vst [vmem:[%s2834_s13 + $0x330] sm:$0xff] (%p2136_p5), %v1269_v38 }
 0x18d   : > { %v708_v40 = vpop.f32.mrf.mxu0  ;;  %v794_v41 = vpop.f32.mrf.mxu1  ;;  %1272 = vst [vmem:[%s2834_s13 + $0x338] sm:$0xff] (%p2136_p5), %v1271_v39 }
 0x18e   : > { %728 = vst.msk [vmem:[%s2695_s15 + $0x70] sm:$0xff] %vm367_vm1, %v708_v40  ;;  %v1273_v40 = vld [vmem:[%s2440_s12 + $0x1c0] sm:$0xff] (%p2136_p5) }
 0x18f   : > { %1871 = vst.msk [vmem:[%s2695_s15 + $0xf0] sm:$0xff] %vm367_vm1, %v794_v41  ;;  %v881_v42 = vpop.f32.mrf.mxu2  ;;  %v968_v43 = vpop.f32.mrf.mxu3  ;;  %v1275_v41 = vld [vmem:[%s2440_s12 + $0x1c8] sm:$0xff] (%p2136_p5) }
 0x190   : > { %1907 = vst.msk [vmem:[%s2695_s15 + $0x170] sm:$0xff] %vm367_vm1, %v881_v42  ;;  %v1277_v42 = vld [vmem:[%s2440_s12 + $0x1d0] sm:$0xff] (%p2136_p5) }
 0x191   : > { %1943 = vst.msk [vmem:[%s2695_s15 + $0x1f0] sm:$0xff] %vm367_vm1, %v968_v43  ;;  %v1279_v43 = vld [vmem:[%s2440_s12 + $0x1d8] sm:$0xff] (%p2136_p5) }
 0x192   : > { %1274 = vst [vmem:[%s2834_s13 + $0x340] sm:$0xff] (%p2136_p5), %v1273_v40 }
 0x193   : > { %1276 = vst [vmem:[%s2834_s13 + $0x348] sm:$0xff] (%p2136_p5), %v1275_v41 }
 0x194   : > { %1278 = vst [vmem:[%s2834_s13 + $0x350] sm:$0xff] (%p2136_p5), %v1277_v42 }
 0x195   : > { %v711_v44 = vpop.f32.mrf.mxu0  ;;  %v797_v45 = vpop.f32.mrf.mxu1  ;;  %1001 = sbr.rel (!%p2136_p5) target bundleno = 414 (0x19e), region = 36  ;;  %1280 = vst [vmem:[%s2834_s13 + $0x358] sm:$0xff] (%p2136_p5), %v1279_v43 }
 0x196   : > { %729 = vst.msk [vmem:[%s2695_s15 + $0x78] sm:$0xff] %vm367_vm1, %v711_v44  ;;  %v1281_v44 = vld [vmem:[%s2440_s12 + $0x1e0] sm:$0xff] (%p2136_p5) }
 0x197   : > { %1872 = vst.msk [vmem:[%s2695_s15 + $0xf8] sm:$0xff] %vm367_vm1, %v797_v45  ;;  %v884_v48 = vpop.f32.mrf.mxu2  ;;  %v971_v49 = vpop.f32.mrf.mxu3  ;;  %v1283_v45 = vld [vmem:[%s2440_s12 + $0x1e8] sm:$0xff] (%p2136_p5) }
 0x198   : > { %1908 = vst.msk [vmem:[%s2695_s15 + $0x178] sm:$0xff] %vm367_vm1, %v884_v48  ;;  %v1285_v48 = vld [vmem:[%s2440_s12 + $0x1f0] sm:$0xff] (%p2136_p5) }
 0x199   : > { %1944 = vst.msk [vmem:[%s2695_s15 + $0x1f8] sm:$0xff] %vm367_vm1, %v971_v49  ;;  %v1287_v49 = vld [vmem:[%s2440_s12 + $0x1f8] sm:$0xff] (%p2136_p5) }
 0x19a   : > { %1282 = vst [vmem:[%s2834_s13 + $0x360] sm:$0xff] %v1281_v44 }
 0x19b   : > { %1284 = vst [vmem:[%s2834_s13 + $0x368] sm:$0xff] %v1283_v45 }
 0x19c   : > { %1286 = vst [vmem:[%s2834_s13 + $0x370] sm:$0xff] %v1285_v48 }
 0x19d   : > { %1288 = vst [vmem:[%s2834_s13 + $0x378] sm:$0xff] %v1287_v49 }
 0x19e PF: > { %1294 = sbr.rel (!%p2136_p5) target bundleno = 482 (0x1e2), region = 74  ;;  %s1951_s14 = sshll.u32 (%p2136_p5), %s2053_s18, 7  ;;  %v1454_v46 = vld [vmem:[%s2695_s15] sm:$0xff] (%p2136_p5)  ;;  %v1456_v50 = vld [vmem:[%s2695_s15 + $0x8] sm:$0xff] (%p2136_p5)  ;;  %v1458_v47 = vld [vmem:[%s2695_s15 + $0x10] sm:$0xff] (%p2136_p5) }
 0x19f   : > { %s1297_s24 = sadd.s32 (%p2136_p5), %s1951_s14, %s2158_s11  ;;  %v1460_v51 = vld [vmem:[%s2695_s15 + $0x18] sm:$0xff] (%p2136_p5)  ;;  %v1462_v52 = vld [vmem:[%s2695_s15 + $0x20] sm:$0xff] (%p2136_p5)  ;;  %v1464_v53 = vld [vmem:[%s2695_s15 + $0x28] sm:$0xff] (%p2136_p5) }
 0x1a0   : > { %s1952_s25 = sshll.u32 (%p2136_p5), %s1297_s24, 3  ;;  %v1466_v54 = vld [vmem:[%s2695_s15 + $0x30] sm:$0xff] (%p2136_p5)  ;;  %v1468_v55 = vld [vmem:[%s2695_s15 + $0x38] sm:$0xff] (%p2136_p5)  ;;  %v1470_v56 = vld [vmem:[%s2695_s15 + $0x40] sm:$0xff] (%p2136_p5) }
 0x1a1   : > { %s2971_s26 = scalar_lea.vmem (%p2136_p5), %s3124_s4, %s1952_s25  ;;  %v1472_v57 = vld [vmem:[%s2695_s15 + $0x48] sm:$0xff] (%p2136_p5)  ;;  %v1474_v58 = vld [vmem:[%s2695_s15 + $0x50] sm:$0xff] (%p2136_p5)  ;;  %v1476_v59 = vld [vmem:[%s2695_s15 + $0x58] sm:$0xff] (%p2136_p5) }
 0x1a2   : > { %1455 = vst [vmem:[%s2971_s26] sm:$0xff] (%p2136_p5), %v1454_v46  ;;  %v1478_v60 = vld [vmem:[%s2695_s15 + $0x60] sm:$0xff] (%p2136_p5)  ;;  %v1480_v61 = vld [vmem:[%s2695_s15 + $0x68] sm:$0xff] (%p2136_p5)  ;;  %v1482_v62 = vld [vmem:[%s2695_s15 + $0x70] sm:$0xff] (%p2136_p5) }
 0x1a3   : > { %1457 = vst [vmem:[%s2971_s26 + $0x8] sm:$0xff] %v1456_v50  ;;  %v1484_v63 = vld [vmem:[%s2695_s15 + $0x78] sm:$0xff]  ;;  %v1486_v0 = vld [vmem:[%s2695_s15 + $0x80] sm:$0xff]  ;;  %v1488_v1 = vld [vmem:[%s2695_s15 + $0x88] sm:$0xff] }
 0x1a4   : > { %1459 = vst [vmem:[%s2971_s26 + $0x10] sm:$0xff] %v1458_v47  ;;  %v1490_v2 = vld [vmem:[%s2695_s15 + $0x90] sm:$0xff]  ;;  %v1492_v3 = vld [vmem:[%s2695_s15 + $0x98] sm:$0xff]  ;;  %v1494_v4 = vld [vmem:[%s2695_s15 + $0xa0] sm:$0xff] }
 0x1a5   : > { %1461 = vst [vmem:[%s2971_s26 + $0x18] sm:$0xff] %v1460_v51  ;;  %v1496_v5 = vld [vmem:[%s2695_s15 + $0xa8] sm:$0xff]  ;;  %v1498_v6 = vld [vmem:[%s2695_s15 + $0xb0] sm:$0xff]  ;;  %v1500_v7 = vld [vmem:[%s2695_s15 + $0xb8] sm:$0xff] }
 0x1a6   : > { %1463 = vst [vmem:[%s2971_s26 + $0x20] sm:$0xff] %v1462_v52  ;;  %v1502_v8 = vld [vmem:[%s2695_s15 + $0xc0] sm:$0xff]  ;;  %v1504_v9 = vld [vmem:[%s2695_s15 + $0xc8] sm:$0xff]  ;;  %v1506_v10 = vld [vmem:[%s2695_s15 + $0xd0] sm:$0xff] }
 0x1a7   : > { %1465 = vst [vmem:[%s2971_s26 + $0x28] sm:$0xff] %v1464_v53  ;;  %v1508_v11 = vld [vmem:[%s2695_s15 + $0xd8] sm:$0xff]  ;;  %v1510_v12 = vld [vmem:[%s2695_s15 + $0xe0] sm:$0xff]  ;;  %v1512_v13 = vld [vmem:[%s2695_s15 + $0xe8] sm:$0xff] }
 0x1a8   : > { %1467 = vst [vmem:[%s2971_s26 + $0x30] sm:$0xff] %v1466_v54  ;;  %v1514_v14 = vld [vmem:[%s2695_s15 + $0xf0] sm:$0xff]  ;;  %v1516_v15 = vld [vmem:[%s2695_s15 + $0xf8] sm:$0xff]  ;;  %v1518_v16 = vld [vmem:[%s2695_s15 + $0x100] sm:$0xff] }
 0x1a9   : > { %1469 = vst [vmem:[%s2971_s26 + $0x38] sm:$0xff] %v1468_v55  ;;  %v1520_v17 = vld [vmem:[%s2695_s15 + $0x108] sm:$0xff]  ;;  %v1522_v18 = vld [vmem:[%s2695_s15 + $0x110] sm:$0xff]  ;;  %v1524_v19 = vld [vmem:[%s2695_s15 + $0x118] sm:$0xff] }
 0x1aa   : > { %1471 = vst [vmem:[%s2971_s26 + $0x40] sm:$0xff] %v1470_v56  ;;  %v1526_v20 = vld [vmem:[%s2695_s15 + $0x120] sm:$0xff]  ;;  %v1528_v21 = vld [vmem:[%s2695_s15 + $0x128] sm:$0xff]  ;;  %v1530_v22 = vld [vmem:[%s2695_s15 + $0x130] sm:$0xff] }
 0x1ab   : > { %1473 = vst [vmem:[%s2971_s26 + $0x48] sm:$0xff] %v1472_v57  ;;  %v1532_v23 = vld [vmem:[%s2695_s15 + $0x138] sm:$0xff]  ;;  %v1534_v24 = vld [vmem:[%s2695_s15 + $0x140] sm:$0xff]  ;;  %v1536_v25 = vld [vmem:[%s2695_s15 + $0x148] sm:$0xff] }
 0x1ac   : > { %1475 = vst [vmem:[%s2971_s26 + $0x50] sm:$0xff] %v1474_v58  ;;  %v1538_v26 = vld [vmem:[%s2695_s15 + $0x150] sm:$0xff]  ;;  %v1540_v27 = vld [vmem:[%s2695_s15 + $0x158] sm:$0xff]  ;;  %v1542_v28 = vld [vmem:[%s2695_s15 + $0x160] sm:$0xff] }
 0x1ad   : > { %1477 = vst [vmem:[%s2971_s26 + $0x58] sm:$0xff] %v1476_v59  ;;  %v1544_v29 = vld [vmem:[%s2695_s15 + $0x168] sm:$0xff]  ;;  %v1546_v30 = vld [vmem:[%s2695_s15 + $0x170] sm:$0xff]  ;;  %v1548_v31 = vld [vmem:[%s2695_s15 + $0x178] sm:$0xff] }
 0x1ae   : > { %1479 = vst [vmem:[%s2971_s26 + $0x60] sm:$0xff] %v1478_v60  ;;  %v1550_v32 = vld [vmem:[%s2695_s15 + $0x180] sm:$0xff]  ;;  %v1552_v33 = vld [vmem:[%s2695_s15 + $0x188] sm:$0xff]  ;;  %v1554_v34 = vld [vmem:[%s2695_s15 + $0x190] sm:$0xff] }
 0x1af   : > { %1481 = vst [vmem:[%s2971_s26 + $0x68] sm:$0xff] %v1480_v61  ;;  %v1556_v35 = vld [vmem:[%s2695_s15 + $0x198] sm:$0xff]  ;;  %v1558_v36 = vld [vmem:[%s2695_s15 + $0x1a0] sm:$0xff]  ;;  %v1560_v37 = vld [vmem:[%s2695_s15 + $0x1a8] sm:$0xff] }
 0x1b0   : > { %1483 = vst [vmem:[%s2971_s26 + $0x70] sm:$0xff] %v1482_v62  ;;  %v1562_v38 = vld [vmem:[%s2695_s15 + $0x1b0] sm:$0xff]  ;;  %v1564_v39 = vld [vmem:[%s2695_s15 + $0x1b8] sm:$0xff]  ;;  %v1566_v40 = vld [vmem:[%s2695_s15 + $0x1c0] sm:$0xff] }
 0x1b1   : > { %1485 = vst [vmem:[%s2971_s26 + $0x78] sm:$0xff] %v1484_v63  ;;  %v1568_v41 = vld [vmem:[%s2695_s15 + $0x1c8] sm:$0xff]  ;;  %v1570_v42 = vld [vmem:[%s2695_s15 + $0x1d0] sm:$0xff]  ;;  %v1572_v43 = vld [vmem:[%s2695_s15 + $0x1d8] sm:$0xff] }
 0x1b2   : > { %1487 = vst [vmem:[%s2971_s26 + $0x100] sm:$0xff] %v1486_v0  ;;  %v1574_v44 = vld [vmem:[%s2695_s15 + $0x1e0] sm:$0xff]  ;;  %v1576_v45 = vld [vmem:[%s2695_s15 + $0x1e8] sm:$0xff]  ;;  %v1578_v48 = vld [vmem:[%s2695_s15 + $0x1f0] sm:$0xff] }
 0x1b3   : > { %1489 = vst [vmem:[%s2971_s26 + $0x108] sm:$0xff] %v1488_v1  ;;  %v1580_v49 = vld [vmem:[%s2695_s15 + $0x1f8] sm:$0xff] }
 0x1b4   : > { %1491 = vst [vmem:[%s2971_s26 + $0x110] sm:$0xff] %v1490_v2 }
 0x1b5   : > { %1493 = vst [vmem:[%s2971_s26 + $0x118] sm:$0xff] %v1492_v3 }
 0x1b6   : > { %1495 = vst [vmem:[%s2971_s26 + $0x120] sm:$0xff] %v1494_v4 }
 0x1b7   : > { %1497 = vst [vmem:[%s2971_s26 + $0x128] sm:$0xff] %v1496_v5 }
 0x1b8   : > { %1499 = vst [vmem:[%s2971_s26 + $0x130] sm:$0xff] %v1498_v6 }
 0x1b9   : > { %1501 = vst [vmem:[%s2971_s26 + $0x138] sm:$0xff] %v1500_v7 }
 0x1ba   : > { %1503 = vst [vmem:[%s2971_s26 + $0x140] sm:$0xff] %v1502_v8 }
 0x1bb   : > { %1505 = vst [vmem:[%s2971_s26 + $0x148] sm:$0xff] %v1504_v9 }
 0x1bc   : > { %1507 = vst [vmem:[%s2971_s26 + $0x150] sm:$0xff] %v1506_v10 }
 0x1bd   : > { %1509 = vst [vmem:[%s2971_s26 + $0x158] sm:$0xff] %v1508_v11 }
 0x1be   : > { %1511 = vst [vmem:[%s2971_s26 + $0x160] sm:$0xff] %v1510_v12 }
 0x1bf   : > { %1513 = vst [vmem:[%s2971_s26 + $0x168] sm:$0xff] %v1512_v13 }
 0x1c0   : > { %1515 = vst [vmem:[%s2971_s26 + $0x170] sm:$0xff] %v1514_v14 }
 0x1c1   : > { %1517 = vst [vmem:[%s2971_s26 + $0x178] sm:$0xff] %v1516_v15 }
 0x1c2   : > { %1519 = vst [vmem:[%s2971_s26 + $0x200] sm:$0xff] %v1518_v16 }
 0x1c3   : > { %1521 = vst [vmem:[%s2971_s26 + $0x208] sm:$0xff] %v1520_v17 }
 0x1c4   : > { %1523 = vst [vmem:[%s2971_s26 + $0x210] sm:$0xff] %v1522_v18 }
 0x1c5   : > { %1525 = vst [vmem:[%s2971_s26 + $0x218] sm:$0xff] %v1524_v19 }
 0x1c6   : > { %1527 = vst [vmem:[%s2971_s26 + $0x220] sm:$0xff] %v1526_v20 }
 0x1c7   : > { %1529 = vst [vmem:[%s2971_s26 + $0x228] sm:$0xff] %v1528_v21 }
 0x1c8   : > { %1531 = vst [vmem:[%s2971_s26 + $0x230] sm:$0xff] %v1530_v22 }
 0x1c9   : > { %1533 = vst [vmem:[%s2971_s26 + $0x238] sm:$0xff] %v1532_v23 }
 0x1ca   : > { %1535 = vst [vmem:[%s2971_s26 + $0x240] sm:$0xff] %v1534_v24 }
 0x1cb   : > { %1537 = vst [vmem:[%s2971_s26 + $0x248] sm:$0xff] %v1536_v25 }
 0x1cc   : > { %1539 = vst [vmem:[%s2971_s26 + $0x250] sm:$0xff] %v1538_v26 }
 0x1cd   : > { %1541 = vst [vmem:[%s2971_s26 + $0x258] sm:$0xff] %v1540_v27 }
 0x1ce   : > { %1543 = vst [vmem:[%s2971_s26 + $0x260] sm:$0xff] %v1542_v28 }
 0x1cf   : > { %1545 = vst [vmem:[%s2971_s26 + $0x268] sm:$0xff] %v1544_v29 }
 0x1d0   : > { %1547 = vst [vmem:[%s2971_s26 + $0x270] sm:$0xff] %v1546_v30 }
 0x1d1   : > { %1549 = vst [vmem:[%s2971_s26 + $0x278] sm:$0xff] %v1548_v31 }
 0x1d2   : > { %1551 = vst [vmem:[%s2971_s26 + $0x300] sm:$0xff] %v1550_v32 }
 0x1d3   : > { %1553 = vst [vmem:[%s2971_s26 + $0x308] sm:$0xff] %v1552_v33 }
 0x1d4   : > { %1555 = vst [vmem:[%s2971_s26 + $0x310] sm:$0xff] %v1554_v34 }
 0x1d5   : > { %1557 = vst [vmem:[%s2971_s26 + $0x318] sm:$0xff] %v1556_v35 }
 0x1d6   : > { %1559 = vst [vmem:[%s2971_s26 + $0x320] sm:$0xff] %v1558_v36 }
 0x1d7   : > { %1561 = vst [vmem:[%s2971_s26 + $0x328] sm:$0xff] %v1560_v37 }
 0x1d8   : > { %1563 = vst [vmem:[%s2971_s26 + $0x330] sm:$0xff] %v1562_v38 }
 0x1d9   : > { %1565 = vst [vmem:[%s2971_s26 + $0x338] sm:$0xff] %v1564_v39 }
 0x1da   : > { %1567 = vst [vmem:[%s2971_s26 + $0x340] sm:$0xff] %v1566_v40 }
 0x1db   : > { %1569 = vst [vmem:[%s2971_s26 + $0x348] sm:$0xff] %v1568_v41 }
 0x1dc   : > { %1571 = vst [vmem:[%s2971_s26 + $0x350] sm:$0xff] %v1570_v42 }
 0x1dd   : > { %1573 = vst [vmem:[%s2971_s26 + $0x358] sm:$0xff] %v1572_v43 }
 0x1de   : > { %1575 = vst [vmem:[%s2971_s26 + $0x360] sm:$0xff] %v1574_v44 }
 0x1df   : > { %1577 = vst [vmem:[%s2971_s26 + $0x368] sm:$0xff] %v1576_v45 }
 0x1e0   : > { %1579 = vst [vmem:[%s2971_s26 + $0x370] sm:$0xff] %v1578_v48 }
 0x1e1   : > { %1581 = vst [vmem:[%s2971_s26 + $0x378] sm:$0xff] %v1580_v49 }
 0x1e2 PF: > { %s15_s21 = sadd.s32 1, %s2065_s21   ;;  %s3126_s15 = smov %s2045_s16 }
 0x1e3   : > { %p12_p11 = scmp.ge.s32.totalorder %s15_s21, 6   ;;  %s3127_s16 = smov %s2147_s30 }
 0x1e4   : > { %s3128_s17 = smov %s2057_s19  ;;  %s3129_s18 = smov %s2061_s20 }
 0x1e5   : > { %s3130_s19 = smov %s3133_s22  ;;  %s3131_s20 = smov %s3137_s23 }
 0x1e6   :  { %14 = sbr.rel (!%p12_p11) target bundleno = 4 (0x4), region = 162 }

</bundles_post_ra>
